<compile_context>
chip_gen: v6e
topology: v6e:2x2x1
jax: 0.10.0
libtpu: 0.0.40
codegen_flags: <defaults>
</compile_context>

<pallas_src>
import jax
import jax.numpy as jnp
from jax import lax
from jax.experimental import pallas as pl
from jax.experimental.pallas import tpu as pltpu


# ----------------------------------------------------------------------------
# Kernel 1: SeqAttnMatch + drnn_input concat, whole batch in one call.
#   xp = relu(x W^T + b); yp = relu(y W^T + b)
#   alpha = softmax_Lq(mask(xp yp^T)); matched = alpha @ y
#   out   = concat([x, matched, x1_f], axis=-1)
# ----------------------------------------------------------------------------
def _seq_attn_concat_kernel(x_ref, y_ref, f_ref, ymask_ref, wT_ref, b_ref, out_ref):
    B, Ld, D = x_ref.shape
    Lq = y_ref.shape[1]
    nf = f_ref.shape[2]
    x = x_ref[...]
    y = y_ref[...]
    wT = wT_ref[...]                                   # (D, D) bf16
    b = b_ref[...]                                     # (1, D) f32
    xp = jnp.maximum(
        jnp.dot(x.reshape(B * Ld, D).astype(jnp.bfloat16), wT,
                preferred_element_type=jnp.float32) + b, 0.0).reshape(B, Ld, D)
    yp = jnp.maximum(
        jnp.dot(y.reshape(B * Lq, D).astype(jnp.bfloat16), wT,
                preferred_element_type=jnp.float32) + b, 0.0).reshape(B, Lq, D)
    scores = jnp.einsum("bld,bqd->blq", xp.astype(jnp.bfloat16),
                        yp.astype(jnp.bfloat16),
                        preferred_element_type=jnp.float32)      # (B, Ld, Lq)
    mask = ymask_ref[...]                              # (B, 1, Lq); 1.0 == pad
    scores = jnp.where(mask > 0.0, jnp.float32(-1e30), scores)   # finite mask
    m = jnp.max(scores, axis=-1, keepdims=True)
    e = jnp.exp(scores - m)
    alpha = e * pl.reciprocal(jnp.sum(e, axis=-1, keepdims=True), approx=True)
    matched = jnp.einsum("blq,bqd->bld", alpha.astype(jnp.bfloat16),
                         y.astype(jnp.bfloat16),
                         preferred_element_type=jnp.float32)     # (B, Ld, D)
    out_ref[:, :, :D] = x
    out_ref[:, :, D:2 * D] = matched
    out_ref[:, :, 2 * D:2 * D + nf] = f_ref[...]


def qemb_match_concat(x_emb, y_emb, y_mask, x_feat, W, b):
    B, Ld, D = x_emb.shape
    Lq = y_emb.shape[1]
    nf = x_feat.shape[2]
    Dout = 2 * D + nf
    return pl.pallas_call(
        _seq_attn_concat_kernel,
        grid=(1,),
        out_shape=jax.ShapeDtypeStruct((B, Ld, Dout), jnp.float32),
        in_specs=[
            pl.BlockSpec((B, Ld, D), lambda i: (0, 0, 0)),
            pl.BlockSpec((B, Lq, D), lambda i: (0, 0, 0)),
            pl.BlockSpec((B, Ld, nf), lambda i: (0, 0, 0)),
            pl.BlockSpec((B, 1, Lq), lambda i: (0, 0, 0)),
            pl.BlockSpec((D, D), lambda i: (0, 0)),
            pl.BlockSpec((1, D), lambda i: (0, 0)),
        ],
        out_specs=pl.BlockSpec((B, Ld, Dout), lambda i: (0, 0, 0)),
        compiler_params=pltpu.CompilerParams(dimension_semantics=("arbitrary",)),
    )(x_emb, y_emb, x_feat,
      y_mask.reshape(B, 1, Lq).astype(jnp.float32),
      W.T.astype(jnp.bfloat16), b.reshape(1, D))


# ----------------------------------------------------------------------------
# Kernel 2: fused StackedBRNN (all layers, both directions, concat_layers).
#   Per layer: hoisted input projection x @ [W_ih_f | W_ih_b]^T + (b_ih+b_hh),
#   then one fori_loop doing fwd(t) and bwd(T-1-t) together:
#     h = tanh(xproj[t] + h @ W_hh^T)
#   Layer outputs are written into lane-slices of the (T, B, L*2H) output ref,
#   which also serves as the next layer's VMEM-resident input.
# ----------------------------------------------------------------------------
def _make_stacked_brnn_kernel(num_layers, T, B, H):
    C2 = 2 * H

    def kernel(*refs):
        x_ref = refs[0]
        out_ref = refs[1 + 4 * num_layers]
        xf_ref = refs[2 + 4 * num_layers]      # (T, B, H) scratch, fwd lane
        xb_ref = refs[3 + 4 * num_layers]      # (T, B, H) scratch, bwd lane

        for l in range(num_layers):
            wih_ref, whhf_ref, whhb_ref, b_ref = refs[1 + 4 * l: 5 + 4 * l]
            base = l * C2
            if l == 0:
                din = x_ref.shape[2]
                inp = x_ref[...].reshape(T * B, din)
            else:
                inp = out_ref[:, :, base - C2:base].reshape(T * B, C2)
            # Hoisted input projection (one big MXU op instead of T tiny ones).
            proj = jnp.dot(inp.astype(jnp.bfloat16), wih_ref[...],
                           preferred_element_type=jnp.float32) + b_ref[...]
            xf_ref[...] = proj[:, :H].reshape(T, B, H)
            xb_ref[...] = proj[:, H:].reshape(T, B, H)
            whhf = whhf_ref[...]               # (H, H) bf16
            whhb = whhb_ref[...]               # (H, H) bf16

            def step(t, carry, whhf=whhf, whhb=whhb):
                hf, hb = carry
                tb = T - 1 - t
                hf32 = jnp.tanh(xf_ref[t] +
                                jnp.dot(hf, whhf, preferred_element_type=jnp.float32))
                hb32 = jnp.tanh(xb_ref[tb] +
                                jnp.dot(hb, whhb, preferred_element_type=jnp.float32))
                xf_ref[t] = hf32               # reuse projection scratch as output
                xb_ref[tb] = hb32
                return hf32.astype(jnp.bfloat16), hb32.astype(jnp.bfloat16)

            h0 = jnp.zeros((B, H), jnp.bfloat16)
            lax.fori_loop(0, T, step, (h0, h0))
            out_ref[:, :, base:base + H] = xf_ref[...]
            out_ref[:, :, base + H:base + C2] = xb_ref[...]

    return kernel


def stacked_brnn(x_btd, layer_params):
    """x_btd (B, T, Din) -> (B, T, num_layers*2H) with concat_layers=True."""
    B, T, Din0 = x_btd.shape
    H = layer_params[0]["w_hh_f"].shape[0]
    C2 = 2 * H
    L = len(layer_params)
    x_tbd = jnp.transpose(x_btd, (1, 0, 2))            # single entry transpose

    inputs = [x_tbd]
    in_specs = [pl.BlockSpec((T, B, Din0), lambda i: (0, 0, 0))]
    for l, p in enumerate(layer_params):
        din = Din0 if l == 0 else C2
        wih = jnp.concatenate([p["w_ih_f"].T, p["w_ih_b"].T],
                              axis=1).astype(jnp.bfloat16)           # (din, 2H)
        whhf = p["w_hh_f"].T.astype(jnp.bfloat16)
        whhb = p["w_hh_b"].T.astype(jnp.bfloat16)
        bias = jnp.concatenate([p["b_ih_f"] + p["b_hh_f"],
                                p["b_ih_b"] + p["b_hh_b"]]).reshape(1, C2)
        inputs += [wih, whhf, whhb, bias]
        in_specs += [pl.BlockSpec((din, C2), lambda i: (0, 0)),
                     pl.BlockSpec((H, H), lambda i: (0, 0)),
                     pl.BlockSpec((H, H), lambda i: (0, 0)),
                     pl.BlockSpec((1, C2), lambda i: (0, 0))]

    out = pl.pallas_call(
        _make_stacked_brnn_kernel(L, T, B, H),
        grid=(1,),
        out_shape=jax.ShapeDtypeStruct((T, B, L * C2), jnp.float32),
        in_specs=in_specs,
        out_specs=pl.BlockSpec((T, B, L * C2), lambda i: (0, 0, 0)),
        scratch_shapes=[pltpu.VMEM((T, B, H), jnp.float32),
                        pltpu.VMEM((T, B, H), jnp.float32)],
        compiler_params=pltpu.CompilerParams(
            dimension_semantics=("arbitrary",),
            vmem_limit_bytes=64 * 1024 * 1024),
    )(*inputs)
    return jnp.transpose(out, (1, 0, 2))               # single exit transpose


# ----------------------------------------------------------------------------
# Kernel 3: question merge ('avg') + BilinearSeqAttn + fused sentence select.
#   q_hidden = uniform_weights(q_mask) @ question_hiddens           (guarded)
#   Wy = q_hidden W^T + b
#   wscore[b,t]  = doc[b,t] . Wy[b]
#   scores[b,s]  = sel[b,s,:] . wscore[b,:]   (sel = 0.5*(onehot(s)+onehot(e)))
#   out = softmax_Ls(mask(scores))            (normalize=True, eval -> softmax)
# ----------------------------------------------------------------------------
def _answer_kernel(doc_ref, qh_ref, qmask_ref, smask_ref, sel_ref,
                   wT_ref, b_ref, out_ref):
    qh = qh_ref[...]                                   # (B, Lq, Hq)
    qmask = qmask_ref[...]                             # (B, Lq)
    alpha = 1.0 - qmask                                # uniform_weights
    denom = jnp.maximum(jnp.sum(alpha, axis=-1, keepdims=True), 1.0)  # NaN guard
    alpha = alpha / denom
    q_hidden = jnp.sum(alpha[:, :, None] * qh, axis=1)               # (B, Hq)
    wy = jnp.dot(q_hidden.astype(jnp.bfloat16), wT_ref[...],
                 preferred_element_type=jnp.float32) + b_ref[...]    # (B, Hd)
    wscore = jnp.sum(doc_ref[...] * wy[:, None, :], axis=-1)         # (B, Ld)
    scores = jnp.sum(sel_ref[...] * wscore[:, None, :], axis=-1)     # (B, Ls)
    scores = jnp.where(smask_ref[...] > 0.0, jnp.float32(-1e30), scores)
    m = jnp.max(scores, axis=-1, keepdims=True)
    e = jnp.exp(scores - m)
    out_ref[...] = e / jnp.sum(e, axis=-1, keepdims=True)


def answer_scores(doc_h, q_h, q_mask, s_mask, sent_s, sent_e, W, b):
    B, Ld, Hd = doc_h.shape
    Lq, Hq = q_h.shape[1], q_h.shape[2]
    Ls = sent_s.shape[1]
    # Selection matrix encodes index_select(start)+index_select(end) then mean.
    sel = 0.5 * (jax.nn.one_hot(sent_s, Ld, dtype=jnp.float32) +
                 jax.nn.one_hot(sent_e, Ld, dtype=jnp.float32))      # (B, Ls, Ld)
    return pl.pallas_call(
        _answer_kernel,
        grid=(1,),
        out_shape=jax.ShapeDtypeStruct((B, Ls), jnp.float32),
        in_specs=[
            pl.BlockSpec((B, Ld, Hd), lambda i: (0, 0, 0)),
            pl.BlockSpec((B, Lq, Hq), lambda i: (0, 0, 0)),
            pl.BlockSpec((B, Lq), lambda i: (0, 0)),
            pl.BlockSpec((B, Ls), lambda i: (0, 0)),
            pl.BlockSpec((B, Ls, Ld), lambda i: (0, 0, 0)),
            pl.BlockSpec((Hq, Hd), lambda i: (0, 0)),
            pl.BlockSpec((1, Hd), lambda i: (0, 0)),
        ],
        out_specs=pl.BlockSpec((B, Ls), lambda i: (0, 0)),
        compiler_params=pltpu.CompilerParams(dimension_semantics=("arbitrary",)),
    )(doc_h, q_h, q_mask.astype(jnp.float32), s_mask.astype(jnp.float32),
      sel, W.T.astype(jnp.bfloat16), b.reshape(1, Hd))


# ----------------------------------------------------------------------------
# Full forward
# ----------------------------------------------------------------------------
def rnn_doc_reader_forward(params, x1, x1_f, x1_mask, x2, x2_mask,
                           x1_sentence_s, x1_sentence_e, x1_sentence_mask):
    emb = params["embedding"]
    x1_emb = emb[x1]                                   # (B, Ld, D)  XLA gather
    x2_emb = emb[x2]                                   # (B, Lq, D)

    # use_qemb + num_features: fused SeqAttnMatch + drnn_input concat (kernel 1)
    drnn_input = qemb_match_concat(x1_emb, x2_emb, x2_mask, x1_f,
                                   params["qemb_W"], params["qemb_b"])

    # TODO(synk): x1_mask unused -> unpadded StackedBRNN path only.
    doc_hiddens_wordlevel = stacked_brnn(drnn_input, params["doc_rnn"])   # (B,Ld,128)
    question_hiddens = stacked_brnn(x2_emb, params["question_rnn"])       # (B,Lq,128)

    # question_merge='avg' + get_doc_sent mean + BilinearSeqAttn (kernel 3)
    start_scores = answer_scores(doc_hiddens_wordlevel, question_hiddens,
                                 x2_mask, x1_sentence_mask,
                                 x1_sentence_s, x1_sentence_e,
                                 params["start_W"], params["start_b"])
    return start_scores


# ----------------------------------------------------------------------------
# Deterministic parameter construction
# ----------------------------------------------------------------------------
def _normal(key, shape, scale=0.1):
    return scale * jax.random.normal(key, shape, dtype=jnp.float32)


def make_rnn_layer_params(key, in_dim, hidden):
    ks = jax.random.split(key, 8)
    return dict(
        w_ih_f=_normal(ks[0], (hidden, in_dim)),
        w_hh_f=_normal(ks[1], (hidden, hidden)),
        b_ih_f=_normal(ks[2], (hidden,)),
        b_hh_f=_normal(ks[3], (hidden,)),
        w_ih_b=_normal(ks[4], (hidden, in_dim)),
        w_hh_b=_normal(ks[5], (hidden, hidden)),
        b_ih_b=_normal(ks[6], (hidden,)),
        b_hh_b=_normal(ks[7], (hidden,)),
    )


if __name__ == "__main__":
    B, Ld, Lq, Ls = 2, 16, 8, 4
    vocab_size, embedding_dim, num_features = 100, 32, 4
    hidden_size, doc_layers, question_layers = 32, 2, 2

    key = jax.random.PRNGKey(0)
    (k_emb, k_qw, k_qb, k_doc0, k_doc1, k_q0, k_q1,
     k_sw, k_sb, k_x1, k_x2, k_x1f, k_ss, k_se) = jax.random.split(key, 14)

    emb = _normal(k_emb, (vocab_size, embedding_dim))
    emb = emb.at[0].set(0.0)                            # padding_idx=0

    doc_in = embedding_dim + embedding_dim + num_features   # use_qemb + features
    doc_hidden_size = 2 * hidden_size * doc_layers           # concat_rnn_layers
    q_hidden_size = 2 * hidden_size * question_layers

    params = dict(
        embedding=emb,
        qemb_W=_normal(k_qw, (embedding_dim, embedding_dim)),
        qemb_b=_normal(k_qb, (embedding_dim,)),
        doc_rnn=[
            make_rnn_layer_params(k_doc0, doc_in, hidden_size),
            make_rnn_layer_params(k_doc1, 2 * hidden_size, hidden_size),
        ],
        question_rnn=[
            make_rnn_layer_params(k_q0, embedding_dim, hidden_size),
            make_rnn_layer_params(k_q1, 2 * hidden_size, hidden_size),
        ],
        start_W=_normal(k_sw, (doc_hidden_size, q_hidden_size)),
        start_b=_normal(k_sb, (doc_hidden_size,)),
    )

    x1 = jax.random.randint(k_x1, (B, Ld), 1, vocab_size, dtype=jnp.int32)
    x2 = jax.random.randint(k_x2, (B, Lq), 1, vocab_size, dtype=jnp.int32)
    x1_f = _normal(k_x1f, (B, Ld, num_features), scale=1.0)
    x1_mask = jnp.zeros((B, Ld), jnp.float32)           # no padding
    x2_mask = jnp.zeros((B, Lq), jnp.float32)
    x1_sentence_s = jax.random.randint(k_ss, (B, Ls), 0, Ld, dtype=jnp.int32)
    x1_sentence_e = jax.random.randint(k_se, (B, Ls), 0, Ld, dtype=jnp.int32)
    x1_sentence_mask = jnp.zeros((B, Ls), jnp.float32)

    fwd = jax.jit(rnn_doc_reader_forward)
    start_scores = fwd(params, x1, x1_f, x1_mask, x2, x2_mask,
                       x1_sentence_s, x1_sentence_e, x1_sentence_mask)
    start_scores = jax.block_until_ready(start_scores)

    assert start_scores.shape == (B, Ls)
    assert bool(jnp.all(jnp.isfinite(start_scores)))
    row_sums = jnp.sum(start_scores, axis=-1)
    assert bool(jnp.all(jnp.abs(row_sums - 1.0) < 1e-4)), row_sums
    print("KERNEL_OK")
</pallas_src>

<mosaic_0001>
module attributes {stable_mosaic.version = 11 : i64} {
  func.func @_seq_attn_concat_kernel(%arg0: i32, %arg1: memref<2x16x32xf32, #tpu.memory_space<vmem>>, %arg2: memref<2x8x32xf32, #tpu.memory_space<vmem>>, %arg3: memref<2x16x4xf32, #tpu.memory_space<vmem>>, %arg4: memref<2x1x8xf32, #tpu.memory_space<vmem>>, %arg5: memref<32x32xbf16, #tpu.memory_space<vmem>>, %arg6: memref<1x32xf32, #tpu.memory_space<vmem>>, %arg7: memref<2x16x68xf32, #tpu.memory_space<vmem>>) attributes {dimension_semantics = [#tpu.dimension_semantics<arbitrary>], iteration_bounds = array<i64: 1>, scalar_prefetch = 0 : i64, scratch_operands = 0 : i64, tpu.core_type = #tpu.core_type<tc>, window_params = [{pipeline_mode = #tpu.pipeline_mode<synchronous>, transform_indices = @transform_0, window_bounds = array<i64: 2, 16, 32>}, {pipeline_mode = #tpu.pipeline_mode<synchronous>, transform_indices = @transform_1, window_bounds = array<i64: 2, 8, 32>}, {pipeline_mode = #tpu.pipeline_mode<synchronous>, transform_indices = @transform_2, window_bounds = array<i64: 2, 16, 4>}, {pipeline_mode = #tpu.pipeline_mode<synchronous>, transform_indices = @transform_3, window_bounds = array<i64: 2, 1, 8>}, {pipeline_mode = #tpu.pipeline_mode<synchronous>, transform_indices = @transform_4, window_bounds = array<i64: 32, 32>}, {pipeline_mode = #tpu.pipeline_mode<synchronous>, transform_indices = @transform_5, window_bounds = array<i64: 1, 32>}, {pipeline_mode = #tpu.pipeline_mode<synchronous>, transform_indices = @transform_6, window_bounds = array<i64: 2, 16, 68>}]} {
    %c0 = arith.constant 0 : index
    %c0_0 = arith.constant 0 : index
    %c0_1 = arith.constant 0 : index
    %0 = vector.load %arg1[%c0, %c0_0, %c0_1] : memref<2x16x32xf32, #tpu.memory_space<vmem>>, vector<2x16x32xf32>
    %c0_2 = arith.constant 0 : index
    %c0_3 = arith.constant 0 : index
    %c0_4 = arith.constant 0 : index
    %1 = vector.load %arg2[%c0_2, %c0_3, %c0_4] : memref<2x8x32xf32, #tpu.memory_space<vmem>>, vector<2x8x32xf32>
    %c0_5 = arith.constant 0 : index
    %c0_6 = arith.constant 0 : index
    %2 = vector.load %arg5[%c0_5, %c0_6] : memref<32x32xbf16, #tpu.memory_space<vmem>>, vector<32x32xbf16>
    %c0_7 = arith.constant 0 : index
    %c0_8 = arith.constant 0 : index
    %3 = vector.load %arg6[%c0_7, %c0_8] : memref<1x32xf32, #tpu.memory_space<vmem>>, vector<1x32xf32>
    %4 = vector.shape_cast %0 : vector<2x16x32xf32> to vector<32x32xf32>
    %5 = arith.truncf %4 : vector<32x32xf32> to vector<32x32xbf16>
    %cst = arith.constant dense<0.000000e+00> : vector<32x32xf32>
    %6 = tpu.matmul %5, %2, %cst {dimension_numbers = #tpu.dot_dimension_numbers<[1], [0], [0], [1], [0, 0, 1, 1], [], []>} : vector<32x32xbf16>, vector<32x32xbf16>, vector<32x32xf32> -> vector<32x32xf32>
    %7 = vector.broadcast %3 : vector<1x32xf32> to vector<32x32xf32>
    %8 = arith.addf %6, %7 : vector<32x32xf32>
    %cst_9 = arith.constant 0.000000e+00 : f32
    %9 = vector.broadcast %cst_9 : f32 to vector<32x32xf32>
    %10 = arith.maximumf %8, %9 : vector<32x32xf32>
    %11 = vector.shape_cast %10 : vector<32x32xf32> to vector<2x16x32xf32>
    %12 = vector.shape_cast %1 : vector<2x8x32xf32> to vector<16x32xf32>
    %13 = arith.truncf %12 : vector<16x32xf32> to vector<16x32xbf16>
    %cst_10 = arith.constant dense<0.000000e+00> : vector<16x32xf32>
    %14 = tpu.matmul %13, %2, %cst_10 {dimension_numbers = #tpu.dot_dimension_numbers<[1], [0], [0], [1], [0, 0, 1, 1], [], []>} : vector<16x32xbf16>, vector<32x32xbf16>, vector<16x32xf32> -> vector<16x32xf32>
    %15 = vector.broadcast %3 : vector<1x32xf32> to vector<16x32xf32>
    %16 = arith.addf %14, %15 : vector<16x32xf32>
    %cst_11 = arith.constant 0.000000e+00 : f32
    %17 = vector.broadcast %cst_11 : f32 to vector<16x32xf32>
    %18 = arith.maximumf %16, %17 : vector<16x32xf32>
    %19 = vector.shape_cast %18 : vector<16x32xf32> to vector<2x8x32xf32>
    %20 = arith.truncf %11 : vector<2x16x32xf32> to vector<2x16x32xbf16>
    %21 = arith.truncf %19 : vector<2x8x32xf32> to vector<2x8x32xbf16>
    "tpu.trace_start"() <{level = 10 : i32, message = "bld,bqd->blq"}> : () -> ()
    %cst_12 = arith.constant dense<0.000000e+00> : vector<2x16x8xf32>
    %22 = tpu.matmul %20, %21, %cst_12 {dimension_numbers = #tpu.dot_dimension_numbers<[2], [2], [1], [1], [0, 0, 0, 1, 1, 1], [0], [0]>} : vector<2x16x32xbf16>, vector<2x8x32xbf16>, vector<2x16x8xf32> -> vector<2x16x8xf32>
    "tpu.trace_stop"() : () -> ()
    %c0_13 = arith.constant 0 : index
    %c0_14 = arith.constant 0 : index
    %c0_15 = arith.constant 0 : index
    %23 = vector.load %arg4[%c0_13, %c0_14, %c0_15] : memref<2x1x8xf32, #tpu.memory_space<vmem>>, vector<2x1x8xf32>
    %cst_16 = arith.constant 0.000000e+00 : f32
    %24 = vector.broadcast %cst_16 : f32 to vector<2x1x8xf32>
    %25 = arith.cmpf ogt, %23, %24 : vector<2x1x8xf32>
    %cst_17 = arith.constant -1.000000e+30 : f32
    %26 = vector.shape_cast %25 : vector<2x1x8xi1> to vector<2x1x8xi1>
    %27 = vector.broadcast %26 : vector<2x1x8xi1> to vector<2x16x8xi1>
    %28 = vector.broadcast %cst_17 : f32 to vector<2x16x8xf32>
    %29 = arith.select %27, %28, %22 : vector<2x16x8xi1>, vector<2x16x8xf32>
    %cst_18 = arith.constant dense<0xFF800000> : vector<2x16xf32>
    %30 = vector.multi_reduction <maximumf>, %29, %cst_18 [2] : vector<2x16x8xf32> to vector<2x16xf32>
    %31 = vector.shape_cast %30 : vector<2x16xf32> to vector<2x16x1xf32>
    %32 = vector.broadcast %31 : vector<2x16x1xf32> to vector<2x16x8xf32>
    %33 = arith.subf %29, %32 : vector<2x16x8xf32>
    %34 = math.exp %33 : vector<2x16x8xf32>
    %cst_19 = arith.constant dense<0.000000e+00> : vector<2x16xf32>
    %35 = vector.multi_reduction <add>, %34, %cst_19 [2] : vector<2x16x8xf32> to vector<2x16xf32>
    %36 = vector.shape_cast %35 : vector<2x16xf32> to vector<2x16x1xf32>
    %37 = tpu.reciprocal %36 {approx = true} : vector<2x16x1xf32> -> vector<2x16x1xf32>
    %38 = vector.broadcast %37 : vector<2x16x1xf32> to vector<2x16x8xf32>
    %39 = arith.mulf %34, %38 : vector<2x16x8xf32>
    %40 = arith.truncf %39 : vector<2x16x8xf32> to vector<2x16x8xbf16>
    %41 = arith.truncf %1 : vector<2x8x32xf32> to vector<2x8x32xbf16>
    "tpu.trace_start"() <{level = 10 : i32, message = "blq,bqd->bld"}> : () -> ()
    %cst_20 = arith.constant dense<0.000000e+00> : vector<2x16x32xf32>
    %42 = tpu.matmul %40, %41, %cst_20 {dimension_numbers = #tpu.dot_dimension_numbers<[2], [1], [1], [2], [0, 0, 0, 1, 1, 2], [0], [0]>} : vector<2x16x8xbf16>, vector<2x8x32xbf16>, vector<2x16x32xf32> -> vector<2x16x32xf32>
    "tpu.trace_stop"() : () -> ()
    %c0_21 = arith.constant 0 : index
    %c0_22 = arith.constant 0 : index
    %c0_23 = arith.constant 0 : index
    %43 = vector.load %arg7[%c0_21, %c0_22, %c0_23] : memref<2x16x68xf32, #tpu.memory_space<vmem>>, vector<2x16x32xf32>
    tpu.vector_store %arg7[%c0_21, %c0_22, %c0_23], %0 {strides = array<i32>} : memref<2x16x68xf32, #tpu.memory_space<vmem>>, vector<2x16x32xf32>,
    %c0_24 = arith.constant 0 : index
    %c0_25 = arith.constant 0 : index
    %c32 = arith.constant 32 : index
    %44 = vector.load %arg7[%c0_24, %c0_25, %c32] : memref<2x16x68xf32, #tpu.memory_space<vmem>>, vector<2x16x32xf32>
    tpu.vector_store %arg7[%c0_24, %c0_25, %c32], %42 {strides = array<i32>} : memref<2x16x68xf32, #tpu.memory_space<vmem>>, vector<2x16x32xf32>,
    %c0_26 = arith.constant 0 : index
    %c0_27 = arith.constant 0 : index
    %c0_28 = arith.constant 0 : index
    %45 = vector.load %arg3[%c0_26, %c0_27, %c0_28] : memref<2x16x4xf32, #tpu.memory_space<vmem>>, vector<2x16x4xf32>
    %c0_29 = arith.constant 0 : index
    %c0_30 = arith.constant 0 : index
    %c64 = arith.constant 64 : index
    %46 = vector.load %arg7[%c0_29, %c0_30, %c64] : memref<2x16x68xf32, #tpu.memory_space<vmem>>, vector<2x16x4xf32>
    tpu.vector_store %arg7[%c0_29, %c0_30, %c64], %45 {strides = array<i32>} : memref<2x16x68xf32, #tpu.memory_space<vmem>>, vector<2x16x4xf32>,
    return
  }
  func.func @transform_0(%arg0: i32) -> (i32, i32, i32) {
    %c0_i32 = arith.constant 0 : i32
    %c0_i32_0 = arith.constant 0 : i32
    %c0_i32_1 = arith.constant 0 : i32
    %c0_i32_2 = arith.constant 0 : i32
    return %c0_i32, %c0_i32_0, %c0_i32_1 : i32, i32, i32
  }
  func.func @transform_1(%arg0: i32) -> (i32, i32, i32) {
    %c0_i32 = arith.constant 0 : i32
    %c0_i32_0 = arith.constant 0 : i32
    %c0_i32_1 = arith.constant 0 : i32
    %c0_i32_2 = arith.constant 0 : i32
    return %c0_i32, %c0_i32_0, %c0_i32_1 : i32, i32, i32
  }
  func.func @transform_2(%arg0: i32) -> (i32, i32, i32) {
    %c0_i32 = arith.constant 0 : i32
    %c0_i32_0 = arith.constant 0 : i32
    %c0_i32_1 = arith.constant 0 : i32
    %c0_i32_2 = arith.constant 0 : i32
    return %c0_i32, %c0_i32_0, %c0_i32_1 : i32, i32, i32
  }
  func.func @transform_3(%arg0: i32) -> (i32, i32, i32) {
    %c0_i32 = arith.constant 0 : i32
    %c0_i32_0 = arith.constant 0 : i32
    %c0_i32_1 = arith.constant 0 : i32
    %c0_i32_2 = arith.constant 0 : i32
    return %c0_i32, %c0_i32_0, %c0_i32_1 : i32, i32, i32
  }
  func.func @transform_4(%arg0: i32) -> (i32, i32) {
    %c0_i32 = arith.constant 0 : i32
    %c0_i32_0 = arith.constant 0 : i32
    %c0_i32_1 = arith.constant 0 : i32
    return %c0_i32, %c0_i32_0 : i32, i32
  }
  func.func @transform_5(%arg0: i32) -> (i32, i32) {
    %c0_i32 = arith.constant 0 : i32
    %c0_i32_0 = arith.constant 0 : i32
    %c0_i32_1 = arith.constant 0 : i32
    return %c0_i32, %c0_i32_0 : i32, i32
  }
  func.func @transform_6(%arg0: i32) -> (i32, i32, i32) {
    %c0_i32 = arith.constant 0 : i32
    %c0_i32_0 = arith.constant 0 : i32
    %c0_i32_1 = arith.constant 0 : i32
    %c0_i32_2 = arith.constant 0 : i32
    return %c0_i32, %c0_i32_0, %c0_i32_1 : i32, i32, i32
  }
}

module attributes {stable_mosaic.version = 11 : i64} {
  func.func @kernel(%arg0: i32, %arg1: memref<16x2x68xf32, #tpu.memory_space<vmem>>, %arg2: memref<68x64xbf16, #tpu.memory_space<vmem>>, %arg3: memref<32x32xbf16, #tpu.memory_space<vmem>>, %arg4: memref<32x32xbf16, #tpu.memory_space<vmem>>, %arg5: memref<1x64xf32, #tpu.memory_space<vmem>>, %arg6: memref<64x64xbf16, #tpu.memory_space<vmem>>, %arg7: memref<32x32xbf16, #tpu.memory_space<vmem>>, %arg8: memref<32x32xbf16, #tpu.memory_space<vmem>>, %arg9: memref<1x64xf32, #tpu.memory_space<vmem>>, %arg10: memref<16x2x128xf32, #tpu.memory_space<vmem>>, %arg11: memref<16x2x32xf32, #tpu.memory_space<vmem>>, %arg12: memref<16x2x32xf32, #tpu.memory_space<vmem>>) attributes {dimension_semantics = [#tpu.dimension_semantics<arbitrary>], iteration_bounds = array<i64: 1>, scalar_prefetch = 0 : i64, scratch_operands = 2 : i64, tpu.core_type = #tpu.core_type<tc>, window_params = [{pipeline_mode = #tpu.pipeline_mode<synchronous>, transform_indices = @transform_0, window_bounds = array<i64: 16, 2, 68>}, {pipeline_mode = #tpu.pipeline_mode<synchronous>, transform_indices = @transform_1, window_bounds = array<i64: 68, 64>}, {pipeline_mode = #tpu.pipeline_mode<synchronous>, transform_indices = @transform_2, window_bounds = array<i64: 32, 32>}, {pipeline_mode = #tpu.pipeline_mode<synchronous>, transform_indices = @transform_3, window_bounds = array<i64: 32, 32>}, {pipeline_mode = #tpu.pipeline_mode<synchronous>, transform_indices = @transform_4, window_bounds = array<i64: 1, 64>}, {pipeline_mode = #tpu.pipeline_mode<synchronous>, transform_indices = @transform_5, window_bounds = array<i64: 64, 64>}, {pipeline_mode = #tpu.pipeline_mode<synchronous>, transform_indices = @transform_6, window_bounds = array<i64: 32, 32>}, {pipeline_mode = #tpu.pipeline_mode<synchronous>, transform_indices = @transform_7, window_bounds = array<i64: 32, 32>}, {pipeline_mode = #tpu.pipeline_mode<synchronous>, transform_indices = @transform_8, window_bounds = array<i64: 1, 64>}, {pipeline_mode = #tpu.pipeline_mode<synchronous>, transform_indices = @transform_9, window_bounds = array<i64: 16, 2, 128>}]} {
    %c0 = arith.constant 0 : index
    %c0_0 = arith.constant 0 : index
    %c0_1 = arith.constant 0 : index
    %0 = vector.load %arg1[%c0, %c0_0, %c0_1] : memref<16x2x68xf32, #tpu.memory_space<vmem>>, vector<16x2x68xf32>
    %1 = vector.shape_cast %0 : vector<16x2x68xf32> to vector<32x68xf32>
    %2 = arith.truncf %1 : vector<32x68xf32> to vector<32x68xbf16>
    %c0_2 = arith.constant 0 : index
    %c0_3 = arith.constant 0 : index
    %3 = vector.load %arg2[%c0_2, %c0_3] : memref<68x64xbf16, #tpu.memory_space<vmem>>, vector<68x64xbf16>
    %cst = arith.constant dense<0.000000e+00> : vector<32x64xf32>
    %4 = tpu.matmul %2, %3, %cst {dimension_numbers = #tpu.dot_dimension_numbers<[1], [0], [0], [1], [0, 0, 1, 1], [], []>} : vector<32x68xbf16>, vector<68x64xbf16>, vector<32x64xf32> -> vector<32x64xf32>
    %c0_4 = arith.constant 0 : index
    %c0_5 = arith.constant 0 : index
    %5 = vector.load %arg5[%c0_4, %c0_5] : memref<1x64xf32, #tpu.memory_space<vmem>>, vector<1x64xf32>
    %6 = vector.broadcast %5 : vector<1x64xf32> to vector<32x64xf32>
    %7 = arith.addf %4, %6 : vector<32x64xf32>
    %8 = vector.extract_strided_slice %7 {offsets = [0, 0], sizes = [32, 32], strides = [1, 1]} : vector<32x64xf32> to vector<32x32xf32>
    %9 = vector.shape_cast %8 : vector<32x32xf32> to vector<16x2x32xf32>
    %c0_6 = arith.constant 0 : index
    %c0_7 = arith.constant 0 : index
    %c0_8 = arith.constant 0 : index
    %10 = vector.load %arg11[%c0_6, %c0_7, %c0_8] : memref<16x2x32xf32, #tpu.memory_space<vmem>>, vector<16x2x32xf32>
    tpu.vector_store %arg11[%c0_6, %c0_7, %c0_8], %9 {strides = array<i32>} : memref<16x2x32xf32, #tpu.memory_space<vmem>>, vector<16x2x32xf32>,
    %11 = vector.extract_strided_slice %7 {offsets = [0, 32], sizes = [32, 32], strides = [1, 1]} : vector<32x64xf32> to vector<32x32xf32>
    %12 = vector.shape_cast %11 : vector<32x32xf32> to vector<16x2x32xf32>
    %c0_9 = arith.constant 0 : index
    %c0_10 = arith.constant 0 : index
    %c0_11 = arith.constant 0 : index
    %13 = vector.load %arg12[%c0_9, %c0_10, %c0_11] : memref<16x2x32xf32, #tpu.memory_space<vmem>>, vector<16x2x32xf32>
    tpu.vector_store %arg12[%c0_9, %c0_10, %c0_11], %12 {strides = array<i32>} : memref<16x2x32xf32, #tpu.memory_space<vmem>>, vector<16x2x32xf32>,
    %c0_12 = arith.constant 0 : index
    %c0_13 = arith.constant 0 : index
    %14 = vector.load %arg3[%c0_12, %c0_13] : memref<32x32xbf16, #tpu.memory_space<vmem>>, vector<32x32xbf16>
    %c0_14 = arith.constant 0 : index
    %c0_15 = arith.constant 0 : index
    %15 = vector.load %arg4[%c0_14, %c0_15] : memref<32x32xbf16, #tpu.memory_space<vmem>>, vector<32x32xbf16>
    %cst_16 = arith.constant 0.000000e+00 : bf16
    %16 = vector.broadcast %cst_16 : bf16 to vector<2x32xbf16>
    %c0_i32 = arith.constant 0 : i32
    %c16_i32 = arith.constant 16 : i32
    %17 = arith.addi %c0_i32, %c16_i32 : i32
    %c1_i32 = arith.constant 1 : i32
    %18:2 = scf.for %arg13 = %c0_i32 to %17 step %c1_i32 iter_args(%arg14 = %16, %arg15 = %16) -> (vector<2x32xbf16>, vector<2x32xbf16>)  : i32 {
      %c15_i32 = arith.constant 15 : i32
      %46 = arith.subi %c15_i32, %arg13 : i32
      %47 = arith.index_cast %arg13 : i32 to index
      %c0_62 = arith.constant 0 : index
      %c0_63 = arith.constant 0 : index
      %48 = vector.load %arg11[%47, %c0_62, %c0_63] : memref<16x2x32xf32, #tpu.memory_space<vmem>>, vector<1x2x32xf32>
      %49 = vector.shape_cast %48 : vector<1x2x32xf32> to vector<2x32xf32>
      %cst_64 = arith.constant dense<0.000000e+00> : vector<2x32xf32>
      %50 = tpu.matmul %arg14, %14, %cst_64 {dimension_numbers = #tpu.dot_dimension_numbers<[1], [0], [0], [1], [0, 0, 1, 1], [], []>} : vector<2x32xbf16>, vector<32x32xbf16>, vector<2x32xf32> -> vector<2x32xf32>
      %51 = arith.addf %49, %50 : vector<2x32xf32>
      %52 = math.tanh %51 : vector<2x32xf32>
      %53 = arith.index_cast %46 : i32 to index
      %c0_65 = arith.constant 0 : index
      %c0_66 = arith.constant 0 : index
      %54 = vector.load %arg12[%53, %c0_65, %c0_66] : memref<16x2x32xf32, #tpu.memory_space<vmem>>, vector<1x2x32xf32>
      %55 = vector.shape_cast %54 : vector<1x2x32xf32> to vector<2x32xf32>
      %cst_67 = arith.constant dense<0.000000e+00> : vector<2x32xf32>
      %56 = tpu.matmul %arg15, %15, %cst_67 {dimension_numbers = #tpu.dot_dimension_numbers<[1], [0], [0], [1], [0, 0, 1, 1], [], []>} : vector<2x32xbf16>, vector<32x32xbf16>, vector<2x32xf32> -> vector<2x32xf32>
      %57 = arith.addf %55, %56 : vector<2x32xf32>
      %58 = math.tanh %57 : vector<2x32xf32>
      %59 = arith.index_cast %arg13 : i32 to index
      %c0_68 = arith.constant 0 : index
      %c0_69 = arith.constant 0 : index
      %60 = vector.load %arg11[%59, %c0_68, %c0_69] : memref<16x2x32xf32, #tpu.memory_space<vmem>>, vector<1x2x32xf32>
      %61 = vector.shape_cast %60 : vector<1x2x32xf32> to vector<2x32xf32>
      %62 = vector.shape_cast %52 : vector<2x32xf32> to vector<1x2x32xf32>
      tpu.vector_store %arg11[%59, %c0_68, %c0_69], %62 {strides = array<i32>} : memref<16x2x32xf32, #tpu.memory_space<vmem>>, vector<1x2x32xf32>,
      %63 = arith.index_cast %46 : i32 to index
      %c0_70 = arith.constant 0 : index
      %c0_71 = arith.constant 0 : index
      %64 = vector.load %arg12[%63, %c0_70, %c0_71] : memref<16x2x32xf32, #tpu.memory_space<vmem>>, vector<1x2x32xf32>
      %65 = vector.shape_cast %64 : vector<1x2x32xf32> to vector<2x32xf32>
      %66 = vector.shape_cast %58 : vector<2x32xf32> to vector<1x2x32xf32>
      tpu.vector_store %arg12[%63, %c0_70, %c0_71], %66 {strides = array<i32>} : memref<16x2x32xf32, #tpu.memory_space<vmem>>, vector<1x2x32xf32>,
      %67 = arith.truncf %52 : vector<2x32xf32> to vector<2x32xbf16>
      %68 = arith.truncf %58 : vector<2x32xf32> to vector<2x32xbf16>
      scf.yield %67, %68 : vector<2x32xbf16>, vector<2x32xbf16>
    }
    %c16_i32_17 = arith.constant 16 : i32
    %c0_18 = arith.constant 0 : index
    %c0_19 = arith.constant 0 : index
    %c0_20 = arith.constant 0 : index
    %19 = vector.load %arg11[%c0_18, %c0_19, %c0_20] : memref<16x2x32xf32, #tpu.memory_space<vmem>>, vector<16x2x32xf32>
    %c0_21 = arith.constant 0 : index
    %c0_22 = arith.constant 0 : index
    %c0_23 = arith.constant 0 : index
    %20 = vector.load %arg10[%c0_21, %c0_22, %c0_23] : memref<16x2x128xf32, #tpu.memory_space<vmem>>, vector<16x2x32xf32>
    tpu.vector_store %arg10[%c0_21, %c0_22, %c0_23], %19 {strides = array<i32>} : memref<16x2x128xf32, #tpu.memory_space<vmem>>, vector<16x2x32xf32>,
    %c0_24 = arith.constant 0 : index
    %c0_25 = arith.constant 0 : index
    %c0_26 = arith.constant 0 : index
    %21 = vector.load %arg12[%c0_24, %c0_25, %c0_26] : memref<16x2x32xf32, #tpu.memory_space<vmem>>, vector<16x2x32xf32>
    %c0_27 = arith.constant 0 : index
    %c0_28 = arith.constant 0 : index
    %c32 = arith.constant 32 : index
    %22 = vector.load %arg10[%c0_27, %c0_28, %c32] : memref<16x2x128xf32, #tpu.memory_space<vmem>>, vector<16x2x32xf32>
    tpu.vector_store %arg10[%c0_27, %c0_28, %c32], %21 {strides = array<i32>} : memref<16x2x128xf32, #tpu.memory_space<vmem>>, vector<16x2x32xf32>,
    %c0_29 = arith.constant 0 : index
    %c0_30 = arith.constant 0 : index
    %c0_31 = arith.constant 0 : index
    %23 = vector.load %arg10[%c0_29, %c0_30, %c0_31] : memref<16x2x128xf32, #tpu.memory_space<vmem>>, vector<16x2x64xf32>
    %24 = vector.shape_cast %23 : vector<16x2x64xf32> to vector<32x64xf32>
    %25 = arith.truncf %24 : vector<32x64xf32> to vector<32x64xbf16>
    %c0_32 = arith.constant 0 : index
    %c0_33 = arith.constant 0 : index
    %26 = vector.load %arg6[%c0_32, %c0_33] : memref<64x64xbf16, #tpu.memory_space<vmem>>, vector<64x64xbf16>
    %cst_34 = arith.constant dense<0.000000e+00> : vector<32x64xf32>
    %27 = tpu.matmul %25, %26, %cst_34 {dimension_numbers = #tpu.dot_dimension_numbers<[1], [0], [0], [1], [0, 0, 1, 1], [], []>} : vector<32x64xbf16>, vector<64x64xbf16>, vector<32x64xf32> -> vector<32x64xf32>
    %c0_35 = arith.constant 0 : index
    %c0_36 = arith.constant 0 : index
    %28 = vector.load %arg9[%c0_35, %c0_36] : memref<1x64xf32, #tpu.memory_space<vmem>>, vector<1x64xf32>
    %29 = vector.broadcast %28 : vector<1x64xf32> to vector<32x64xf32>
    %30 = arith.addf %27, %29 : vector<32x64xf32>
    %31 = vector.extract_strided_slice %30 {offsets = [0, 0], sizes = [32, 32], strides = [1, 1]} : vector<32x64xf32> to vector<32x32xf32>
    %32 = vector.shape_cast %31 : vector<32x32xf32> to vector<16x2x32xf32>
    %c0_37 = arith.constant 0 : index
    %c0_38 = arith.constant 0 : index
    %c0_39 = arith.constant 0 : index
    %33 = vector.load %arg11[%c0_37, %c0_38, %c0_39] : memref<16x2x32xf32, #tpu.memory_space<vmem>>, vector<16x2x32xf32>
    tpu.vector_store %arg11[%c0_37, %c0_38, %c0_39], %32 {strides = array<i32>} : memref<16x2x32xf32, #tpu.memory_space<vmem>>, vector<16x2x32xf32>,
    %34 = vector.extract_strided_slice %30 {offsets = [0, 32], sizes = [32, 32], strides = [1, 1]} : vector<32x64xf32> to vector<32x32xf32>
    %35 = vector.shape_cast %34 : vector<32x32xf32> to vector<16x2x32xf32>
    %c0_40 = arith.constant 0 : index
    %c0_41 = arith.constant 0 : index
    %c0_42 = arith.constant 0 : index
    %36 = vector.load %arg12[%c0_40, %c0_41, %c0_42] : memref<16x2x32xf32, #tpu.memory_space<vmem>>, vector<16x2x32xf32>
    tpu.vector_store %arg12[%c0_40, %c0_41, %c0_42], %35 {strides = array<i32>} : memref<16x2x32xf32, #tpu.memory_space<vmem>>, vector<16x2x32xf32>,
    %c0_43 = arith.constant 0 : index
    %c0_44 = arith.constant 0 : index
    %37 = vector.load %arg7[%c0_43, %c0_44] : memref<32x32xbf16, #tpu.memory_space<vmem>>, vector<32x32xbf16>
    %c0_45 = arith.constant 0 : index
    %c0_46 = arith.constant 0 : index
    %38 = vector.load %arg8[%c0_45, %c0_46] : memref<32x32xbf16, #tpu.memory_space<vmem>>, vector<32x32xbf16>
    %cst_47 = arith.constant 0.000000e+00 : bf16
    %39 = vector.broadcast %cst_47 : bf16 to vector<2x32xbf16>
    %c0_i32_48 = arith.constant 0 : i32
    %c16_i32_49 = arith.constant 16 : i32
    %40 = arith.addi %c0_i32_48, %c16_i32_49 : i32
    %c1_i32_50 = arith.constant 1 : i32
    %41:2 = scf.for %arg13 = %c0_i32_48 to %40 step %c1_i32_50 iter_args(%arg14 = %39, %arg15 = %39) -> (vector<2x32xbf16>, vector<2x32xbf16>)  : i32 {
      %c15_i32 = arith.constant 15 : i32
      %46 = arith.subi %c15_i32, %arg13 : i32
      %47 = arith.index_cast %arg13 : i32 to index
      %c0_62 = arith.constant 0 : index
      %c0_63 = arith.constant 0 : index
      %48 = vector.load %arg11[%47, %c0_62, %c0_63] : memref<16x2x32xf32, #tpu.memory_space<vmem>>, vector<1x2x32xf32>
      %49 = vector.shape_cast %48 : vector<1x2x32xf32> to vector<2x32xf32>
      %cst_64 = arith.constant dense<0.000000e+00> : vector<2x32xf32>
      %50 = tpu.matmul %arg14, %37, %cst_64 {dimension_numbers = #tpu.dot_dimension_numbers<[1], [0], [0], [1], [0, 0, 1, 1], [], []>} : vector<2x32xbf16>, vector<32x32xbf16>, vector<2x32xf32> -> vector<2x32xf32>
      %51 = arith.addf %49, %50 : vector<2x32xf32>
      %52 = math.tanh %51 : vector<2x32xf32>
      %53 = arith.index_cast %46 : i32 to index
      %c0_65 = arith.constant 0 : index
      %c0_66 = arith.constant 0 : index
      %54 = vector.load %arg12[%53, %c0_65, %c0_66] : memref<16x2x32xf32, #tpu.memory_space<vmem>>, vector<1x2x32xf32>
      %55 = vector.shape_cast %54 : vector<1x2x32xf32> to vector<2x32xf32>
      %cst_67 = arith.constant dense<0.000000e+00> : vector<2x32xf32>
      %56 = tpu.matmul %arg15, %38, %cst_67 {dimension_numbers = #tpu.dot_dimension_numbers<[1], [0], [0], [1], [0, 0, 1, 1], [], []>} : vector<2x32xbf16>, vector<32x32xbf16>, vector<2x32xf32> -> vector<2x32xf32>
      %57 = arith.addf %55, %56 : vector<2x32xf32>
      %58 = math.tanh %57 : vector<2x32xf32>
      %59 = arith.index_cast %arg13 : i32 to index
      %c0_68 = arith.constant 0 : index
      %c0_69 = arith.constant 0 : index
      %60 = vector.load %arg11[%59, %c0_68, %c0_69] : memref<16x2x32xf32, #tpu.memory_space<vmem>>, vector<1x2x32xf32>
      %61 = vector.shape_cast %60 : vector<1x2x32xf32> to vector<2x32xf32>
      %62 = vector.shape_cast %52 : vector<2x32xf32> to vector<1x2x32xf32>
      tpu.vector_store %arg11[%59, %c0_68, %c0_69], %62 {strides = array<i32>} : memref<16x2x32xf32, #tpu.memory_space<vmem>>, vector<1x2x32xf32>,
      %63 = arith.index_cast %46 : i32 to index
      %c0_70 = arith.constant 0 : index
      %c0_71 = arith.constant 0 : index
      %64 = vector.load %arg12[%63, %c0_70, %c0_71] : memref<16x2x32xf32, #tpu.memory_space<vmem>>, vector<1x2x32xf32>
      %65 = vector.shape_cast %64 : vector<1x2x32xf32> to vector<2x32xf32>
      %66 = vector.shape_cast %58 : vector<2x32xf32> to vector<1x2x32xf32>
      tpu.vector_store %arg12[%63, %c0_70, %c0_71], %66 {strides = array<i32>} : memref<16x2x32xf32, #tpu.memory_space<vmem>>, vector<1x2x32xf32>,
      %67 = arith.truncf %52 : vector<2x32xf32> to vector<2x32xbf16>
      %68 = arith.truncf %58 : vector<2x32xf32> to vector<2x32xbf16>
      scf.yield %67, %68 : vector<2x32xbf16>, vector<2x32xbf16>
    }
    %c16_i32_51 = arith.constant 16 : i32
    %c0_52 = arith.constant 0 : index
    %c0_53 = arith.constant 0 : index
    %c0_54 = arith.constant 0 : index
    %42 = vector.load %arg11[%c0_52, %c0_53, %c0_54] : memref<16x2x32xf32, #tpu.memory_space<vmem>>, vector<16x2x32xf32>
    %c0_55 = arith.constant 0 : index
    %c0_56 = arith.constant 0 : index
    %c64 = arith.constant 64 : index
    %43 = vector.load %arg10[%c0_55, %c0_56, %c64] : memref<16x2x128xf32, #tpu.memory_space<vmem>>, vector<16x2x32xf32>
    tpu.vector_store %arg10[%c0_55, %c0_56, %c64], %42 {strides = array<i32>} : memref<16x2x128xf32, #tpu.memory_space<vmem>>, vector<16x2x32xf32>,
    %c0_57 = arith.constant 0 : index
    %c0_58 = arith.constant 0 : index
    %c0_59 = arith.constant 0 : index
    %44 = vector.load %arg12[%c0_57, %c0_58, %c0_59] : memref<16x2x32xf32, #tpu.memory_space<vmem>>, vector<16x2x32xf32>
    %c0_60 = arith.constant 0 : index
    %c0_61 = arith.constant 0 : index
    %c96 = arith.constant 96 : index
    %45 = vector.load %arg10[%c0_60, %c0_61, %c96] : memref<16x2x128xf32, #tpu.memory_space<vmem>>, vector<16x2x32xf32>
    tpu.vector_store %arg10[%c0_60, %c0_61, %c96], %44 {strides = array<i32>} : memref<16x2x128xf32, #tpu.memory_space<vmem>>, vector<16x2x32xf32>,
    return
  }
  func.func @transform_0(%arg0: i32) -> (i32, i32, i32) {
    %c0_i32 = arith.constant 0 : i32
    %c0_i32_0 = arith.constant 0 : i32
    %c0_i32_1 = arith.constant 0 : i32
    %c0_i32_2 = arith.constant 0 : i32
    return %c0_i32, %c0_i32_0, %c0_i32_1 : i32, i32, i32
  }
  func.func @transform_1(%arg0: i32) -> (i32, i32) {
    %c0_i32 = arith.constant 0 : i32
    %c0_i32_0 = arith.constant 0 : i32
    %c0_i32_1 = arith.constant 0 : i32
    return %c0_i32, %c0_i32_0 : i32, i32
  }
  func.func @transform_2(%arg0: i32) -> (i32, i32) {
    %c0_i32 = arith.constant 0 : i32
    %c0_i32_0 = arith.constant 0 : i32
    %c0_i32_1 = arith.constant 0 : i32
    return %c0_i32, %c0_i32_0 : i32, i32
  }
  func.func @transform_3(%arg0: i32) -> (i32, i32) {
    %c0_i32 = arith.constant 0 : i32
    %c0_i32_0 = arith.constant 0 : i32
    %c0_i32_1 = arith.constant 0 : i32
    return %c0_i32, %c0_i32_0 : i32, i32
  }
  func.func @transform_4(%arg0: i32) -> (i32, i32) {
    %c0_i32 = arith.constant 0 : i32
    %c0_i32_0 = arith.constant 0 : i32
    %c0_i32_1 = arith.constant 0 : i32
    return %c0_i32, %c0_i32_0 : i32, i32
  }
  func.func @transform_5(%arg0: i32) -> (i32, i32) {
    %c0_i32 = arith.constant 0 : i32
    %c0_i32_0 = arith.constant 0 : i32
    %c0_i32_1 = arith.constant 0 : i32
    return %c0_i32, %c0_i32_0 : i32, i32
  }
  func.func @transform_6(%arg0: i32) -> (i32, i32) {
    %c0_i32 = arith.constant 0 : i32
    %c0_i32_0 = arith.constant 0 : i32
    %c0_i32_1 = arith.constant 0 : i32
    return %c0_i32, %c0_i32_0 : i32, i32
  }
  func.func @transform_7(%arg0: i32) -> (i32, i32) {
    %c0_i32 = arith.constant 0 : i32
    %c0_i32_0 = arith.constant 0 : i32
    %c0_i32_1 = arith.constant 0 : i32
    return %c0_i32, %c0_i32_0 : i32, i32
  }
  func.func @transform_8(%arg0: i32) -> (i32, i32) {
    %c0_i32 = arith.constant 0 : i32
    %c0_i32_0 = arith.constant 0 : i32
    %c0_i32_1 = arith.constant 0 : i32
    return %c0_i32, %c0_i32_0 : i32, i32
  }
  func.func @transform_9(%arg0: i32) -> (i32, i32, i32) {
    %c0_i32 = arith.constant 0 : i32
    %c0_i32_0 = arith.constant 0 : i32
    %c0_i32_1 = arith.constant 0 : i32
    %c0_i32_2 = arith.constant 0 : i32
    return %c0_i32, %c0_i32_0, %c0_i32_1 : i32, i32, i32
  }
}

module attributes {stable_mosaic.version = 11 : i64} {
  func.func @kernel(%arg0: i32, %arg1: memref<8x2x32xf32, #tpu.memory_space<vmem>>, %arg2: memref<32x64xbf16, #tpu.memory_space<vmem>>, %arg3: memref<32x32xbf16, #tpu.memory_space<vmem>>, %arg4: memref<32x32xbf16, #tpu.memory_space<vmem>>, %arg5: memref<1x64xf32, #tpu.memory_space<vmem>>, %arg6: memref<64x64xbf16, #tpu.memory_space<vmem>>, %arg7: memref<32x32xbf16, #tpu.memory_space<vmem>>, %arg8: memref<32x32xbf16, #tpu.memory_space<vmem>>, %arg9: memref<1x64xf32, #tpu.memory_space<vmem>>, %arg10: memref<8x2x128xf32, #tpu.memory_space<vmem>>, %arg11: memref<8x2x32xf32, #tpu.memory_space<vmem>>, %arg12: memref<8x2x32xf32, #tpu.memory_space<vmem>>) attributes {dimension_semantics = [#tpu.dimension_semantics<arbitrary>], iteration_bounds = array<i64: 1>, scalar_prefetch = 0 : i64, scratch_operands = 2 : i64, tpu.core_type = #tpu.core_type<tc>, window_params = [{pipeline_mode = #tpu.pipeline_mode<synchronous>, transform_indices = @transform_0, window_bounds = array<i64: 8, 2, 32>}, {pipeline_mode = #tpu.pipeline_mode<synchronous>, transform_indices = @transform_1, window_bounds = array<i64: 32, 64>}, {pipeline_mode = #tpu.pipeline_mode<synchronous>, transform_indices = @transform_2, window_bounds = array<i64: 32, 32>}, {pipeline_mode = #tpu.pipeline_mode<synchronous>, transform_indices = @transform_3, window_bounds = array<i64: 32, 32>}, {pipeline_mode = #tpu.pipeline_mode<synchronous>, transform_indices = @transform_4, window_bounds = array<i64: 1, 64>}, {pipeline_mode = #tpu.pipeline_mode<synchronous>, transform_indices = @transform_5, window_bounds = array<i64: 64, 64>}, {pipeline_mode = #tpu.pipeline_mode<synchronous>, transform_indices = @transform_6, window_bounds = array<i64: 32, 32>}, {pipeline_mode = #tpu.pipeline_mode<synchronous>, transform_indices = @transform_7, window_bounds = array<i64: 32, 32>}, {pipeline_mode = #tpu.pipeline_mode<synchronous>, transform_indices = @transform_8, window_bounds = array<i64: 1, 64>}, {pipeline_mode = #tpu.pipeline_mode<synchronous>, transform_indices = @transform_9, window_bounds = array<i64: 8, 2, 128>}]} {
    %c0 = arith.constant 0 : index
    %c0_0 = arith.constant 0 : index
    %c0_1 = arith.constant 0 : index
    %0 = vector.load %arg1[%c0, %c0_0, %c0_1] : memref<8x2x32xf32, #tpu.memory_space<vmem>>, vector<8x2x32xf32>
    %1 = vector.shape_cast %0 : vector<8x2x32xf32> to vector<16x32xf32>
    %2 = arith.truncf %1 : vector<16x32xf32> to vector<16x32xbf16>
    %c0_2 = arith.constant 0 : index
    %c0_3 = arith.constant 0 : index
    %3 = vector.load %arg2[%c0_2, %c0_3] : memref<32x64xbf16, #tpu.memory_space<vmem>>, vector<32x64xbf16>
    %cst = arith.constant dense<0.000000e+00> : vector<16x64xf32>
    %4 = tpu.matmul %2, %3, %cst {dimension_numbers = #tpu.dot_dimension_numbers<[1], [0], [0], [1], [0, 0, 1, 1], [], []>} : vector<16x32xbf16>, vector<32x64xbf16>, vector<16x64xf32> -> vector<16x64xf32>
    %c0_4 = arith.constant 0 : index
    %c0_5 = arith.constant 0 : index
    %5 = vector.load %arg5[%c0_4, %c0_5] : memref<1x64xf32, #tpu.memory_space<vmem>>, vector<1x64xf32>
    %6 = vector.broadcast %5 : vector<1x64xf32> to vector<16x64xf32>
    %7 = arith.addf %4, %6 : vector<16x64xf32>
    %8 = vector.extract_strided_slice %7 {offsets = [0, 0], sizes = [16, 32], strides = [1, 1]} : vector<16x64xf32> to vector<16x32xf32>
    %9 = vector.shape_cast %8 : vector<16x32xf32> to vector<8x2x32xf32>
    %c0_6 = arith.constant 0 : index
    %c0_7 = arith.constant 0 : index
    %c0_8 = arith.constant 0 : index
    %10 = vector.load %arg11[%c0_6, %c0_7, %c0_8] : memref<8x2x32xf32, #tpu.memory_space<vmem>>, vector<8x2x32xf32>
    tpu.vector_store %arg11[%c0_6, %c0_7, %c0_8], %9 {strides = array<i32>} : memref<8x2x32xf32, #tpu.memory_space<vmem>>, vector<8x2x32xf32>,
    %11 = vector.extract_strided_slice %7 {offsets = [0, 32], sizes = [16, 32], strides = [1, 1]} : vector<16x64xf32> to vector<16x32xf32>
    %12 = vector.shape_cast %11 : vector<16x32xf32> to vector<8x2x32xf32>
    %c0_9 = arith.constant 0 : index
    %c0_10 = arith.constant 0 : index
    %c0_11 = arith.constant 0 : index
    %13 = vector.load %arg12[%c0_9, %c0_10, %c0_11] : memref<8x2x32xf32, #tpu.memory_space<vmem>>, vector<8x2x32xf32>
    tpu.vector_store %arg12[%c0_9, %c0_10, %c0_11], %12 {strides = array<i32>} : memref<8x2x32xf32, #tpu.memory_space<vmem>>, vector<8x2x32xf32>,
    %c0_12 = arith.constant 0 : index
    %c0_13 = arith.constant 0 : index
    %14 = vector.load %arg3[%c0_12, %c0_13] : memref<32x32xbf16, #tpu.memory_space<vmem>>, vector<32x32xbf16>
    %c0_14 = arith.constant 0 : index
    %c0_15 = arith.constant 0 : index
    %15 = vector.load %arg4[%c0_14, %c0_15] : memref<32x32xbf16, #tpu.memory_space<vmem>>, vector<32x32xbf16>
    %cst_16 = arith.constant 0.000000e+00 : bf16
    %16 = vector.broadcast %cst_16 : bf16 to vector<2x32xbf16>
    %c0_i32 = arith.constant 0 : i32
    %c8_i32 = arith.constant 8 : i32
    %17 = arith.addi %c0_i32, %c8_i32 : i32
    %c1_i32 = arith.constant 1 : i32
    %18:2 = scf.for %arg13 = %c0_i32 to %17 step %c1_i32 iter_args(%arg14 = %16, %arg15 = %16) -> (vector<2x32xbf16>, vector<2x32xbf16>)  : i32 {
      %c7_i32 = arith.constant 7 : i32
      %46 = arith.subi %c7_i32, %arg13 : i32
      %47 = arith.index_cast %arg13 : i32 to index
      %c0_62 = arith.constant 0 : index
      %c0_63 = arith.constant 0 : index
      %48 = vector.load %arg11[%47, %c0_62, %c0_63] : memref<8x2x32xf32, #tpu.memory_space<vmem>>, vector<1x2x32xf32>
      %49 = vector.shape_cast %48 : vector<1x2x32xf32> to vector<2x32xf32>
      %cst_64 = arith.constant dense<0.000000e+00> : vector<2x32xf32>
      %50 = tpu.matmul %arg14, %14, %cst_64 {dimension_numbers = #tpu.dot_dimension_numbers<[1], [0], [0], [1], [0, 0, 1, 1], [], []>} : vector<2x32xbf16>, vector<32x32xbf16>, vector<2x32xf32> -> vector<2x32xf32>
      %51 = arith.addf %49, %50 : vector<2x32xf32>
      %52 = math.tanh %51 : vector<2x32xf32>
      %53 = arith.index_cast %46 : i32 to index
      %c0_65 = arith.constant 0 : index
      %c0_66 = arith.constant 0 : index
      %54 = vector.load %arg12[%53, %c0_65, %c0_66] : memref<8x2x32xf32, #tpu.memory_space<vmem>>, vector<1x2x32xf32>
      %55 = vector.shape_cast %54 : vector<1x2x32xf32> to vector<2x32xf32>
      %cst_67 = arith.constant dense<0.000000e+00> : vector<2x32xf32>
      %56 = tpu.matmul %arg15, %15, %cst_67 {dimension_numbers = #tpu.dot_dimension_numbers<[1], [0], [0], [1], [0, 0, 1, 1], [], []>} : vector<2x32xbf16>, vector<32x32xbf16>, vector<2x32xf32> -> vector<2x32xf32>
      %57 = arith.addf %55, %56 : vector<2x32xf32>
      %58 = math.tanh %57 : vector<2x32xf32>
      %59 = arith.index_cast %arg13 : i32 to index
      %c0_68 = arith.constant 0 : index
      %c0_69 = arith.constant 0 : index
      %60 = vector.load %arg11[%59, %c0_68, %c0_69] : memref<8x2x32xf32, #tpu.memory_space<vmem>>, vector<1x2x32xf32>
      %61 = vector.shape_cast %60 : vector<1x2x32xf32> to vector<2x32xf32>
      %62 = vector.shape_cast %52 : vector<2x32xf32> to vector<1x2x32xf32>
      tpu.vector_store %arg11[%59, %c0_68, %c0_69], %62 {strides = array<i32>} : memref<8x2x32xf32, #tpu.memory_space<vmem>>, vector<1x2x32xf32>,
      %63 = arith.index_cast %46 : i32 to index
      %c0_70 = arith.constant 0 : index
      %c0_71 = arith.constant 0 : index
      %64 = vector.load %arg12[%63, %c0_70, %c0_71] : memref<8x2x32xf32, #tpu.memory_space<vmem>>, vector<1x2x32xf32>
      %65 = vector.shape_cast %64 : vector<1x2x32xf32> to vector<2x32xf32>
      %66 = vector.shape_cast %58 : vector<2x32xf32> to vector<1x2x32xf32>
      tpu.vector_store %arg12[%63, %c0_70, %c0_71], %66 {strides = array<i32>} : memref<8x2x32xf32, #tpu.memory_space<vmem>>, vector<1x2x32xf32>,
      %67 = arith.truncf %52 : vector<2x32xf32> to vector<2x32xbf16>
      %68 = arith.truncf %58 : vector<2x32xf32> to vector<2x32xbf16>
      scf.yield %67, %68 : vector<2x32xbf16>, vector<2x32xbf16>
    }
    %c8_i32_17 = arith.constant 8 : i32
    %c0_18 = arith.constant 0 : index
    %c0_19 = arith.constant 0 : index
    %c0_20 = arith.constant 0 : index
    %19 = vector.load %arg11[%c0_18, %c0_19, %c0_20] : memref<8x2x32xf32, #tpu.memory_space<vmem>>, vector<8x2x32xf32>
    %c0_21 = arith.constant 0 : index
    %c0_22 = arith.constant 0 : index
    %c0_23 = arith.constant 0 : index
    %20 = vector.load %arg10[%c0_21, %c0_22, %c0_23] : memref<8x2x128xf32, #tpu.memory_space<vmem>>, vector<8x2x32xf32>
    tpu.vector_store %arg10[%c0_21, %c0_22, %c0_23], %19 {strides = array<i32>} : memref<8x2x128xf32, #tpu.memory_space<vmem>>, vector<8x2x32xf32>,
    %c0_24 = arith.constant 0 : index
    %c0_25 = arith.constant 0 : index
    %c0_26 = arith.constant 0 : index
    %21 = vector.load %arg12[%c0_24, %c0_25, %c0_26] : memref<8x2x32xf32, #tpu.memory_space<vmem>>, vector<8x2x32xf32>
    %c0_27 = arith.constant 0 : index
    %c0_28 = arith.constant 0 : index
    %c32 = arith.constant 32 : index
    %22 = vector.load %arg10[%c0_27, %c0_28, %c32] : memref<8x2x128xf32, #tpu.memory_space<vmem>>, vector<8x2x32xf32>
    tpu.vector_store %arg10[%c0_27, %c0_28, %c32], %21 {strides = array<i32>} : memref<8x2x128xf32, #tpu.memory_space<vmem>>, vector<8x2x32xf32>,
    %c0_29 = arith.constant 0 : index
    %c0_30 = arith.constant 0 : index
    %c0_31 = arith.constant 0 : index
    %23 = vector.load %arg10[%c0_29, %c0_30, %c0_31] : memref<8x2x128xf32, #tpu.memory_space<vmem>>, vector<8x2x64xf32>
    %24 = vector.shape_cast %23 : vector<8x2x64xf32> to vector<16x64xf32>
    %25 = arith.truncf %24 : vector<16x64xf32> to vector<16x64xbf16>
    %c0_32 = arith.constant 0 : index
    %c0_33 = arith.constant 0 : index
    %26 = vector.load %arg6[%c0_32, %c0_33] : memref<64x64xbf16, #tpu.memory_space<vmem>>, vector<64x64xbf16>
    %cst_34 = arith.constant dense<0.000000e+00> : vector<16x64xf32>
    %27 = tpu.matmul %25, %26, %cst_34 {dimension_numbers = #tpu.dot_dimension_numbers<[1], [0], [0], [1], [0, 0, 1, 1], [], []>} : vector<16x64xbf16>, vector<64x64xbf16>, vector<16x64xf32> -> vector<16x64xf32>
    %c0_35 = arith.constant 0 : index
    %c0_36 = arith.constant 0 : index
    %28 = vector.load %arg9[%c0_35, %c0_36] : memref<1x64xf32, #tpu.memory_space<vmem>>, vector<1x64xf32>
    %29 = vector.broadcast %28 : vector<1x64xf32> to vector<16x64xf32>
    %30 = arith.addf %27, %29 : vector<16x64xf32>
    %31 = vector.extract_strided_slice %30 {offsets = [0, 0], sizes = [16, 32], strides = [1, 1]} : vector<16x64xf32> to vector<16x32xf32>
    %32 = vector.shape_cast %31 : vector<16x32xf32> to vector<8x2x32xf32>
    %c0_37 = arith.constant 0 : index
    %c0_38 = arith.constant 0 : index
    %c0_39 = arith.constant 0 : index
    %33 = vector.load %arg11[%c0_37, %c0_38, %c0_39] : memref<8x2x32xf32, #tpu.memory_space<vmem>>, vector<8x2x32xf32>
    tpu.vector_store %arg11[%c0_37, %c0_38, %c0_39], %32 {strides = array<i32>} : memref<8x2x32xf32, #tpu.memory_space<vmem>>, vector<8x2x32xf32>,
    %34 = vector.extract_strided_slice %30 {offsets = [0, 32], sizes = [16, 32], strides = [1, 1]} : vector<16x64xf32> to vector<16x32xf32>
    %35 = vector.shape_cast %34 : vector<16x32xf32> to vector<8x2x32xf32>
    %c0_40 = arith.constant 0 : index
    %c0_41 = arith.constant 0 : index
    %c0_42 = arith.constant 0 : index
    %36 = vector.load %arg12[%c0_40, %c0_41, %c0_42] : memref<8x2x32xf32, #tpu.memory_space<vmem>>, vector<8x2x32xf32>
    tpu.vector_store %arg12[%c0_40, %c0_41, %c0_42], %35 {strides = array<i32>} : memref<8x2x32xf32, #tpu.memory_space<vmem>>, vector<8x2x32xf32>,
    %c0_43 = arith.constant 0 : index
    %c0_44 = arith.constant 0 : index
    %37 = vector.load %arg7[%c0_43, %c0_44] : memref<32x32xbf16, #tpu.memory_space<vmem>>, vector<32x32xbf16>
    %c0_45 = arith.constant 0 : index
    %c0_46 = arith.constant 0 : index
    %38 = vector.load %arg8[%c0_45, %c0_46] : memref<32x32xbf16, #tpu.memory_space<vmem>>, vector<32x32xbf16>
    %cst_47 = arith.constant 0.000000e+00 : bf16
    %39 = vector.broadcast %cst_47 : bf16 to vector<2x32xbf16>
    %c0_i32_48 = arith.constant 0 : i32
    %c8_i32_49 = arith.constant 8 : i32
    %40 = arith.addi %c0_i32_48, %c8_i32_49 : i32
    %c1_i32_50 = arith.constant 1 : i32
    %41:2 = scf.for %arg13 = %c0_i32_48 to %40 step %c1_i32_50 iter_args(%arg14 = %39, %arg15 = %39) -> (vector<2x32xbf16>, vector<2x32xbf16>)  : i32 {
      %c7_i32 = arith.constant 7 : i32
      %46 = arith.subi %c7_i32, %arg13 : i32
      %47 = arith.index_cast %arg13 : i32 to index
      %c0_62 = arith.constant 0 : index
      %c0_63 = arith.constant 0 : index
      %48 = vector.load %arg11[%47, %c0_62, %c0_63] : memref<8x2x32xf32, #tpu.memory_space<vmem>>, vector<1x2x32xf32>
      %49 = vector.shape_cast %48 : vector<1x2x32xf32> to vector<2x32xf32>
      %cst_64 = arith.constant dense<0.000000e+00> : vector<2x32xf32>
      %50 = tpu.matmul %arg14, %37, %cst_64 {dimension_numbers = #tpu.dot_dimension_numbers<[1], [0], [0], [1], [0, 0, 1, 1], [], []>} : vector<2x32xbf16>, vector<32x32xbf16>, vector<2x32xf32> -> vector<2x32xf32>
      %51 = arith.addf %49, %50 : vector<2x32xf32>
      %52 = math.tanh %51 : vector<2x32xf32>
      %53 = arith.index_cast %46 : i32 to index
      %c0_65 = arith.constant 0 : index
      %c0_66 = arith.constant 0 : index
      %54 = vector.load %arg12[%53, %c0_65, %c0_66] : memref<8x2x32xf32, #tpu.memory_space<vmem>>, vector<1x2x32xf32>
      %55 = vector.shape_cast %54 : vector<1x2x32xf32> to vector<2x32xf32>
      %cst_67 = arith.constant dense<0.000000e+00> : vector<2x32xf32>
      %56 = tpu.matmul %arg15, %38, %cst_67 {dimension_numbers = #tpu.dot_dimension_numbers<[1], [0], [0], [1], [0, 0, 1, 1], [], []>} : vector<2x32xbf16>, vector<32x32xbf16>, vector<2x32xf32> -> vector<2x32xf32>
      %57 = arith.addf %55, %56 : vector<2x32xf32>
      %58 = math.tanh %57 : vector<2x32xf32>
      %59 = arith.index_cast %arg13 : i32 to index
      %c0_68 = arith.constant 0 : index
      %c0_69 = arith.constant 0 : index
      %60 = vector.load %arg11[%59, %c0_68, %c0_69] : memref<8x2x32xf32, #tpu.memory_space<vmem>>, vector<1x2x32xf32>
      %61 = vector.shape_cast %60 : vector<1x2x32xf32> to vector<2x32xf32>
      %62 = vector.shape_cast %52 : vector<2x32xf32> to vector<1x2x32xf32>
      tpu.vector_store %arg11[%59, %c0_68, %c0_69], %62 {strides = array<i32>} : memref<8x2x32xf32, #tpu.memory_space<vmem>>, vector<1x2x32xf32>,
      %63 = arith.index_cast %46 : i32 to index
      %c0_70 = arith.constant 0 : index
      %c0_71 = arith.constant 0 : index
      %64 = vector.load %arg12[%63, %c0_70, %c0_71] : memref<8x2x32xf32, #tpu.memory_space<vmem>>, vector<1x2x32xf32>
      %65 = vector.shape_cast %64 : vector<1x2x32xf32> to vector<2x32xf32>
      %66 = vector.shape_cast %58 : vector<2x32xf32> to vector<1x2x32xf32>
      tpu.vector_store %arg12[%63, %c0_70, %c0_71], %66 {strides = array<i32>} : memref<8x2x32xf32, #tpu.memory_space<vmem>>, vector<1x2x32xf32>,
      %67 = arith.truncf %52 : vector<2x32xf32> to vector<2x32xbf16>
      %68 = arith.truncf %58 : vector<2x32xf32> to vector<2x32xbf16>
      scf.yield %67, %68 : vector<2x32xbf16>, vector<2x32xbf16>
    }
    %c8_i32_51 = arith.constant 8 : i32
    %c0_52 = arith.constant 0 : index
    %c0_53 = arith.constant 0 : index
    %c0_54 = arith.constant 0 : index
    %42 = vector.load %arg11[%c0_52, %c0_53, %c0_54] : memref<8x2x32xf32, #tpu.memory_space<vmem>>, vector<8x2x32xf32>
    %c0_55 = arith.constant 0 : index
    %c0_56 = arith.constant 0 : index
    %c64 = arith.constant 64 : index
    %43 = vector.load %arg10[%c0_55, %c0_56, %c64] : memref<8x2x128xf32, #tpu.memory_space<vmem>>, vector<8x2x32xf32>
    tpu.vector_store %arg10[%c0_55, %c0_56, %c64], %42 {strides = array<i32>} : memref<8x2x128xf32, #tpu.memory_space<vmem>>, vector<8x2x32xf32>,
    %c0_57 = arith.constant 0 : index
    %c0_58 = arith.constant 0 : index
    %c0_59 = arith.constant 0 : index
    %44 = vector.load %arg12[%c0_57, %c0_58, %c0_59] : memref<8x2x32xf32, #tpu.memory_space<vmem>>, vector<8x2x32xf32>
    %c0_60 = arith.constant 0 : index
    %c0_61 = arith.constant 0 : index
    %c96 = arith.constant 96 : index
    %45 = vector.load %arg10[%c0_60, %c0_61, %c96] : memref<8x2x128xf32, #tpu.memory_space<vmem>>, vector<8x2x32xf32>
    tpu.vector_store %arg10[%c0_60, %c0_61, %c96], %44 {strides = array<i32>} : memref<8x2x128xf32, #tpu.memory_space<vmem>>, vector<8x2x32xf32>,
    return
  }
  func.func @transform_0(%arg0: i32) -> (i32, i32, i32) {
    %c0_i32 = arith.constant 0 : i32
    %c0_i32_0 = arith.constant 0 : i32
    %c0_i32_1 = arith.constant 0 : i32
    %c0_i32_2 = arith.constant 0 : i32
    return %c0_i32, %c0_i32_0, %c0_i32_1 : i32, i32, i32
  }
  func.func @transform_1(%arg0: i32) -> (i32, i32) {
    %c0_i32 = arith.constant 0 : i32
    %c0_i32_0 = arith.constant 0 : i32
    %c0_i32_1 = arith.constant 0 : i32
    return %c0_i32, %c0_i32_0 : i32, i32
  }
  func.func @transform_2(%arg0: i32) -> (i32, i32) {
    %c0_i32 = arith.constant 0 : i32
    %c0_i32_0 = arith.constant 0 : i32
    %c0_i32_1 = arith.constant 0 : i32
    return %c0_i32, %c0_i32_0 : i32, i32
  }
  func.func @transform_3(%arg0: i32) -> (i32, i32) {
    %c0_i32 = arith.constant 0 : i32
    %c0_i32_0 = arith.constant 0 : i32
    %c0_i32_1 = arith.constant 0 : i32
    return %c0_i32, %c0_i32_0 : i32, i32
  }
  func.func @transform_4(%arg0: i32) -> (i32, i32) {
    %c0_i32 = arith.constant 0 : i32
    %c0_i32_0 = arith.constant 0 : i32
    %c0_i32_1 = arith.constant 0 : i32
    return %c0_i32, %c0_i32_0 : i32, i32
  }
  func.func @transform_5(%arg0: i32) -> (i32, i32) {
    %c0_i32 = arith.constant 0 : i32
    %c0_i32_0 = arith.constant 0 : i32
    %c0_i32_1 = arith.constant 0 : i32
    return %c0_i32, %c0_i32_0 : i32, i32
  }
  func.func @transform_6(%arg0: i32) -> (i32, i32) {
    %c0_i32 = arith.constant 0 : i32
    %c0_i32_0 = arith.constant 0 : i32
    %c0_i32_1 = arith.constant 0 : i32
    return %c0_i32, %c0_i32_0 : i32, i32
  }
  func.func @transform_7(%arg0: i32) -> (i32, i32) {
    %c0_i32 = arith.constant 0 : i32
    %c0_i32_0 = arith.constant 0 : i32
    %c0_i32_1 = arith.constant 0 : i32
    return %c0_i32, %c0_i32_0 : i32, i32
  }
  func.func @transform_8(%arg0: i32) -> (i32, i32) {
    %c0_i32 = arith.constant 0 : i32
    %c0_i32_0 = arith.constant 0 : i32
    %c0_i32_1 = arith.constant 0 : i32
    return %c0_i32, %c0_i32_0 : i32, i32
  }
  func.func @transform_9(%arg0: i32) -> (i32, i32, i32) {
    %c0_i32 = arith.constant 0 : i32
    %c0_i32_0 = arith.constant 0 : i32
    %c0_i32_1 = arith.constant 0 : i32
    %c0_i32_2 = arith.constant 0 : i32
    return %c0_i32, %c0_i32_0, %c0_i32_1 : i32, i32, i32
  }
}

module attributes {stable_mosaic.version = 11 : i64} {
  func.func @_answer_kernel(%arg0: i32, %arg1: memref<2x16x128xf32, #tpu.memory_space<vmem>>, %arg2: memref<2x8x128xf32, #tpu.memory_space<vmem>>, %arg3: memref<2x8xf32, #tpu.memory_space<vmem>>, %arg4: memref<2x4xf32, #tpu.memory_space<vmem>>, %arg5: memref<2x4x16xf32, #tpu.memory_space<vmem>>, %arg6: memref<128x128xbf16, #tpu.memory_space<vmem>>, %arg7: memref<1x128xf32, #tpu.memory_space<vmem>>, %arg8: memref<2x4xf32, #tpu.memory_space<vmem>>) attributes {dimension_semantics = [#tpu.dimension_semantics<arbitrary>], iteration_bounds = array<i64: 1>, scalar_prefetch = 0 : i64, scratch_operands = 0 : i64, tpu.core_type = #tpu.core_type<tc>, window_params = [{pipeline_mode = #tpu.pipeline_mode<synchronous>, transform_indices = @transform_0, window_bounds = array<i64: 2, 16, 128>}, {pipeline_mode = #tpu.pipeline_mode<synchronous>, transform_indices = @transform_1, window_bounds = array<i64: 2, 8, 128>}, {pipeline_mode = #tpu.pipeline_mode<synchronous>, transform_indices = @transform_2, window_bounds = array<i64: 2, 8>}, {pipeline_mode = #tpu.pipeline_mode<synchronous>, transform_indices = @transform_3, window_bounds = array<i64: 2, 4>}, {pipeline_mode = #tpu.pipeline_mode<synchronous>, transform_indices = @transform_4, window_bounds = array<i64: 2, 4, 16>}, {pipeline_mode = #tpu.pipeline_mode<synchronous>, transform_indices = @transform_5, window_bounds = array<i64: 128, 128>}, {pipeline_mode = #tpu.pipeline_mode<synchronous>, transform_indices = @transform_6, window_bounds = array<i64: 1, 128>}, {pipeline_mode = #tpu.pipeline_mode<synchronous>, transform_indices = @transform_7, window_bounds = array<i64: 2, 4>}]} {
    %c0 = arith.constant 0 : index
    %c0_0 = arith.constant 0 : index
    %c0_1 = arith.constant 0 : index
    %0 = vector.load %arg2[%c0, %c0_0, %c0_1] : memref<2x8x128xf32, #tpu.memory_space<vmem>>, vector<2x8x128xf32>
    %c0_2 = arith.constant 0 : index
    %c0_3 = arith.constant 0 : index
    %1 = vector.load %arg3[%c0_2, %c0_3] : memref<2x8xf32, #tpu.memory_space<vmem>>, vector<2x8xf32>
    %cst = arith.constant 1.000000e+00 : f32
    %2 = vector.broadcast %cst : f32 to vector<2x8xf32>
    %3 = arith.subf %2, %1 : vector<2x8xf32>
    %cst_4 = arith.constant dense<0.000000e+00> : vector<2xf32>
    %4 = vector.multi_reduction <add>, %3, %cst_4 [1] : vector<2x8xf32> to vector<2xf32>
    %5 = vector.shape_cast %4 : vector<2xf32> to vector<2x1xf32>
    %cst_5 = arith.constant 1.000000e+00 : f32
    %6 = vector.broadcast %cst_5 : f32 to vector<2x1xf32>
    %7 = arith.maximumf %5, %6 : vector<2x1xf32>
    %8 = vector.broadcast %7 : vector<2x1xf32> to vector<2x8xf32>
    %9 = arith.divf %3, %8 : vector<2x8xf32>
    %10 = vector.shape_cast %9 : vector<2x8xf32> to vector<2x8x1xf32>
    %11 = vector.broadcast %10 : vector<2x8x1xf32> to vector<2x8x128xf32>
    %12 = arith.mulf %11, %0 : vector<2x8x128xf32>
    %cst_6 = arith.constant dense<0.000000e+00> : vector<2x128xf32>
    %13 = vector.multi_reduction <add>, %12, %cst_6 [1] : vector<2x8x128xf32> to vector<2x128xf32>
    %14 = arith.truncf %13 : vector<2x128xf32> to vector<2x128xbf16>
    %c0_7 = arith.constant 0 : index
    %c0_8 = arith.constant 0 : index
    %15 = vector.load %arg6[%c0_7, %c0_8] : memref<128x128xbf16, #tpu.memory_space<vmem>>, vector<128x128xbf16>
    %cst_9 = arith.constant dense<0.000000e+00> : vector<2x128xf32>
    %16 = tpu.matmul %14, %15, %cst_9 {dimension_numbers = #tpu.dot_dimension_numbers<[1], [0], [0], [1], [0, 0, 1, 1], [], []>} : vector<2x128xbf16>, vector<128x128xbf16>, vector<2x128xf32> -> vector<2x128xf32>
    %c0_10 = arith.constant 0 : index
    %c0_11 = arith.constant 0 : index
    %17 = vector.load %arg7[%c0_10, %c0_11] : memref<1x128xf32, #tpu.memory_space<vmem>>, vector<1x128xf32>
    %18 = vector.broadcast %17 : vector<1x128xf32> to vector<2x128xf32>
    %19 = arith.addf %16, %18 : vector<2x128xf32>
    %c0_12 = arith.constant 0 : index
    %c0_13 = arith.constant 0 : index
    %c0_14 = arith.constant 0 : index
    %20 = vector.load %arg1[%c0_12, %c0_13, %c0_14] : memref<2x16x128xf32, #tpu.memory_space<vmem>>, vector<2x16x128xf32>
    %21 = vector.shape_cast %19 : vector<2x128xf32> to vector<2x1x128xf32>
    %22 = vector.broadcast %21 : vector<2x1x128xf32> to vector<2x16x128xf32>
    %23 = arith.mulf %20, %22 : vector<2x16x128xf32>
    %cst_15 = arith.constant dense<0.000000e+00> : vector<2x16xf32>
    %24 = vector.multi_reduction <add>, %23, %cst_15 [2] : vector<2x16x128xf32> to vector<2x16xf32>
    %c0_16 = arith.constant 0 : index
    %c0_17 = arith.constant 0 : index
    %c0_18 = arith.constant 0 : index
    %25 = vector.load %arg5[%c0_16, %c0_17, %c0_18] : memref<2x4x16xf32, #tpu.memory_space<vmem>>, vector<2x4x16xf32>
    %26 = vector.shape_cast %24 : vector<2x16xf32> to vector<2x1x16xf32>
    %27 = vector.broadcast %26 : vector<2x1x16xf32> to vector<2x4x16xf32>
    %28 = arith.mulf %25, %27 : vector<2x4x16xf32>
    %cst_19 = arith.constant dense<0.000000e+00> : vector<2x4xf32>
    %29 = vector.multi_reduction <add>, %28, %cst_19 [2] : vector<2x4x16xf32> to vector<2x4xf32>
    %c0_20 = arith.constant 0 : index
    %c0_21 = arith.constant 0 : index
    %30 = vector.load %arg4[%c0_20, %c0_21] : memref<2x4xf32, #tpu.memory_space<vmem>>, vector<2x4xf32>
    %cst_22 = arith.constant 0.000000e+00 : f32
    %31 = vector.broadcast %cst_22 : f32 to vector<2x4xf32>
    %32 = arith.cmpf ogt, %30, %31 : vector<2x4xf32>
    %cst_23 = arith.constant -1.000000e+30 : f32
    %33 = vector.broadcast %cst_23 : f32 to vector<2x4xf32>
    %34 = arith.select %32, %33, %29 : vector<2x4xi1>, vector<2x4xf32>
    %cst_24 = arith.constant dense<0xFF800000> : vector<2xf32>
    %35 = vector.multi_reduction <maximumf>, %34, %cst_24 [1] : vector<2x4xf32> to vector<2xf32>
    %36 = vector.shape_cast %35 : vector<2xf32> to vector<2x1xf32>
    %37 = vector.broadcast %36 : vector<2x1xf32> to vector<2x4xf32>
    %38 = arith.subf %34, %37 : vector<2x4xf32>
    %39 = math.exp %38 : vector<2x4xf32>
    %cst_25 = arith.constant dense<0.000000e+00> : vector<2xf32>
    %40 = vector.multi_reduction <add>, %39, %cst_25 [1] : vector<2x4xf32> to vector<2xf32>
    %41 = vector.shape_cast %40 : vector<2xf32> to vector<2x1xf32>
    %42 = vector.broadcast %41 : vector<2x1xf32> to vector<2x4xf32>
    %43 = arith.divf %39, %42 : vector<2x4xf32>
    %c0_26 = arith.constant 0 : index
    %c0_27 = arith.constant 0 : index
    %44 = vector.load %arg8[%c0_26, %c0_27] : memref<2x4xf32, #tpu.memory_space<vmem>>, vector<2x4xf32>
    tpu.vector_store %arg8[%c0_26, %c0_27], %43 {strides = array<i32>} : memref<2x4xf32, #tpu.memory_space<vmem>>, vector<2x4xf32>,
    return
  }
  func.func @transform_0(%arg0: i32) -> (i32, i32, i32) {
    %c0_i32 = arith.constant 0 : i32
    %c0_i32_0 = arith.constant 0 : i32
    %c0_i32_1 = arith.constant 0 : i32
    %c0_i32_2 = arith.constant 0 : i32
    return %c0_i32, %c0_i32_0, %c0_i32_1 : i32, i32, i32
  }
  func.func @transform_1(%arg0: i32) -> (i32, i32, i32) {
    %c0_i32 = arith.constant 0 : i32
    %c0_i32_0 = arith.constant 0 : i32
    %c0_i32_1 = arith.constant 0 : i32
    %c0_i32_2 = arith.constant 0 : i32
    return %c0_i32, %c0_i32_0, %c0_i32_1 : i32, i32, i32
  }
  func.func @transform_2(%arg0: i32) -> (i32, i32) {
    %c0_i32 = arith.constant 0 : i32
    %c0_i32_0 = arith.constant 0 : i32
    %c0_i32_1 = arith.constant 0 : i32
    return %c0_i32, %c0_i32_0 : i32, i32
  }
  func.func @transform_3(%arg0: i32) -> (i32, i32) {
    %c0_i32 = arith.constant 0 : i32
    %c0_i32_0 = arith.constant 0 : i32
    %c0_i32_1 = arith.constant 0 : i32
    return %c0_i32, %c0_i32_0 : i32, i32
  }
  func.func @transform_4(%arg0: i32) -> (i32, i32, i32) {
    %c0_i32 = arith.constant 0 : i32
    %c0_i32_0 = arith.constant 0 : i32
    %c0_i32_1 = arith.constant 0 : i32
    %c0_i32_2 = arith.constant 0 : i32
    return %c0_i32, %c0_i32_0, %c0_i32_1 : i32, i32, i32
  }
  func.func @transform_5(%arg0: i32) -> (i32, i32) {
    %c0_i32 = arith.constant 0 : i32
    %c0_i32_0 = arith.constant 0 : i32
    %c0_i32_1 = arith.constant 0 : i32
    return %c0_i32, %c0_i32_0 : i32, i32
  }
  func.func @transform_6(%arg0: i32) -> (i32, i32) {
    %c0_i32 = arith.constant 0 : i32
    %c0_i32_0 = arith.constant 0 : i32
    %c0_i32_1 = arith.constant 0 : i32
    return %c0_i32, %c0_i32_0 : i32, i32
  }
  func.func @transform_7(%arg0: i32) -> (i32, i32) {
    %c0_i32 = arith.constant 0 : i32
    %c0_i32_0 = arith.constant 0 : i32
    %c0_i32_1 = arith.constant 0 : i32
    return %c0_i32, %c0_i32_0 : i32, i32
  }
}

</mosaic_0001>

<bundles_post_ra>
// kernel: rnn_doc_reader_forward.4
= control target key start
LH: loop header
LB: loop body
LE: loop exit
PB: predicated region body
PF: predicated region fallthrough
CT: control target
= control target key end

     0   :  { %v566_v0 = vmov 0.0   ;;  %vm567_vm0 = vmmov 0   ;;  %vm55_vm1 = vcmask 261120   ;;  %v266_v39 = vlaneseq  ;;  %s569_s24 = smov 64   ;;  %s570_s27 = smov 32   ;;  %s738_s4 = inlined_call_operand.vmem [shape: bf16[32,32], index: 4, kind: input, shape index: {}]   ;;  %s739_s0 = inlined_call_operand.vmem [shape: f32[2,16,32], index: 0, kind: input, shape index: {}]   ;;  %s740_s1 = inlined_call_operand.vmem [shape: f32[2,8,32], index: 1, kind: input, shape index: {}]   ;;  %s741_s6 = inlined_call_operand.vmem [shape: f32[2,16,68], index: 6, kind: output, shape index: {}]   ;;  %s742_s5 = inlined_call_operand.vmem [shape: f32[1,32], index: 5, kind: input, shape index: {}]   ;;  %s743_s3 = inlined_call_operand.vmem [shape: f32[2,1,8], index: 3, kind: input, shape index: {}]   ;;  %s744_s2 = inlined_call_operand.vmem [shape: f32[2,16,4], index: 2, kind: input, shape index: {}]  }
   0x1   :  { %511 = vmatprep.subr.bf16.mxu1 %v566_v0  ;;  %v548_v1 = vld [vmem:[%s738_s4 + $0x8] sm:$0xff]   ;;  %515 = vmatprep.mubr.msk.bf16.mxu1 %vm567_vm0, %v566_v0  ;;  %v549_v2 = vld [vmem:[%s738_s4] sm:$0xff]   ;;  %v26_v8 = vld [vmem:[%s739_s0 + $0x10] sm:$0xff]  ;;  %v568_v44 = vmov 0   ;;  %vm280_vm5 = vcmask 64512   ;;  %vm332_vm7 = vcmask 1043456  }
   0x2   :  { %503 = vmatprep.subr.bf16.mxu0 %v548_v1  ;;  %512 = vmatpush3.bf16.msra.mxu1 %v548_v1  ;;  %v24_v3 = vld [vmem:[%s739_s0] sm:$0xff]  ;;  %v25_v4 = vld [vmem:[%s739_s0 + $0x8] sm:$0xff]  ;;  %v27_v9 = vld [vmem:[%s739_s0 + $0x18] sm:$0xff]  ;;  %426 = vst.msk [vmem:[%s741_s6 + $0x10] sm:$0xff] %vm55_vm1, %v26_v8  ;;  %v267_v41 = vshrl.u32 %v266_v39, 7  ;;  %vm444_vm8 = vcmask 523520  }
   0x3   :  { %v624_v5 = vld [vmem:[%s740_s1] sm:$0xff]  ;;  %504 = vmatpush3.bf16.msra.mxu0 %v548_v1  ;;  %513 = vmatprep.subr.bf16.mxu1 %v566_v0  ;;  %v35_v6 = vpack.c.bf16 %v25_v4, %v24_v3  ;;  %424 = vst.msk [vmem:[%s741_s6] sm:$0xff] %vm55_vm1, %v24_v3  ;;  %425 = vst.msk [vmem:[%s741_s6 + $0x8] sm:$0xff] %vm55_vm1, %v25_v4  ;;  %v638_v7 = vld [vmem:[%s740_s1 + $0x8] sm:$0xff]  ;;  %v36_v11 = vpack.c.bf16 %v27_v9, %v26_v8  ;;  %vm469_vm9 = vcmask 556544  }
   0x4   :  { %505 = vmatprep.subr.bf16.mxu0 %v549_v2  ;;  %427 = vst.msk [vmem:[%s741_s6 + $0x18] sm:$0xff] %vm55_vm1, %v27_v9  ;;  %v115_v10 = vpack.c.bf16 %v638_v7, %v624_v5  ;;  %v478_v12 = vld [vmem:[%s742_s5] ss:$0 sm:$0xff]  ;;  %v261_v42 = vld [vmem:[%s743_s3 + $0x1] sm:$0x1]  ;;  %v268_v43 = vsub.s32 0, %v267_v41 }
   0x5   :  { %507 = vmatprep.mubr.msk.bf16.mxu0 %vm55_vm1, %v35_v6  ;;  %v260_v40 = vld [vmem:[%s743_s3] sm:$0x1]  ;;  %vm263_vm3 = vcmp.gt.f32.partialorder %v261_v42, 0.0 }
   0x6   :  { %514 = vmatpush3.bf16.msra.mxu1 %v549_v2  ;;  %vm262_vm2 = vcmp.gt.f32.partialorder %v260_v40, 0.0  ;;  %v265_v47 = vsel %vm263_vm3, 1, %v568_v44  ;;  %v450_v40 = vld [vmem:[%s744_s2 + $0x8] sm:$0xff] }
   0x7   :  { %506 = vmatpush3.bf16.msra.mxu0 %v549_v2  ;;  %525 = vmatprep.subr.bf16.mxu1 %v566_v0  ;;  %v264_v45 = vsel %vm262_vm2, 1, %v568_v44  ;;  %v273_v48 = vrot.slane %v265_v47, %v268_v43 }
   0x8   :  { %519 = vmatprep.subr.bf16.mxu0 %v566_v0  ;;  %v269_v46 = vrot.slane %v264_v45, %v268_v43  ;;  %v451_v43 = vld [vmem:[%s744_s2 + $0x10] sm:$0xff] }
   0x9   :  { %516 = vmatmul.mubr.msk.bf16.vlgmr.msra.gmra.mxu1 %vm55_vm1, %v115_v10  ;;  %vm275_vm6 = vcmp.eq.s32.totalorder %v273_v48, 1 }
   0xa   :  { %508 = vmatmul.mubr.msk.bf16.vlgmr.msra.gmra.mxu0 %vm55_vm1, %v36_v11  ;;  %527 = vmatprep.mubr.msk.bf16.mxu1 %vm567_vm0, %v566_v0  ;;  %vm274_vm4 = vcmp.eq.s32.totalorder %v269_v46, 1 }
   0xb   :  { %521 = vmatprep.mubr.msk.bf16.mxu0 %vm567_vm0, %v566_v0 }
  0xc9   :  { %v153_v13 = vpop.f32.mrf.mxu1 }
  0xca   :  { %v154_v14 = vadd.f32 %v478_v12, %v153_v13  ;;  %v509_v15 = vpop.f32.mrf.mxu0 }
  0xcb   :  { %v517_v16 = vpop.f32.mrf.mxu1  ;;  %v105_v33 = vadd.f32 %v509_v15, %v478_v12 }
  0xcc   :  { %v160_v17 = vmax.f32 %v154_v14, 0.0  ;;  %v96_v18 = vpop.f32.mrf.mxu0 }
  0xcd   :  { %v156_v19 = vpop.f32.mrf.mxu1  ;;  %v97_v23 = vadd.f32 %v478_v12, %v96_v18  ;;  %v113_v37 = vmax.f32 %v105_v33, 0.0 }
  0xce   :  { %v164_v20 = vpack.c.bf16 %v160_v17, %v160_v17  ;;  %v157_v21 = vadd.f32 %v478_v12, %v156_v19  ;;  %v510_v22 = vpop.f32.mrf.mxu0 }
  0xcf   :  { %v518_v24 = vpop.f32.mrf.mxu1  ;;  %v108_v30 = vadd.f32 %v510_v22, %v478_v12  ;;  %v111_v31 = vmax.f32 %v97_v23, 0.0  ;;  %v327_v23 = vpack.c.bf16 %v624_v5, %v624_v5 }
  0xd0   :  { %v161_v25 = vmax.f32 %v157_v21, 0.0  ;;  %v99_v26 = vpop.f32.mrf.mxu0  ;;  %v170_v27 = vsel %vm55_vm1, %v164_v20, 0 }
  0xd1   :  { %v100_v28 = vadd.f32 %v478_v12, %v99_v26  ;;  %520 = vmatpush3.bf16.xpose.msra.mxu0 %v170_v27  ;;  %v114_v36 = vmax.f32 %v108_v30, 0.0  ;;  %v334_v24 = vsel %vm332_vm7, %v327_v23, 0  ;;  %v449_v27 = vld [vmem:[%s744_s2] sm:$0xff] }
  0xd2   :  { %v165_v29 = vpack.c.bf16 %v161_v25, %v161_v25  ;;  %531 = vmatprep.subr.bf16.mxu0 %v566_v0  ;;  %v328_v25 = vpack.c.bf16 %v638_v7, %v638_v7 }
  0xd3   :  { %v112_v32 = vmax.f32 %v100_v28, 0.0  ;;  %v163_v38 = vpack.c.bf16 %v114_v36, %v113_v37 }
  0xd4   :  { %v217_v34 = vsel %vm55_vm1, %v165_v29, 0  ;;  %v381_v26 = vsel %vm332_vm7, %v328_v25, 0 }
  0xd5   :  { %v162_v35 = vpack.c.bf16 %v112_v32, %v111_v31  ;;  %526 = vmatpush3.bf16.xpose.msra.mxu1 %v217_v34 }
  0xd6   :  { %537 = vmatprep.subr.bf16.mxu1 %v566_v0 }
  0xd8   :  { %522 = vmatmul.mubr.msk.bf16.vlgmr.msra.gmra.mxu0 %vm55_vm1, %v162_v35 }
  0xd9   :  { %533 = vmatprep.mubr.msk.bf16.mxu0 %vm567_vm0, %v566_v0  ;;  %532 = vmatpush3.bf16.msra.mxu0 %v334_v24 }
  0xdc   :  { %528 = vmatmul.mubr.msk.bf16.vlgmr.msra.gmra.mxu1 %vm55_vm1, %v163_v38 }
  0xdd   :  { %539 = vmatprep.mubr.msk.bf16.mxu1 %vm567_vm0, %v566_v0  ;;  %538 = vmatpush3.bf16.msra.mxu1 %v381_v26 }
 0x198   :  { %v206_v49 = vpop.f32.mrf.mxu0 }
 0x199   :  { %v276_v50 = vsel %vm274_vm4, -1e+30, %v206_v49 }
 0x19a   :  { %v523_v51 = vpop.f32.mrf.mxu0  ;;  %v281_v52 = vsel %vm280_vm5, %v276_v50, -inf }
 0x19b   :  { %282 = vmax.xlane.f32.xlu0 %v281_v52 }
 0x19c   :  { %v209_v53 = vpop.f32.mrf.mxu0  ;;  %v253_v54 = vpop.f32.mrf.mxu1 }
 0x19d   :  { %v277_v55 = vsel %vm274_vm4, -1e+30, %v209_v53  ;;  %v278_v56 = vsel %vm275_vm6, -1e+30, %v253_v54 }
 0x19e   :  { %v524_v57 = vpop.f32.mrf.mxu0  ;;  %v529_v58 = vpop.f32.mrf.mxu1  ;;  %v287_v59 = vsel %vm280_vm5, %v278_v56, -inf  ;;  %v284_v60 = vsel %vm280_vm5, %v277_v55, -inf }
 0x19f   :  { %288 = vmax.xlane.f32.xlu1 %v287_v59  ;;  %285 = vmax.xlane.f32.xlu0 %v284_v60 }
 0x1a0   :  { %v256_v61 = vpop.f32.mrf.mxu1 }
 0x1a1   :  { %v279_v62 = vsel %vm275_vm6, -1e+30, %v256_v61 }
 0x1a2   :  { %v530_v63 = vpop.f32.mrf.mxu1  ;;  %v290_v0 = vsel %vm280_vm5, %v279_v62, -inf }
 0x1a3   :  { %291 = vmax.xlane.f32.xlu1 %v290_v0 }
 0x224   :  { %v283_v1 = vpop.xlane.xlu0 %282 }
 0x225   :  { %v293_v2 = vsub.f32 %v276_v50, %v283_v1  ;;  %v452_v50 = vld [vmem:[%s744_s2 + $0x18] sm:$0xff] }
 0x227   :  { %v297_v3 = vmul.f32 1.442695, %v293_v2 }
 0x228   :  { %v289_v4 = vpop.xlane.xlu1 %288  ;;  %v286_v6 = vpop.xlane.xlu0 %285 }
 0x229   :  { %550 = vpow2.f32 %v297_v3  ;;  %v295_v8 = vsub.f32 %v278_v56, %v289_v4  ;;  %v294_v9 = vsub.f32 %v277_v55, %v286_v6 }
 0x22b   :  { %v301_v10 = vmul.f32 1.442695, %v295_v8  ;;  %v299_v11 = vmul.f32 1.442695, %v294_v9 }
 0x22c   :  { %v292_v12 = vpop.xlane.xlu1 %291 }
 0x22d   :  { %552 = vpow2.f32 %v301_v10  ;;  %v296_v13 = vsub.f32 %v279_v62, %v292_v12 }
 0x22e   :  { %554 = vpow2.f32 %v299_v11 }
 0x22f   :  { %v303_v14 = vmul.f32 1.442695, %v296_v13 }
 0x231   :  { %556 = vpow2.f32 %v303_v14 }
 0x236   :  { %v551_v15 = vpop.eup %550 }
 0x237   :  { %v305_v16 = vsel %vm280_vm5, %v551_v15, 0.0 }
 0x238   :  { %306 = vadd.xlane.f32.xlu0 %v305_v16 }
 0x23a   :  { %v553_v17 = vpop.eup %552 }
 0x23b   :  { %v555_v18 = vpop.eup %554  ;;  %v311_v19 = vsel %vm280_vm5, %v553_v17, 0.0 }
 0x23c   :  { %312 = vadd.xlane.f32.xlu0 %v311_v19  ;;  %v308_v20 = vsel %vm280_vm5, %v555_v18, 0.0 }
 0x23d   :  { %309 = vadd.xlane.f32.xlu1 %v308_v20 }
 0x23e   :  { %v557_v21 = vpop.eup %556 }
 0x23f   :  { %v314_v22 = vsel %vm280_vm5, %v557_v21, 0.0 }
 0x241   :  { %315 = vadd.xlane.f32.xlu1 %v314_v22 }
 0x252   :  { %457 = vrot.lane.b32.xlu0 %v449_v27, %s569_s24  ;;  %459 = vrot.lane.b32.xlu1 %v450_v40, %s569_s24 }
 0x2c1   :  { %v307_v28 = vpop.xlane.xlu0 %306 }
 0x2c2   :  { %558 = vrcp.f32 %v307_v28 }
 0x2c5   :  { %v313_v30 = vpop.xlane.xlu0 %312 }
 0x2c6   :  { %v310_v29 = vpop.xlane.xlu1 %309 }
 0x2c7   :  { %560 = vrcp.f32 %v310_v29 }
 0x2c8   :  { %562 = vrcp.f32 %v313_v30 }
 0x2c9   :  { %v458_v51 = vpop.permute.xlu0 %457 }
 0x2ca   :  { %v316_v5 = vpop.xlane.xlu1 %315 }
 0x2cb   :  { %564 = vrcp.f32 %v316_v5 }
 0x2ce   :  { %v460_v52 = vpop.permute.xlu1 %459 }
 0x2cf   :  { %v559_v31 = vpop.eup %558 }
 0x2d0   :  { %v321_v7 = vmul.f32 %v559_v31, %v551_v15 }
 0x2d4   :  { %v561_v32 = vpop.eup %560 }
 0x2d5   :  { %v322_v33 = vmul.f32 %v561_v32, %v555_v18  ;;  %v563_v34 = vpop.eup %562 }
 0x2d6   :  { %v323_v37 = vmul.f32 %v563_v34, %v553_v17 }
 0x2d7   :  { %v325_v35 = vpack.c.bf16 %v322_v33, %v321_v7 }
 0x2d8   :  { %v565_v36 = vpop.eup %564 }
 0x2d9   :  { %534 = vmatmul.mubr.msk.bf16.vlgmr.msra.gmra.mxu0 %vm280_vm5, %v325_v35  ;;  %v324_v38 = vmul.f32 %v565_v36, %v557_v21 }
 0x2db   :  { %v326_v39 = vpack.c.bf16 %v324_v38, %v323_v37 }
 0x2dd   :  { %540 = vmatmul.mubr.msk.bf16.vlgmr.msra.gmra.mxu1 %vm280_vm5, %v326_v39 }
 0x399   :  { %v370_v41 = vpop.f32.mrf.mxu0 }
 0x39a   :  { %432 = vrot.lane.b32.xlu0 %v370_v41, %s570_s27 }
 0x39b   :  { %v535_v42 = vpop.f32.mrf.mxu0 }
 0x39d   :  { %v373_v44 = vpop.f32.mrf.mxu0  ;;  %v417_v45 = vpop.f32.mrf.mxu1 }
 0x39e   :  { %434 = vrot.lane.b32.xlu1 %v373_v44, %s570_s27  ;;  %461 = vrot.lane.b32.xlu0 %v451_v43, %s569_s24 }
 0x39f   :  { %v536_v46 = vpop.f32.mrf.mxu0  ;;  %v541_v47 = vpop.f32.mrf.mxu1 }
 0x3a1   :  { %v420_v48 = vpop.f32.mrf.mxu1 }
 0x3a2   :  { %436 = vrot.lane.b32.xlu1 %v417_v45, %s570_s27 }
 0x3a3   :  { %v542_v49 = vpop.f32.mrf.mxu1 }
 0x3a6   :  { %438 = vrot.lane.b32.xlu1 %v420_v48, %s570_s27 }
 0x3aa   :  { %463 = vrot.lane.b32.xlu1 %v452_v50, %s569_s24 }
 0x40c   :  { %v433_v53 = vpop.permute.xlu0 %432 }
 0x40d   :  { %445 = vst.msk [vmem:[%s741_s6] sm:$0xff] %vm444_vm8, %v433_v53 }
 0x40e   :  { %470 = vst.msk [vmem:[%s741_s6] sm:$0xff] %vm469_vm9, %v458_v51 }
 0x410   :  { %v435_v54 = vpop.permute.xlu1 %434  ;;  %v462_v55 = vpop.permute.xlu0 %461 }
 0x411   :  { %446 = vst.msk [vmem:[%s741_s6 + $0x8] sm:$0xff] %vm444_vm8, %v435_v54 }
 0x412   :  { %471 = vst.msk [vmem:[%s741_s6 + $0x8] sm:$0xff] %vm469_vm9, %v460_v52 }
 0x414   :  { %v437_v56 = vpop.permute.xlu1 %436 }
 0x415   :  { %447 = vst.msk [vmem:[%s741_s6 + $0x10] sm:$0xff] %vm444_vm8, %v437_v56 }
 0x416   :  { %472 = vst.msk [vmem:[%s741_s6 + $0x10] sm:$0xff] %vm469_vm9, %v462_v55 }
 0x418   :  { %v439_v57 = vpop.permute.xlu1 %438 }
 0x419   :  { %448 = vst.msk [vmem:[%s741_s6 + $0x18] sm:$0xff] %vm444_vm8, %v439_v57 }
 0x41c   :  { %v464_v58 = vpop.permute.xlu1 %463 }
 0x41d   :  { %473 = vst.msk [vmem:[%s741_s6 + $0x18] sm:$0xff] %vm469_vm9, %v464_v58 }

// kernel: rnn_doc_reader_forward.7
= control target key start
LH: loop header
LB: loop body
LE: loop exit
PB: predicated region body
PF: predicated region fallthrough
CT: control target
= control target key end

     0   :  { %vm32_vm0 = vcmask 58368   ;;  %s525_s0 = inlined_call_operand.vmem [shape: f32[2,16,128], index: 0, kind: input, shape index: {}]   ;;  %s526_s1 = inlined_call_operand.vmem [shape: f32[2,8,128], index: 1, kind: input, shape index: {}]   ;;  %s527_s2 = inlined_call_operand.vmem [shape: f32[2,8], index: 2, kind: input, shape index: {}]   ;;  %s528_s3 = inlined_call_operand.vmem [shape: f32[2,4], index: 3, kind: input, shape index: {}]   ;;  %s529_s4 = inlined_call_operand.vmem [shape: f32[2,4,16], index: 4, kind: input, shape index: {}]   ;;  %s530_s5 = inlined_call_operand.vmem [shape: bf16[128,128], index: 5, kind: input, shape index: {}]   ;;  %s531_s6 = inlined_call_operand.vmem [shape: f32[1,128], index: 6, kind: input, shape index: {}]   ;;  %s532_s7 = inlined_call_operand.hbm [shape: f32[2,4], index: 7, kind: output, shape index: {}]  }
   0x1   :  { %v30_v0 = vld [vmem:[%s527_s2] sm:$0x3] }
   0x2   :  { %v31_v1 = vsub.f32 1.0, %v30_v0 }
   0x4   :  { %v33_v2 = vsel %vm32_vm0, %v31_v1, 0.0 }
   0x5   :  { %34 = vadd.xlane.f32.xlu0 %v33_v2 }
   0x6   :  { %12 = vsyncpa [#allocation3], 0  ;;  %v366_v3 = vld [vmem:[%s530_s5 + $0x38] sm:$0xff]   ;;  %v402_v4 = vmov 0.0   ;;  %v367_v5 = vld [vmem:[%s530_s5 + $0x30] sm:$0xff]   ;;  %v39_v9 = vlaneseq  ;;  %vm403_vm1 = vmmov 0  }
   0x7   :  { %342 = vmatprep.subr.bf16.mxu0 %v402_v4  ;;  %v368_v6 = vld [vmem:[%s530_s5 + $0x28] sm:$0xff]   ;;  %v369_v10 = vld [vmem:[%s530_s5 + $0x20] sm:$0xff]   ;;  %v370_v12 = vld [vmem:[%s530_s5 + $0x18] sm:$0xff]   ;;  %358 = vmatprep.mubr.msk.bf16.mxu0 %vm403_vm1, %v402_v4  ;;  %vm96_vm2 = vcmask 1041409   ;;  %v404_v46 = vmov 1966171168  }
   0x8   :  { %343 = vmatpush3.bf16.msra.mxu0 %v366_v3  ;;  %v462_v11 = vshrl.u32 %v39_v9, 7  ;;  %v371_v16 = vld [vmem:[%s530_s5 + $0x10] sm:$0xff]   ;;  %v372_v20 = vld [vmem:[%s530_s5 + $0x8] sm:$0xff]   ;;  %v373_v21 = vld [vmem:[%s530_s5] sm:$0xff]   ;;  %v194_v47 = vunpack.c.l.s4 %v404_v46  ;;  %vm254_vm3 = vcmask 130112   ;;  %vm275_vm4 = vcmask 125952  }
   0x9   :  { %344 = vmatprep.subr.bf16.mxu0 %v402_v4  ;;  %v29_v22 = vld [vmem:[%s526_s1 + $0x8] sm:$0xff]  ;;  %v28_v23 = vld [vmem:[%s526_s1] sm:$0xff]  ;;  %v190_v2 = vld [vmem:[%s525_s0 + $0x10] sm:$0xff]  ;;  %vm297_vm6 = vcmask 25600  }
   0xa   :  { %v48_v13 = vsub.s32 1, %v462_v11  ;;  %v469_v14 = vsub.s32 0, %v462_v11  ;;  %v195_v48 = vunpack.c.0.s8 %v194_v47  ;;  %v324_v49 = vld [vmem:[%s531_s6] ss:$0 sm:$0xff]  ;;  %v189_v59 = vld [vmem:[%s525_s0 + $0x8] sm:$0xff] }
   0xb   :  { %v188_v60 = vld [vmem:[%s525_s0] sm:$0xff] }
   0xc   :  { %345 = vmatpush3.bf16.msra.mxu0 %v367_v5  ;;  %v198_v50 = vsub.s32 %v195_v48, %v462_v11 }
   0xd   :  { %346 = vmatprep.subr.bf16.mxu0 %v402_v4 }
  0x10   :  { %347 = vmatpush3.bf16.msra.mxu0 %v368_v6  ;;  %v244_v6 = vand.u32 127, %v39_v9 }
  0x11   :  { %348 = vmatprep.subr.bf16.mxu0 %v402_v4 }
  0x14   :  { %349 = vmatpush3.bf16.msra.mxu0 %v369_v10  ;;  %v247_v10 = vsub.s32 %v244_v6, %v462_v11 }
  0x15   :  { %350 = vmatprep.subr.bf16.mxu0 %v402_v4 }
  0x18   :  { %351 = vmatpush3.bf16.msra.mxu0 %v370_v12 }
  0x19   :  { %352 = vmatprep.subr.bf16.mxu0 %v402_v4 }
  0x1c   :  { %353 = vmatpush3.bf16.msra.mxu0 %v371_v16  ;;  %v237_v16 = vld [vmem:[%s529_s4] sm:$0xf] }
  0x1d   :  { %354 = vmatprep.subr.bf16.mxu0 %v402_v4 }
  0x20   :  { %355 = vmatpush3.bf16.msra.mxu0 %v372_v20 }
  0x21   :  { %356 = vmatprep.subr.bf16.mxu0 %v402_v4  ;;  %v191_v4 = vld [vmem:[%s525_s0 + $0x18] sm:$0xff] }
  0x24   :  { %357 = vmatpush3.bf16.msra.mxu0 %v373_v21 }
  0x8e   :  { %v35_v7 = vpop.xlane.xlu0 %34 }
  0x8f   :  { %v36_v8 = vmax.f32 %v35_v7, 1.0  ;;  %v249_v7 = vadd.s32 4294967288, %v244_v6 }
  0x91   :  { %374 = vrcp.f32 %v36_v8  ;;  %v252_v8 = vsub.s32 %v249_v7, %v462_v11  ;;  %v238_v11 = vld [vmem:[%s529_s4 + $0x4] sm:$0xf] }
  0x9e   :  { %v375_v15 = vpop.eup %374 }
  0x9f   :  { %v38_v17 = vmul.f32 %v375_v15, %v31_v1 }
  0xa1   :  { %v49_v18 = vrot.slane %v38_v17, %v48_v13  ;;  %v42_v19 = vrot.slane %v38_v17, %v469_v14 }
  0xa3   :  { %51 = vbcast.lane.b32.xlu1 %v49_v18, 256  ;;  %44 = vbcast.lane.b32.xlu0 %v42_v19, 256 }
 0x115   :  { %v52_v24 = vpop.permute.xlu1 %51  ;;  %v45_v25 = vpop.permute.xlu0 %44 }
 0x116   :  { %v54_v26 = vmul.f32 %v52_v24, %v29_v22  ;;  %v53_v27 = vmul.f32 %v45_v25, %v28_v23 }
 0x118   :  { %v61_v28 = vrot.slane %v54_v26, 4  ;;  %v55_v29 = vrot.slane %v53_v27, 4 }
 0x11a   :  { %v62_v30 = vadd.f32 %v61_v28, %v54_v26  ;;  %v56_v31 = vadd.f32 %v55_v29, %v53_v27  ;;  %v282_v27 = vld [vmem:[%s528_s3] sm:$0x3]  ;;  %s405_s3 = smov [#allocation2]  }
 0x11b   :  { %vm283_vm5 = vcmp.gt.f32.partialorder %v282_v27, 0.0  ;;  %s316_s4 = sshll.u32 %s405_s3, 4  ;;  %s317_s4 = int_to_ptr.vmem [resolvable:$true] %s316_s4 }
 0x11c   :  { %v63_v32 = vrot.slane %v62_v30, 2  ;;  %v57_v33 = vrot.slane %v56_v31, 2  ;;  %s380_s10 = scalar_lea.vmem %s317_s4, 32  ;;  %p385_p1 = scmp.lt.s32.totalorder %s317_s4, %s317_s4 }
 0x11d   :  { %p381_p0 = scmp.ne.s32.totalorder %s317_s4, %s380_s10  ;;  %p386_p2 = scmp.lt.s32.totalorder %s380_s10, %s380_s10 }
 0x11e   :  { %v64_v34 = vadd.f32 %v63_v32, %v62_v30  ;;  %v58_v35 = vadd.f32 %v57_v33, %v56_v31 }
 0x11f   :  { %p387_p3 = por %p386_p2, %p385_p1 }
 0x120   :  { %v65_v36 = vrot.slane %v64_v34, 1  ;;  %v59_v37 = vrot.slane %v58_v35, 1 }
 0x121   :  { %p388_p4 = pnand %p387_p3, %p381_p0 }
 0x122   :  { %v66_v38 = vadd.f32 %v65_v36, %v64_v34  ;;  %v60_v39 = vadd.f32 %v59_v37, %v58_v35 }
 0x124   :  { %v68_v40 = vpack.c.bf16 %v66_v38, %v66_v38  ;;  %v67_v41 = vpack.c.bf16 %v60_v39, %v60_v39 }
 0x126   :  { %v95_v42 = vunpack.c.l.b16 %v68_v40  ;;  %v94_v43 = vunpack.c.l.b16 %v67_v41 }
 0x128   :  { %v97_v44 = vsel %vm96_vm2, %v95_v42, %v94_v43 }
 0x129   :  { %v98_v45 = vpack.c.b16 %v97_v44, %v97_v44 }
 0x12b   :  { %359 = vmatmul.mubr.bf16.vlgmr.msra.gmra.mxu0 %v98_v45 }
 0x1eb   :  { %v182_v51 = vpop.f32.mrf.mxu0 }
 0x1ec   :  { %v183_v52 = vadd.f32 %v324_v49, %v182_v51 }
 0x1ed   :  { %v360_v53 = vpop.f32.mrf.mxu0 }
 0x1ee   :  { %v199_v54 = vrot.slane %v183_v52, %v198_v50 }
 0x1ef   :  { %v185_v55 = vpop.f32.mrf.mxu0 }
 0x1f0   :  { %v200_v56 = vcombine.high %v199_v54, %v199_v54  ;;  %v207_v57 = vrot.slane %v199_v54, %v198_v50 }
 0x1f1   :  { %v361_v58 = vpop.f32.mrf.mxu0 }
 0x1f2   :  { %v218_v61 = vrot.slane %v207_v57, %v469_v14  ;;  %v214_v62 = vrot.slane %v200_v56, %v198_v50 }
 0x1f4   :  { %v226_v63 = vmul.f32 %v218_v61, %v189_v59  ;;  %v225_v0 = vmul.f32 %v218_v61, %v188_v60  ;;  %v222_v1 = vrot.slane %v214_v62, %v469_v14 }
 0x1f6   :  { %231 = vadd.xlane.f32.xlu0 %v226_v63  ;;  %229 = vadd.xlane.f32.xlu1 %v225_v0  ;;  %v227_v3 = vmul.f32 %v222_v1, %v190_v2  ;;  %v228_v5 = vmul.f32 %v222_v1, %v191_v4 }
 0x1fa   :  { %233 = vadd.xlane.f32.xlu1 %v227_v3 }
 0x1fe   :  { %235 = vadd.xlane.f32.xlu1 %v228_v5 }
 0x27f   :  { %v232_v12 = vpop.xlane.xlu0 %231  ;;  %v230_v13 = vpop.xlane.xlu1 %229 }
 0x280   :  { %v253_v14 = vrot.slane %v232_v12, %v252_v8  ;;  %v248_v15 = vrot.slane %v230_v13, %v247_v10 }
 0x282   :  { %v255_v17 = vsel %vm254_vm3, %v253_v14, %v248_v15 }
 0x283   :  { %v234_v18 = vpop.xlane.xlu1 %233  ;;  %v273_v19 = vmul.f32 %v255_v17, %v237_v16 }
 0x284   :  { %v259_v21 = vrot.slane %v234_v18, %v247_v10 }
 0x285   :  { %v276_v20 = vsel %vm275_vm4, %v273_v19, 0.0 }
 0x286   :  { %277 = vadd.xlane.f32.xlu1 %v276_v20 }
 0x287   :  { %v236_v9 = vpop.xlane.xlu1 %235 }
 0x288   :  { %v263_v22 = vrot.slane %v236_v9, %v252_v8 }
 0x28a   :  { %v264_v23 = vsel %vm254_vm3, %v263_v22, %v259_v21 }
 0x28b   :  { %v274_v24 = vmul.f32 %v264_v23, %v238_v11 }
 0x28d   :  { %v279_v25 = vsel %vm275_vm4, %v274_v24, 0.0 }
 0x28e   :  { %280 = vadd.xlane.f32.xlu1 %v279_v25 }
 0x30f   :  { %v278_v26 = vpop.xlane.xlu1 %277 }
 0x310   :  { %v289_v29 = vrot.slane %v278_v26, %v247_v10 }
 0x317   :  { %v281_v28 = vpop.xlane.xlu1 %280 }
 0x318   :  { %v293_v30 = vrot.slane %v281_v28, %v247_v10 }
 0x31a   :  { %v294_v31 = vsel %vm96_vm2, %v293_v30, %v289_v29 }
 0x31b   :  { %v296_v32 = vsel %vm283_vm5, -1e+30, %v294_v31 }
 0x31c   :  { %v298_v33 = vsel %vm297_vm6, %v296_v32, -inf }
 0x31d   :  { %299 = vmax.xlane.f32.xlu1 %v298_v33 }
 0x3a6   :  { %v300_v34 = vpop.xlane.xlu1 %299 }
 0x3a7   :  { %v301_v35 = vsub.f32 %v296_v32, %v300_v34 }
 0x3a9   :  { %v302_v36 = vmul.f32 1.442695, %v301_v35 }
 0x3ab   :  { %376 = vpow2.f32 %v302_v36 }
 0x3b8   :  { %v377_v37 = vpop.eup %376 }
 0x3b9   :  { %v304_v38 = vsel %vm297_vm6, %v377_v37, 0.0 }
 0x3ba   :  { %305 = vadd.xlane.f32.xlu0 %v304_v38 }
 0x443   :  { %v306_v39 = vpop.xlane.xlu0 %305 }
 0x444   :  { %378 = vrcp.f32 %v306_v39 }
 0x451   :  { %v379_v40 = vpop.eup %378 }
 0x452   :  { %v308_v41 = vmul.f32 %v379_v40, %v377_v37 }
 0x454   :  { %309 = vst.msk [vmem:[#allocation2] sm:$0x3] %vm297_vm6, %v308_v41 }
 0x455   :  { %391 = shalt.err (!%p388_p4)
}
 0x456   :  { %319 = dma.vmem_to_hbm [thread:$0]  %s317_s4, 32, %s532_s7, [#allocation3]  }
 0x457   :  { %400 = dma.done.wait [#allocation3], 32  }
 0x458   :  { %401 = vsyncadd [#allocation3], 4294967264 }
 0x459   :  { %323 = vsyncpa [#allocation3], 1 }

// kernel: rnn_doc_reader_forward.6
= control target key start
LH: loop header
LB: loop body
LE: loop exit
PB: predicated region body
PF: predicated region fallthrough
CT: control target
= control target key end

     0   :  { %v54_v0 = vlaneseq  ;;  %v1269_v1 = vmov 0.0   ;;  %vm1270_vm0 = vmmov 0   ;;  %v1271_v3 = vmov 1983009808   ;;  %s1762_s5 = inlined_call_operand.vmem [shape: bf16[64,64], index: 5, kind: input, shape index: {}]   ;;  %s1763_s6 = inlined_call_operand.vmem [shape: bf16[32,32], index: 6, kind: input, shape index: {}]   ;;  %s1764_s7 = inlined_call_operand.vmem [shape: bf16[32,32], index: 7, kind: input, shape index: {}]   ;;  %s1765_s8 = inlined_call_operand.vmem [shape: f32[1,64], index: 8, kind: input, shape index: {}]   ;;  %s1766_s9 = inlined_call_operand.vmem [shape: f32[8,2,128], index: 9, kind: output, shape index: {}]   ;;  %s1767_s1 = inlined_call_operand.vmem [shape: bf16[32,64], index: 1, kind: input, shape index: {}]   ;;  %s1768_s0 = inlined_call_operand.vmem [shape: f32[8,2,32], index: 0, kind: input, shape index: {}]   ;;  %s1769_s4 = inlined_call_operand.vmem [shape: f32[1,64], index: 4, kind: input, shape index: {}]   ;;  %s1770_s2 = inlined_call_operand.vmem [shape: bf16[32,32], index: 2, kind: input, shape index: {}]   ;;  %s1771_s3 = inlined_call_operand.vmem [shape: bf16[32,32], index: 3, kind: input, shape index: {}]  }
   0x1   :  { %1097 = vmatprep.subr.bf16.mxu0 %v1269_v1  ;;  %v1207_v2 = vld [vmem:[%s1767_s1 + $0x8] sm:$0xff]   ;;  %1101 = vmatprep.mubr.msk.bf16.mxu0 %vm1270_vm0, %v1269_v1  ;;  %v52_v4 = vunpack.c.l.s4 %v1271_v3  ;;  %v1208_v5 = vld [vmem:[%s1767_s1] sm:$0xff]   ;;  %vm109_vm1 = vcmask 261120   ;;  %vm198_vm2 = vcmask 254976  }
   0x2   :  { %v55_v6 = vshrl.u32 %v54_v0, 7  ;;  %1098 = vmatpush3.bf16.msra.mxu0 %v1207_v2  ;;  %v33_v7 = vld [vmem:[%s1768_s0] sm:$0x3]  ;;  %v34_v8 = vld [vmem:[%s1768_s0 + $0x2] sm:$0x3] }
   0x3   :  { %v35_v9 = vld [vmem:[%s1768_s0 + $0x4] sm:$0x3]  ;;  %v53_v10 = vunpack.c.0.s8 %v52_v4  ;;  %1099 = vmatprep.subr.bf16.mxu0 %v1269_v1  ;;  %v36_v11 = vld [vmem:[%s1768_s0 + $0x6] sm:$0x3]  ;;  %v37_v12 = vld [vmem:[%s1768_s0 + $0x8] sm:$0x3]  ;;  %v49_v14 = vcombine.low %v33_v7, %v34_v8 }
   0x4   :  { %v38_v13 = vld [vmem:[%s1768_s0 + $0xa] sm:$0x3]  ;;  %v39_v15 = vld [vmem:[%s1768_s0 + $0xc] sm:$0x3]  ;;  %v40_v16 = vld [vmem:[%s1768_s0 + $0xe] sm:$0x3]  ;;  %v50_v17 = vcombine.low %v35_v9, %v36_v11 }
   0x5   :  { %v1363_v18 = vsub.s32 %v53_v10, %v55_v6  ;;  %v66_v19 = vcombine.low %v37_v12, %v38_v13  ;;  %v67_v20 = vcombine.low %v39_v15, %v40_v16  ;;  %v1051_v28 = vld [vmem:[%s1769_s4] ss:$0 sm:$0xff]  ;;  %s1272_s4 = smov 96   ;;  %v1390_v45 = vld [vmem:[%s1770_s2 + $0x4] sm:$0xf]  ;;  %v1245_v6 = vmov 0  }
   0x6   :  { %1100 = vmatpush3.bf16.msra.mxu0 %v1208_v5  ;;  %v1385_v44 = vld [vmem:[%s1770_s2] sm:$0xf]  ;;  %v1395_v46 = vld [vmem:[%s1770_s2 + $0x8] sm:$0xf]  ;;  %v1404_v50 = vld [vmem:[%s1770_s2 + $0xc] sm:$0xf] }
   0x7   :  { %v57_v21 = vrot.slane %v49_v14, %v1363_v18  ;;  %v64_v22 = vrot.slane %v50_v17, %v1363_v18  ;;  %v74_v23 = vrot.slane %v66_v19, %v1363_v18  ;;  %v81_v24 = vrot.slane %v67_v20, %v1363_v18  ;;  %v1409_v51 = vld [vmem:[%s1771_s3] sm:$0xf]  ;;  %v1414_v52 = vld [vmem:[%s1771_s3 + $0x4] sm:$0xf]  ;;  %v1420_v53 = vld [vmem:[%s1771_s3 + $0x8] sm:$0xf] }
   0x8   :  { %v1425_v54 = vld [vmem:[%s1771_s3 + $0xc] sm:$0xf]  ;;  %v1249_v7 = vmov 0   ;;  %s1449_s3 = smov 0  }
   0x9   :  { %v65_v25 = vcombine.low %v57_v21, %v64_v22  ;;  %v82_v26 = vcombine.low %v74_v23, %v81_v24 }
   0xb   :  { %v85_v27 = vpack.c.bf16 %v82_v26, %v65_v25 }
   0xd   :  { %1102 = vmatmul.mubr.msk.bf16.vlgmr.msra.gmra.mxu0 %vm109_vm1, %v85_v27 }
  0xcd   :  { %v147_v29 = vpop.f32.mrf.mxu0 }
  0xce   :  { %v148_v30 = vadd.f32 %v1051_v28, %v147_v29 }
  0xcf   :  { %v1103_v31 = vpop.f32.mrf.mxu0 }
  0xd0   :  { %v156_v32 = vcombine.high %v148_v30, %v148_v30  ;;  %v163_v33 = vrot.slane %v148_v30, %v1363_v18 }
  0xd1   :  { %v150_v34 = vpop.f32.mrf.mxu0 }
  0xd2   :  { %v170_v35 = vrot.slane %v156_v32, %v1363_v18  ;;  %199 = vst.msk [vmem:[#allocation2] sm:$0x3] %vm198_vm2, %v163_v33  ;;  %v151_v36 = vadd.f32 %v1051_v28, %v150_v34  ;;  %v213_v37 = vrot.slane %v163_v33, %v1363_v18  ;;  %v171_v38 = vcombine.high %v163_v33, %v163_v33 }
  0xd3   :  { %v1104_v39 = vpop.f32.mrf.mxu0 }
  0xd4   :  { %201 = vst.msk [vmem:[#allocation2 + $0x4] sm:$0x3] %vm198_vm2, %v170_v35  ;;  %v173_v40 = vcombine.high %v151_v36, %v151_v36  ;;  %v180_v41 = vrot.slane %v151_v36, %v1363_v18  ;;  %263 = vrot.lane.b32.xlu0 %v213_v37, %s1272_s4  ;;  %v227_v42 = vrot.slane %v170_v35, %v1363_v18  ;;  %200 = vst.msk [vmem:[#allocation2 + $0x2] sm:$0x3] %vm198_vm2, %v171_v38 }
  0xd5   :  { %v172_v43 = vcombine.high %v170_v35, %v170_v35  ;;  %v220_v48 = vrot.slane %v171_v38, %v1363_v18 }
  0xd6   :  { %v187_v47 = vrot.slane %v173_v40, %v1363_v18  ;;  %203 = vst.msk [vmem:[#allocation2 + $0x8] sm:$0x3] %vm198_vm2, %v180_v41  ;;  %267 = vrot.lane.b32.xlu1 %v227_v42, %s1272_s4  ;;  %v188_v49 = vcombine.high %v180_v41, %v180_v41  ;;  %v241_v57 = vrot.slane %v180_v41, %v1363_v18 }
  0xd7   :  { %202 = vst.msk [vmem:[#allocation2 + $0x6] sm:$0x3] %vm198_vm2, %v172_v43  ;;  %v234_v55 = vrot.slane %v172_v43, %v1363_v18 }
  0xd8   :  { %205 = vst.msk [vmem:[#allocation2 + $0xc] sm:$0x3] %vm198_vm2, %v187_v47  ;;  %265 = vrot.lane.b32.xlu0 %v220_v48, %s1272_s4  ;;  %204 = vst.msk [vmem:[#allocation2 + $0xa] sm:$0x3] %vm198_vm2, %v188_v49  ;;  %v189_v56 = vcombine.high %v187_v47, %v187_v47  ;;  %v248_v58 = vrot.slane %v188_v49, %v1363_v18  ;;  %v255_v59 = vrot.slane %v187_v47, %v1363_v18 }
  0xda   :  { %269 = vrot.lane.b32.xlu1 %v234_v55, %s1272_s4  ;;  %206 = vst.msk [vmem:[#allocation2 + $0xe] sm:$0x3] %vm198_vm2, %v189_v56  ;;  %v262_v60 = vrot.slane %v189_v56, %v1363_v18 }
  0xdc   :  { %271 = vrot.lane.b32.xlu0 %v241_v57, %s1272_s4 }
  0xde   :  { %273 = vrot.lane.b32.xlu1 %v248_v58, %s1272_s4 }
  0xe0   :  { %275 = vrot.lane.b32.xlu0 %v255_v59, %s1272_s4 }
  0xe2   :  { %277 = vrot.lane.b32.xlu1 %v262_v60, %s1272_s4 }
 0x146   :  { %v264_v61 = vpop.permute.xlu0 %263 }
 0x147   :  { %287 = vst.msk [vmem:[#allocation3] sm:$0x3] %vm198_vm2, %v264_v61 }
 0x148   :  { %v268_v62 = vpop.permute.xlu1 %267 }
 0x149   :  { %289 = vst.msk [vmem:[#allocation3 + $0x4] sm:$0x3] %vm198_vm2, %v268_v62 }
 0x14a   :  { %v266_v63 = vpop.permute.xlu0 %265 }
 0x14b   :  { %288 = vst.msk [vmem:[#allocation3 + $0x2] sm:$0x3] %vm198_vm2, %v266_v63 }
 0x14c   :  { %v270_v0 = vpop.permute.xlu1 %269 }
 0x14d   :  { %290 = vst.msk [vmem:[#allocation3 + $0x6] sm:$0x3] %vm198_vm2, %v270_v0 }
 0x14e   :  { %v272_v2 = vpop.permute.xlu0 %271 }
 0x14f   :  { %291 = vst.msk [vmem:[#allocation3 + $0x8] sm:$0x3] %vm198_vm2, %v272_v2 }
 0x150   :  { %v274_v3 = vpop.permute.xlu1 %273 }
 0x151   :  { %292 = vst.msk [vmem:[#allocation3 + $0xa] sm:$0x3] %vm198_vm2, %v274_v3 }
 0x152   :  { %v276_v4 = vpop.permute.xlu0 %275 }
 0x153   :  { %293 = vst.msk [vmem:[#allocation3 + $0xc] sm:$0x3] %vm198_vm2, %v276_v4 }
 0x154   :  { %v278_v5 = vpop.permute.xlu1 %277 }
 0x155   :  { %294 = vst.msk [vmem:[#allocation3 + $0xe] sm:$0x3] %vm198_vm2, %v278_v5 }
 0x156 LB: > { %v1057_v8 = vcombine.low %v1395_v46, %v1404_v50  ;;  %v1061_v9 = vcombine.low %v1420_v53, %v1425_v54  ;;  %v1273_v10 = vmov 0.0   ;;  %v1056_v11 = vcombine.low %v1385_v44, %v1390_v45  ;;  %s311_s22 = ssub.s32 7, %s1255_s3  ;;  %s1055_s23 = sshll.u32 %s1255_s3, 1  ;;  %s1255_s3 = sphi %s1449_s3, %s308_s3   ;;  %v1251_v7 = vphi %v1249_v7, %v434_v7   ;;  %v1247_v6 = vphi %v1245_v6, %v435_v6  }
 0x157   : > { %1105 = vmatprep.subr.bf16.mxu0 %v1273_v10  ;;  %1113 = vmatprep.subr.bf16.mxu1 %v1273_v10  ;;  %v1060_v12 = vcombine.low %v1409_v51, %v1414_v52  ;;  %vm1274_vm3 = vmmov 0   ;;  %s1059_s24 = sshll.u32 %s311_s22, 1  ;;  %s313_s25 = scalar_lea.vmem [#allocation2], %s1055_s23 }
 0x158   : > { %1106 = vmatpush3.bf16.msra.mxu0 %v1057_v8  ;;  %1114 = vmatpush3.bf16.msra.mxu1 %v1061_v9  ;;  %v314_v13 = vld [vmem:[%s313_s25] sm:$0x3]  ;;  %s373_s26 = scalar_lea.vmem [#allocation3], %s1059_s24  ;;  %s308_s3 = sadd.s32 1, %s1255_s3  }
 0x159   : > { %1107 = vmatprep.subr.bf16.mxu0 %v1273_v10  ;;  %1115 = vmatprep.subr.bf16.mxu1 %v1273_v10  ;;  %p305_p0 = scmp.ge.s32.totalorder %s308_s3, 8  }
 0x15a   : > { %1109 = vmatprep.mubr.msk.bf16.mxu0 %vm1274_vm3, %v1273_v10  ;;  %1117 = vmatprep.mubr.msk.bf16.mxu1 %vm1274_vm3, %v1273_v10  ;;  %s1275_s27 = smov (%p305_p0), 32   ;;  %v1213_v42 = vld [vmem:[%s1762_s5 + $0x18] sm:$0xff] (%p305_p0)   ;;  %v1214_v43 = vld [vmem:[%s1762_s5 + $0x10] sm:$0xff] (%p305_p0)   ;;  %v1215_v46 = vld [vmem:[%s1762_s5 + $0x8] sm:$0xff] (%p305_p0)   ;;  %vm492_vm4 = vcmask (%p305_p0), 517376   ;;  %vm593_vm5 = vcmask (%p305_p0), 523264  }
 0x15b   :  { %v1216_v47 = vld [vmem:[%s1762_s5] sm:$0xff] (%p305_p0)  }
 0x15c   : > { %1108 = vmatpush3.bf16.msra.mxu0 %v1056_v11  ;;  %1116 = vmatpush3.bf16.msra.mxu1 %v1060_v12  ;;  %v374_v14 = vld [vmem:[%s373_s26] sm:$0x3] }
 0x15d   :  { %1121 = vmatprep.subr.bf16.mxu0 (%p305_p0), %v1269_v1  ;;  %v1063_v11 = vld [vmem:[%s1765_s8] ss:$0 sm:$0xff] (%p305_p0) }
 0x15f   : > { %1110 = vmatmul.mubr.msk.bf16.vlgmr.msra.gmra.mxu0 %vm109_vm1, %v1251_v7  ;;  %1118 = vmatmul.mubr.msk.bf16.vlgmr.msra.gmra.mxu1 %vm109_vm1, %v1247_v6 }
 0x160   :  { %1129 = vmatprep.mubr.msk.bf16.mxu0 (%p305_p0), %vm1270_vm0, %v1269_v1  ;;  %1122 = vmatpush3.bf16.msra.mxu0 (%p305_p0), %v1213_v42 }
 0x161   :  { %1123 = vmatprep.subr.bf16.mxu0 (%p305_p0), %v1269_v1 }
 0x164   :  { %1124 = vmatpush3.bf16.msra.mxu0 (%p305_p0), %v1214_v43 }
 0x165   :  { %1125 = vmatprep.subr.bf16.mxu0 (%p305_p0), %v1269_v1 }
 0x168   :  { %1126 = vmatpush3.bf16.msra.mxu0 (%p305_p0), %v1215_v46 }
 0x169   :  { %1127 = vmatprep.subr.bf16.mxu0 (%p305_p0), %v1269_v1 }
 0x16c   :  { %1128 = vmatpush3.bf16.msra.mxu0 (%p305_p0), %v1216_v47 }
 0x21f   : > { %v364_v15 = vpop.f32.mrf.mxu0  ;;  %v424_v16 = vpop.f32.mrf.mxu1 }
 0x220   : > { %v370_v17 = vadd.f32 %v364_v15, %v314_v13  ;;  %v430_v19 = vadd.f32 %v424_v16, %v374_v14 }
 0x221   : > { %v1111_v20 = vpop.f32.mrf.mxu0  ;;  %v1119_v21 = vpop.f32.mrf.mxu1 }
 0x222   : > { %1209 = vtanh.f32 %v370_v17 }
 0x223   : > { %1211 = vtanh.f32 %v430_v19  ;;  %v367_v22 = vpop.f32.mrf.mxu0  ;;  %v427_v23 = vpop.f32.mrf.mxu1 }
 0x225   : > { %v1112_v24 = vpop.f32.mrf.mxu0  ;;  %v1120_v25 = vpop.f32.mrf.mxu1 }
 0x22d   :  { %307 = sbr.rel (!%p305_p0) target bundleno = 342 (0x156), region = 74 }
 0x22f   : > { %v1210_v26 = vpop.eup %1209 }
 0x230   : > { %v1212_v27 = vpop.eup %1211  ;;  %432 = vst.msk [vmem:[%s313_s25] sm:$0x3] %vm198_vm2, %v1210_v26  ;;  %v434_v7 = vpack.c.bf16 %v1210_v26, %v1210_v26  }
 0x231   : > { %433 = vst.msk [vmem:[%s373_s26] sm:$0x3] %vm198_vm2, %v1212_v27  ;;  %v435_v6 = vpack.c.bf16 %v1212_v27, %v1212_v27  }
 0x237   :  { %v438_v32 = vld [vmem:[#allocation2 + $0x4] sm:$0x3]  ;;  %v436_v33 = vld [vmem:[#allocation2] sm:$0x3]  ;;  %v439_v34 = vld [vmem:[#allocation2 + $0x6] sm:$0x3] }
 0x238   :  { %v454_v28 = vld [vmem:[#allocation3 + $0x4] sm:$0x3]  ;;  %v452_v29 = vld [vmem:[#allocation3] sm:$0x3]  ;;  %v455_v30 = vld [vmem:[#allocation3 + $0x6] sm:$0x3] }
 0x239   :  { %472 = vrot.lane.b32.xlu1 %v454_v28, %s1275_s27  ;;  %468 = vrot.lane.b32.xlu0 %v452_v29, %s1275_s27  ;;  %v453_v31 = vld [vmem:[#allocation3 + $0x2] sm:$0x3]  ;;  %v457_v35 = vld [vmem:[#allocation3 + $0xa] sm:$0x3]  ;;  %v456_v36 = vld [vmem:[#allocation3 + $0x8] sm:$0x3] }
 0x23a   :  { %446 = vst.msk [vmem:[%s1766_s9 + $0x4] sm:$0x3] %vm198_vm2, %v438_v32  ;;  %444 = vst.msk [vmem:[%s1766_s9] sm:$0x3] %vm198_vm2, %v436_v33  ;;  %v437_v37 = vld [vmem:[#allocation2 + $0x2] sm:$0x3] }
 0x23b   :  { %447 = vst.msk [vmem:[%s1766_s9 + $0x6] sm:$0x3] %vm198_vm2, %v439_v34  ;;  %v441_v38 = vld [vmem:[#allocation2 + $0xa] sm:$0x3]  ;;  %v440_v39 = vld [vmem:[#allocation2 + $0x8] sm:$0x3] }
 0x23c   :  { %445 = vst.msk [vmem:[%s1766_s9 + $0x2] sm:$0x3] %vm198_vm2, %v437_v37  ;;  %449 = vst.msk [vmem:[%s1766_s9 + $0xa] sm:$0x3] %vm198_vm2, %v441_v38  ;;  %v443_v40 = vld [vmem:[#allocation2 + $0xe] sm:$0x3] }
 0x23d   :  { %474 = vrot.lane.b32.xlu1 %v455_v30, %s1275_s27  ;;  %470 = vrot.lane.b32.xlu0 %v453_v31, %s1275_s27  ;;  %448 = vst.msk [vmem:[%s1766_s9 + $0x8] sm:$0x3] %vm198_vm2, %v440_v39  ;;  %v442_v41 = vld [vmem:[#allocation2 + $0xc] sm:$0x3]  ;;  %451 = vst.msk [vmem:[%s1766_s9 + $0xe] sm:$0x3] %vm198_vm2, %v443_v40 }
 0x23e   :  { %450 = vst.msk [vmem:[%s1766_s9 + $0xc] sm:$0x3] %vm198_vm2, %v442_v41  ;;  %v459_v44 = vld [vmem:[#allocation3 + $0xe] sm:$0x3]  ;;  %v458_v45 = vld [vmem:[#allocation3 + $0xc] sm:$0x3] }
 0x23f   :  { %v1604_v28 = vld [vmem:[%s1763_s6] sm:$0xf]  ;;  %v1609_v29 = vld [vmem:[%s1763_s6 + $0x4] sm:$0xf]  ;;  %v1614_v30 = vld [vmem:[%s1763_s6 + $0x8] sm:$0xf] }
 0x240   :  { %v1623_v34 = vld [vmem:[%s1763_s6 + $0xc] sm:$0xf]  ;;  %v1639_v37 = vld [vmem:[%s1764_s7 + $0x8] sm:$0xf] }
 0x241   :  { %478 = vrot.lane.b32.xlu1 %v457_v35, %s1275_s27  ;;  %476 = vrot.lane.b32.xlu0 %v456_v36, %s1275_s27  ;;  %v1628_v35 = vld [vmem:[%s1764_s7] sm:$0xf]  ;;  %v1633_v36 = vld [vmem:[%s1764_s7 + $0x4] sm:$0xf] }
 0x242   :  { %v1644_v38 = vld [vmem:[%s1764_s7 + $0xc] sm:$0xf]  ;;  %s1668_s7 = smov 0  }
 0x245   :  { %482 = vrot.lane.b32.xlu1 %v459_v44, %s1275_s27  ;;  %480 = vrot.lane.b32.xlu0 %v458_v45, %s1275_s27 }
 0x2ab   :  { %v473_v48 = vpop.permute.xlu1 %472  ;;  %v469_v49 = vpop.permute.xlu0 %468 }
 0x2ac   :  { %495 = vst.msk [vmem:[%s1766_s9 + $0x4] sm:$0x3] %vm492_vm4, %v473_v48  ;;  %493 = vst.msk [vmem:[%s1766_s9] sm:$0x3] %vm492_vm4, %v469_v49 }
 0x2af   :  { %v475_v50 = vpop.permute.xlu1 %474  ;;  %v471_v51 = vpop.permute.xlu0 %470 }
 0x2b0   :  { %496 = vst.msk [vmem:[%s1766_s9 + $0x6] sm:$0x3] %vm492_vm4, %v475_v50  ;;  %494 = vst.msk [vmem:[%s1766_s9 + $0x2] sm:$0x3] %vm492_vm4, %v471_v51 }
 0x2b3   :  { %v479_v1 = vpop.permute.xlu1 %478  ;;  %v477_v52 = vpop.permute.xlu0 %476  ;;  %v501_v57 = vld [vmem:[%s1766_s9] sm:$0x3]  ;;  %v503_v58 = vld [vmem:[%s1766_s9 + $0x4] sm:$0x3] }
 0x2b4   :  { %498 = vst.msk [vmem:[%s1766_s9 + $0xa] sm:$0x3] %vm492_vm4, %v479_v1  ;;  %497 = vst.msk [vmem:[%s1766_s9 + $0x8] sm:$0x3] %vm492_vm4, %v477_v52  ;;  %v1257_v1 = vmov 0   ;;  %v1261_v52 = vmov 0  }
 0x2b7   :  { %v483_v53 = vpop.permute.xlu1 %482  ;;  %v481_v54 = vpop.permute.xlu0 %480  ;;  %v502_v55 = vld [vmem:[%s1766_s9 + $0x2] sm:$0x3]  ;;  %v504_v56 = vld [vmem:[%s1766_s9 + $0x6] sm:$0x3] }
 0x2b8   :  { %500 = vst.msk [vmem:[%s1766_s9 + $0xe] sm:$0x3] %vm492_vm4, %v483_v53  ;;  %499 = vst.msk [vmem:[%s1766_s9 + $0xc] sm:$0x3] %vm492_vm4, %v481_v54  ;;  %v517_v61 = vcombine.low %v501_v57, %v502_v55  ;;  %v518_v62 = vcombine.low %v503_v58, %v504_v56 }
 0x2ba   :  { %v525_v3 = vrot.slane %v517_v61, %v1363_v18  ;;  %v532_v4 = vrot.slane %v518_v62, %v1363_v18 }
 0x2bb   :  { %v505_v59 = vld [vmem:[%s1766_s9 + $0x8] sm:$0x3]  ;;  %v506_v60 = vld [vmem:[%s1766_s9 + $0xa] sm:$0x3] }
 0x2bc   :  { %v534_v63 = vcombine.low %v505_v59, %v506_v60  ;;  %v533_v8 = vcombine.low %v525_v3, %v532_v4 }
 0x2be   :  { %v542_v6 = vrot.slane %v534_v63, %v1363_v18 }
 0x2bf   :  { %v507_v0 = vld [vmem:[%s1766_s9 + $0xc] sm:$0x3]  ;;  %v508_v2 = vld [vmem:[%s1766_s9 + $0xe] sm:$0x3] }
 0x2c0   :  { %v535_v5 = vcombine.low %v507_v0, %v508_v2 }
 0x2c2   :  { %v549_v7 = vrot.slane %v535_v5, %v1363_v18 }
 0x2c4   :  { %v550_v9 = vcombine.low %v542_v6, %v549_v7 }
 0x2c6   :  { %v553_v10 = vpack.c.bf16 %v550_v9, %v533_v8 }
 0x2c8   :  { %1130 = vmatmul.mubr.msk.bf16.vlgmr.msra.gmra.mxu0 %vm593_vm5, %v553_v10 }
 0x388   :  { %v631_v12 = vpop.f32.mrf.mxu0 }
 0x389   :  { %v632_v13 = vadd.f32 %v1063_v11, %v631_v12 }
 0x38a   :  { %v1131_v14 = vpop.f32.mrf.mxu0 }
 0x38b   :  { %v640_v15 = vcombine.high %v632_v13, %v632_v13  ;;  %v647_v16 = vrot.slane %v632_v13, %v1363_v18 }
 0x38c   :  { %v634_v17 = vpop.f32.mrf.mxu0 }
 0x38d   :  { %v654_v19 = vrot.slane %v640_v15, %v1363_v18  ;;  %682 = vst.msk [vmem:[#allocation2] sm:$0x3] %vm198_vm2, %v647_v16  ;;  %v635_v20 = vadd.f32 %v1063_v11, %v634_v17  ;;  %v696_v21 = vrot.slane %v647_v16, %v1363_v18  ;;  %v655_v22 = vcombine.high %v647_v16, %v647_v16 }
 0x38e   :  { %v1132_v23 = vpop.f32.mrf.mxu0 }
 0x38f   :  { %684 = vst.msk [vmem:[#allocation2 + $0x4] sm:$0x3] %vm198_vm2, %v654_v19  ;;  %v657_v24 = vcombine.high %v635_v20, %v635_v20  ;;  %v664_v25 = vrot.slane %v635_v20, %v1363_v18  ;;  %746 = vrot.lane.b32.xlu0 %v696_v21, %s1272_s4  ;;  %v703_v26 = vrot.slane %v655_v22, %v1363_v18  ;;  %683 = vst.msk [vmem:[#allocation2 + $0x2] sm:$0x3] %vm198_vm2, %v655_v22 }
 0x390   :  { %v656_v27 = vcombine.high %v654_v19, %v654_v19  ;;  %v710_v32 = vrot.slane %v654_v19, %v1363_v18 }
 0x391   :  { %v671_v31 = vrot.slane %v657_v24, %v1363_v18  ;;  %686 = vst.msk [vmem:[#allocation2 + $0x8] sm:$0x3] %vm198_vm2, %v664_v25  ;;  %748 = vrot.lane.b32.xlu1 %v703_v26, %s1272_s4  ;;  %v672_v33 = vcombine.high %v664_v25, %v664_v25  ;;  %v724_v41 = vrot.slane %v664_v25, %v1363_v18 }
 0x392   :  { %685 = vst.msk [vmem:[#allocation2 + $0x6] sm:$0x3] %vm198_vm2, %v656_v27  ;;  %v717_v39 = vrot.slane %v656_v27, %v1363_v18 }
 0x393   :  { %688 = vst.msk [vmem:[#allocation2 + $0xc] sm:$0x3] %vm198_vm2, %v671_v31  ;;  %750 = vrot.lane.b32.xlu0 %v710_v32, %s1272_s4  ;;  %687 = vst.msk [vmem:[#allocation2 + $0xa] sm:$0x3] %vm198_vm2, %v672_v33  ;;  %v673_v40 = vcombine.high %v671_v31, %v671_v31  ;;  %v731_v42 = vrot.slane %v672_v33, %v1363_v18  ;;  %v738_v43 = vrot.slane %v671_v31, %v1363_v18 }
 0x395   :  { %752 = vrot.lane.b32.xlu1 %v717_v39, %s1272_s4  ;;  %689 = vst.msk [vmem:[#allocation2 + $0xe] sm:$0x3] %vm198_vm2, %v673_v40  ;;  %v745_v44 = vrot.slane %v673_v40, %v1363_v18 }
 0x397   :  { %754 = vrot.lane.b32.xlu0 %v724_v41, %s1272_s4 }
 0x399   :  { %756 = vrot.lane.b32.xlu1 %v731_v42, %s1272_s4 }
 0x39b   :  { %758 = vrot.lane.b32.xlu0 %v738_v43, %s1272_s4 }
 0x39d   :  { %760 = vrot.lane.b32.xlu1 %v745_v44, %s1272_s4 }
 0x401   :  { %v747_v45 = vpop.permute.xlu0 %746 }
 0x402   :  { %770 = vst.msk [vmem:[#allocation3] sm:$0x3] %vm198_vm2, %v747_v45 }
 0x403   :  { %v749_v46 = vpop.permute.xlu1 %748 }
 0x404   :  { %771 = vst.msk [vmem:[#allocation3 + $0x2] sm:$0x3] %vm198_vm2, %v749_v46 }
 0x405   :  { %v751_v47 = vpop.permute.xlu0 %750 }
 0x406   :  { %772 = vst.msk [vmem:[#allocation3 + $0x4] sm:$0x3] %vm198_vm2, %v751_v47 }
 0x407   :  { %v753_v48 = vpop.permute.xlu1 %752 }
 0x408   :  { %773 = vst.msk [vmem:[#allocation3 + $0x6] sm:$0x3] %vm198_vm2, %v753_v48 }
 0x409   :  { %v755_v49 = vpop.permute.xlu0 %754 }
 0x40a   :  { %774 = vst.msk [vmem:[#allocation3 + $0x8] sm:$0x3] %vm198_vm2, %v755_v49 }
 0x40b   :  { %v757_v50 = vpop.permute.xlu1 %756 }
 0x40c   :  { %775 = vst.msk [vmem:[#allocation3 + $0xa] sm:$0x3] %vm198_vm2, %v757_v50 }
 0x40d   :  { %v759_v18 = vpop.permute.xlu0 %758 }
 0x40e   :  { %776 = vst.msk [vmem:[#allocation3 + $0xc] sm:$0x3] %vm198_vm2, %v759_v18 }
 0x40f   :  { %v761_v51 = vpop.permute.xlu1 %760 }
 0x410   :  { %777 = vst.msk [vmem:[#allocation3 + $0xe] sm:$0x3] %vm198_vm2, %v761_v51 }
 0x411 LB: > { %v1071_v53 = vcombine.low %v1614_v30, %v1623_v34  ;;  %v1075_v54 = vcombine.low %v1639_v37, %v1644_v38  ;;  %v1276_v55 = vmov 0.0   ;;  %v1070_v56 = vcombine.low %v1604_v28, %v1609_v29  ;;  %s794_s23 = ssub.s32 7, %s1267_s7  ;;  %s1069_s24 = sshll.u32 %s1267_s7, 1  ;;  %s1267_s7 = sphi %s1668_s7, %s791_s7   ;;  %v1263_v52 = vphi %v1261_v52, %v917_v52   ;;  %v1259_v1 = vphi %v1257_v1, %v918_v1  }
 0x412   : > { %1133 = vmatprep.subr.bf16.mxu0 %v1276_v55  ;;  %1141 = vmatprep.subr.bf16.mxu1 %v1276_v55  ;;  %v1074_v57 = vcombine.low %v1628_v35, %v1633_v36  ;;  %vm1277_vm6 = vmmov 0   ;;  %s1073_s25 = sshll.u32 %s794_s23, 1  ;;  %s796_s26 = scalar_lea.vmem [#allocation2], %s1069_s24 }
 0x413   : > { %1134 = vmatpush3.bf16.msra.mxu0 %v1071_v53  ;;  %1142 = vmatpush3.bf16.msra.mxu1 %v1075_v54  ;;  %v797_v58 = vld [vmem:[%s796_s26] sm:$0x3]  ;;  %s856_s0 = scalar_lea.vmem [#allocation3], %s1073_s25  ;;  %s791_s7 = sadd.s32 1, %s1267_s7  }
 0x414   : > { %1135 = vmatprep.subr.bf16.mxu0 %v1276_v55  ;;  %1143 = vmatprep.subr.bf16.mxu1 %v1276_v55  ;;  %p788_p1 = scmp.ge.s32.totalorder %s791_s7, 8  }
 0x415   : > { %1137 = vmatprep.mubr.msk.bf16.mxu0 %vm1277_vm6, %v1276_v55  ;;  %1145 = vmatprep.mubr.msk.bf16.mxu1 %vm1277_vm6, %v1276_v55  ;;  %s1278_s28 = smov (%p788_p1), 64   ;;  %vm959_vm7 = vcmask (%p788_p1), 779776   ;;  %vm1008_vm8 = vcmask (%p788_p1), 1042176  }
 0x417   : > { %1136 = vmatpush3.bf16.msra.mxu0 %v1070_v56  ;;  %1144 = vmatpush3.bf16.msra.mxu1 %v1074_v57  ;;  %v857_v59 = vld [vmem:[%s856_s0] sm:$0x3] }
 0x41a   : > { %1138 = vmatmul.mubr.msk.bf16.vlgmr.msra.gmra.mxu0 %vm109_vm1, %v1263_v52  ;;  %1146 = vmatmul.mubr.msk.bf16.vlgmr.msra.gmra.mxu1 %vm109_vm1, %v1259_v1 }
 0x4da   : > { %v847_v60 = vpop.f32.mrf.mxu0  ;;  %v907_v61 = vpop.f32.mrf.mxu1 }
 0x4db   : > { %v853_v62 = vadd.f32 %v847_v60, %v797_v58  ;;  %v913_v63 = vadd.f32 %v907_v61, %v857_v59 }
 0x4dc   : > { %v1139_v0 = vpop.f32.mrf.mxu0  ;;  %v1147_v2 = vpop.f32.mrf.mxu1 }
 0x4dd   : > { %1217 = vtanh.f32 %v853_v62 }
 0x4de   : > { %1219 = vtanh.f32 %v913_v63  ;;  %v850_v3 = vpop.f32.mrf.mxu0  ;;  %v910_v4 = vpop.f32.mrf.mxu1 }
 0x4e0   : > { %v1140_v5 = vpop.f32.mrf.mxu0  ;;  %v1148_v6 = vpop.f32.mrf.mxu1 }
 0x4e8   :  { %790 = sbr.rel (!%p788_p1) target bundleno = 1041 (0x411), region = 85 }
 0x4ea   : > { %v1218_v7 = vpop.eup %1217 }
 0x4eb   : > { %v1220_v8 = vpop.eup %1219  ;;  %915 = vst.msk [vmem:[%s796_s26] sm:$0x3] %vm198_vm2, %v1218_v7  ;;  %v917_v52 = vpack.c.bf16 %v1218_v7, %v1218_v7  }
 0x4ec   : > { %916 = vst.msk [vmem:[%s856_s0] sm:$0x3] %vm198_vm2, %v1220_v8  ;;  %v918_v1 = vpack.c.bf16 %v1220_v8, %v1220_v8  }
 0x4f2   :  { %v921_v9 = vld [vmem:[#allocation2 + $0x4] sm:$0x3]  ;;  %v919_v10 = vld [vmem:[#allocation2] sm:$0x3]  ;;  %v922_v11 = vld [vmem:[#allocation2 + $0x6] sm:$0x3] }
 0x4f3   :  { %939 = vrot.lane.b32.xlu1 %v921_v9, %s1278_s28  ;;  %935 = vrot.lane.b32.xlu0 %v919_v10, %s1278_s28  ;;  %v920_v12 = vld [vmem:[#allocation2 + $0x2] sm:$0x3]  ;;  %v924_v13 = vld [vmem:[#allocation2 + $0xa] sm:$0x3]  ;;  %v923_v14 = vld [vmem:[#allocation2 + $0x8] sm:$0x3] }
 0x4f4   :  { %v926_v15 = vld [vmem:[#allocation2 + $0xe] sm:$0x3]  ;;  %v925_v16 = vld [vmem:[#allocation2 + $0xc] sm:$0x3]  ;;  %v969_v17 = vld [vmem:[#allocation3 + $0x2] sm:$0x3] }
 0x4f5   :  { %v968_v19 = vld [vmem:[#allocation3] sm:$0x3]  ;;  %v971_v20 = vld [vmem:[#allocation3 + $0x6] sm:$0x3]  ;;  %v970_v21 = vld [vmem:[#allocation3 + $0x4] sm:$0x3] }
 0x4f6   :  { %v973_v22 = vld [vmem:[#allocation3 + $0xa] sm:$0x3]  ;;  %v972_v23 = vld [vmem:[#allocation3 + $0x8] sm:$0x3]  ;;  %v975_v24 = vld [vmem:[#allocation3 + $0xe] sm:$0x3] }
 0x4f7   :  { %941 = vrot.lane.b32.xlu1 %v922_v11, %s1278_s28  ;;  %937 = vrot.lane.b32.xlu0 %v920_v12, %s1278_s28  ;;  %v974_v25 = vld [vmem:[#allocation3 + $0xc] sm:$0x3] }
 0x4fb   :  { %945 = vrot.lane.b32.xlu1 %v924_v13, %s1278_s28  ;;  %943 = vrot.lane.b32.xlu0 %v923_v14, %s1278_s28 }
 0x4ff   :  { %949 = vrot.lane.b32.xlu1 %v926_v15, %s1278_s28  ;;  %947 = vrot.lane.b32.xlu0 %v925_v16, %s1278_s28 }
 0x503   :  { %986 = vrot.lane.b32.xlu1 %v969_v17, %s1272_s4  ;;  %984 = vrot.lane.b32.xlu0 %v968_v19, %s1272_s4 }
 0x507   :  { %990 = vrot.lane.b32.xlu1 %v971_v20, %s1272_s4  ;;  %988 = vrot.lane.b32.xlu0 %v970_v21, %s1272_s4 }
 0x50b   :  { %994 = vrot.lane.b32.xlu1 %v973_v22, %s1272_s4  ;;  %992 = vrot.lane.b32.xlu0 %v972_v23, %s1272_s4 }
 0x50f   :  { %998 = vrot.lane.b32.xlu1 %v975_v24, %s1272_s4  ;;  %996 = vrot.lane.b32.xlu0 %v974_v25, %s1272_s4 }
 0x565   :  { %v940_v26 = vpop.permute.xlu1 %939  ;;  %v936_v27 = vpop.permute.xlu0 %935 }
 0x566   :  { %962 = vst.msk [vmem:[%s1766_s9 + $0x4] sm:$0x3] %vm959_vm7, %v940_v26  ;;  %960 = vst.msk [vmem:[%s1766_s9] sm:$0x3] %vm959_vm7, %v936_v27 }
 0x569   :  { %v942_v28 = vpop.permute.xlu1 %941  ;;  %v938_v29 = vpop.permute.xlu0 %937 }
 0x56a   :  { %963 = vst.msk [vmem:[%s1766_s9 + $0x6] sm:$0x3] %vm959_vm7, %v942_v28  ;;  %961 = vst.msk [vmem:[%s1766_s9 + $0x2] sm:$0x3] %vm959_vm7, %v938_v29 }
 0x56d   :  { %v946_v30 = vpop.permute.xlu1 %945  ;;  %v944_v31 = vpop.permute.xlu0 %943 }
 0x56e   :  { %965 = vst.msk [vmem:[%s1766_s9 + $0xa] sm:$0x3] %vm959_vm7, %v946_v30  ;;  %964 = vst.msk [vmem:[%s1766_s9 + $0x8] sm:$0x3] %vm959_vm7, %v944_v31 }
 0x571   :  { %v950_v32 = vpop.permute.xlu1 %949  ;;  %v948_v33 = vpop.permute.xlu0 %947 }
 0x572   :  { %967 = vst.msk [vmem:[%s1766_s9 + $0xe] sm:$0x3] %vm959_vm7, %v950_v32  ;;  %966 = vst.msk [vmem:[%s1766_s9 + $0xc] sm:$0x3] %vm959_vm7, %v948_v33 }
 0x575   :  { %v987_v34 = vpop.permute.xlu1 %986  ;;  %v985_v35 = vpop.permute.xlu0 %984 }
 0x576   :  { %1010 = vst.msk [vmem:[%s1766_s9 + $0x2] sm:$0x3] %vm1008_vm8, %v987_v34  ;;  %1009 = vst.msk [vmem:[%s1766_s9] sm:$0x3] %vm1008_vm8, %v985_v35 }
 0x579   :  { %v991_v36 = vpop.permute.xlu1 %990  ;;  %v989_v37 = vpop.permute.xlu0 %988 }
 0x57a   :  { %1012 = vst.msk [vmem:[%s1766_s9 + $0x6] sm:$0x3] %vm1008_vm8, %v991_v36  ;;  %1011 = vst.msk [vmem:[%s1766_s9 + $0x4] sm:$0x3] %vm1008_vm8, %v989_v37 }
 0x57d   :  { %v995_v38 = vpop.permute.xlu1 %994  ;;  %v993_v39 = vpop.permute.xlu0 %992 }
 0x57e   :  { %1014 = vst.msk [vmem:[%s1766_s9 + $0xa] sm:$0x3] %vm1008_vm8, %v995_v38  ;;  %1013 = vst.msk [vmem:[%s1766_s9 + $0x8] sm:$0x3] %vm1008_vm8, %v993_v39 }
 0x581   :  { %v999_v40 = vpop.permute.xlu1 %998  ;;  %v997_v41 = vpop.permute.xlu0 %996 }
 0x582   :  { %1016 = vst.msk [vmem:[%s1766_s9 + $0xe] sm:$0x3] %vm1008_vm8, %v999_v40  ;;  %1015 = vst.msk [vmem:[%s1766_s9 + $0xc] sm:$0x3] %vm1008_vm8, %v997_v41 }

// kernel: rnn_doc_reader_forward.5
= control target key start
LH: loop header
LB: loop body
LE: loop exit
PB: predicated region body
PF: predicated region fallthrough
CT: control target
= control target key end

     0   :  { %vm189_vm0 = vcmask 1041408   ;;  %v70_v0 = vlaneseq  ;;  %v1881_v3 = vmov 1983009808   ;;  %vm182_vm1 = vcmask 556032   ;;  %s2644_s1 = inlined_call_operand.vmem [shape: bf16[68,64], index: 1, kind: input, shape index: {}]   ;;  %s2645_s5 = inlined_call_operand.vmem [shape: bf16[64,64], index: 5, kind: input, shape index: {}]   ;;  %s2646_s6 = inlined_call_operand.vmem [shape: bf16[32,32], index: 6, kind: input, shape index: {}]   ;;  %s2647_s7 = inlined_call_operand.vmem [shape: bf16[32,32], index: 7, kind: input, shape index: {}]   ;;  %s2648_s8 = inlined_call_operand.vmem [shape: f32[1,64], index: 8, kind: input, shape index: {}]   ;;  %s2649_s9 = inlined_call_operand.vmem [shape: f32[16,2,128], index: 9, kind: output, shape index: {}]   ;;  %s2650_s0 = inlined_call_operand.vmem [shape: f32[16,2,68], index: 0, kind: input, shape index: {}]   ;;  %s2651_s4 = inlined_call_operand.vmem [shape: f32[1,64], index: 4, kind: input, shape index: {}]   ;;  %s2652_s2 = inlined_call_operand.vmem [shape: bf16[32,32], index: 2, kind: input, shape index: {}]   ;;  %s2653_s3 = inlined_call_operand.vmem [shape: bf16[32,32], index: 3, kind: input, shape index: {}]  }
   0x1   :  { %v1816_v1 = vld [vmem:[%s2644_s1 + $0x20] ss:$0 sps:$4 sm:$0x33]   ;;  %v1817_v2 = vld [vmem:[%s2644_s1 + $0x18] sm:$0xff]   ;;  %v68_v4 = vunpack.c.l.s4 %v1881_v3  ;;  %v1818_v8 = vld [vmem:[%s2644_s1 + $0x10] sm:$0xff]   ;;  %vm330_vm2 = vcmask 254976  }
   0x2   :  { %1759 = vmatprep.subr.msk.bf16.mxu0 %vm189_vm0, %v1816_v1  ;;  %v191_v5 = vsel %vm189_vm0, %v1816_v1, 0  ;;  %v71_v7 = vshrl.u32 %v70_v0, 7  ;;  %v33_v9 = vld [vmem:[%s2650_s0] sm:$0x3]  ;;  %v34_v10 = vld [vmem:[%s2650_s0 + $0x2] sm:$0x3] }
   0x3   :  { %v69_v6 = vunpack.c.0.s8 %v68_v4  ;;  %1702 = vmatpush3.bf16.msra.mxu0 %v191_v5  ;;  %v35_v11 = vld [vmem:[%s2650_s0 + $0x4] sm:$0x3]  ;;  %v36_v12 = vld [vmem:[%s2650_s0 + $0x6] sm:$0x3]  ;;  %v1819_v14 = vld [vmem:[%s2644_s1 + $0x8] sm:$0xff]   ;;  %v65_v18 = vcombine.low %v33_v9, %v34_v10 }
   0x4   :  { %1703 = vmatprep.subr.bf16.mxu0 %v1817_v2  ;;  %v37_v15 = vld [vmem:[%s2650_s0 + $0x8] sm:$0x3]  ;;  %v38_v16 = vld [vmem:[%s2650_s0 + $0xa] sm:$0x3]  ;;  %v39_v17 = vld [vmem:[%s2650_s0 + $0xc] sm:$0x3]  ;;  %v66_v19 = vcombine.low %v35_v11, %v36_v12 }
   0x5   :  { %v1960_v13 = vsub.s32 %v69_v6, %v71_v7  ;;  %v40_v20 = vld [vmem:[%s2650_s0 + $0xe] sm:$0x3]  ;;  %v82_v21 = vcombine.low %v37_v15, %v38_v16  ;;  %v41_v22 = vld [vmem:[%s2650_s0 + $0x10] sm:$0x3]  ;;  %v42_v23 = vld [vmem:[%s2650_s0 + $0x12] sm:$0x3] }
   0x6   :  { %v83_v26 = vcombine.low %v39_v17, %v40_v20  ;;  %v43_v27 = vld [vmem:[%s2650_s0 + $0x14] sm:$0x3]  ;;  %v44_v28 = vld [vmem:[%s2650_s0 + $0x16] sm:$0x3]  ;;  %v45_v29 = vld [vmem:[%s2650_s0 + $0x18] sm:$0x3]  ;;  %v99_v30 = vcombine.low %v41_v22, %v42_v23 }
   0x7   :  { %1704 = vmatpush3.bf16.msra.mxu0 %v1817_v2  ;;  %v73_v24 = vrot.slane %v65_v18, %v1960_v13  ;;  %v80_v25 = vrot.slane %v66_v19, %v1960_v13  ;;  %v90_v31 = vrot.slane %v82_v21, %v1960_v13  ;;  %v46_v32 = vld [vmem:[%s2650_s0 + $0x1a] sm:$0x3]  ;;  %v47_v33 = vld [vmem:[%s2650_s0 + $0x1c] sm:$0x3]  ;;  %v48_v34 = vld [vmem:[%s2650_s0 + $0x1e] sm:$0x3]  ;;  %v100_v35 = vcombine.low %v43_v27, %v44_v28 }
   0x8   :  { %1705 = vmatprep.subr.bf16.mxu0 %v1818_v8  ;;  %v97_v37 = vrot.slane %v83_v26, %v1960_v13  ;;  %v107_v38 = vrot.slane %v99_v30, %v1960_v13  ;;  %v116_v39 = vcombine.low %v45_v29, %v46_v32  ;;  %v117_v41 = vcombine.low %v47_v33, %v48_v34  ;;  %v1820_v42 = vld [vmem:[%s2644_s1] sm:$0xff]   ;;  %s1882_s1 = smov 96   ;;  %v2071_v28 = vld [vmem:[%s2652_s2 + $0x8] sm:$0xf]  ;;  %v2078_v30 = vld [vmem:[%s2652_s2 + $0xc] sm:$0xf] }
   0x9   :  { %v81_v36 = vcombine.low %v73_v24, %v80_v25  ;;  %v114_v40 = vrot.slane %v100_v35, %v1960_v13  ;;  %v1645_v50 = vld [vmem:[%s2651_s4] ss:$0 sm:$0xff]  ;;  %v2066_v27 = vld [vmem:[%s2652_s2 + $0x4] sm:$0xf]  ;;  %v2093_v33 = vld [vmem:[%s2653_s3 + $0x8] sm:$0xf] }
   0xa   :  { %v98_v43 = vcombine.low %v90_v31, %v97_v37  ;;  %v124_v44 = vrot.slane %v116_v39, %v1960_v13  ;;  %v131_v45 = vrot.slane %v117_v41, %v1960_v13  ;;  %v2061_v26 = vld [vmem:[%s2652_s2] sm:$0xf]  ;;  %v2088_v32 = vld [vmem:[%s2653_s3 + $0x4] sm:$0xf]  ;;  %v2098_v34 = vld [vmem:[%s2653_s3 + $0xc] sm:$0xf] }
   0xb   :  { %1706 = vmatpush3.bf16.msra.mxu0 %v1818_v8  ;;  %v115_v47 = vcombine.low %v107_v38, %v114_v40  ;;  %v2083_v31 = vld [vmem:[%s2653_s3] sm:$0xf]  ;;  %s2127_s2 = smov 0  }
   0xc   :  { %1707 = vmatprep.subr.bf16.mxu0 %v1819_v14  ;;  %v137_v46 = vpack.c.bf16 %v98_v43, %v81_v36  ;;  %v132_v48 = vcombine.low %v124_v44, %v131_v45 }
   0xe   :  { %1711 = vmatprep.mubr.msk.bf16.mxu0 %vm182_vm1, %v137_v46  ;;  %v138_v49 = vpack.c.bf16 %v132_v48, %v115_v47 }
   0xf   :  { %1708 = vmatpush3.bf16.msra.mxu0 %v1819_v14 }
  0x10   :  { %1709 = vmatprep.subr.bf16.mxu0 %v1820_v42 }
  0x13   :  { %1710 = vmatpush3.bf16.msra.mxu0 %v1820_v42 }
  0x16   :  { %1712 = vmatmul.mubr.msk.bf16.vlgmr.msra.gmra.mxu0 %vm182_vm1, %v138_v49 }
  0xd6   :  { %v1713_v51 = vpop.f32.mrf.mxu0 }
  0xd7   :  { %v236_v52 = vadd.f32 %v1713_v51, %v1645_v50 }
  0xd8   :  { %v227_v53 = vpop.f32.mrf.mxu0 }
  0xd9   :  { %v280_v54 = vcombine.high %v236_v52, %v236_v52  ;;  %v287_v55 = vrot.slane %v236_v52, %v1960_v13  ;;  %v228_v56 = vadd.f32 %v1645_v50, %v227_v53 }
  0xda   :  { %v1714_v57 = vpop.f32.mrf.mxu0 }
  0xdb   :  { %v294_v58 = vrot.slane %v280_v54, %v1960_v13  ;;  %339 = vst.msk [vmem:[#allocation2 + $0x10] sm:$0x3] %vm330_vm2, %v287_v55  ;;  %v246_v59 = vcombine.high %v228_v56, %v228_v56  ;;  %v253_v60 = vrot.slane %v228_v56, %v1960_v13  ;;  %v239_v61 = vadd.f32 %v1714_v57, %v1645_v50 }
  0xdc   :  { %v230_v62 = vpop.f32.mrf.mxu0  ;;  %v409_v63 = vrot.slane %v287_v55, %v1960_v13  ;;  %v295_v0 = vcombine.high %v287_v55, %v287_v55  ;;  %v1857_v56 = vmov 0   ;;  %v1861_v57 = vmov 0  }
  0xdd   :  { %341 = vst.msk [vmem:[#allocation2 + $0x14] sm:$0x3] %vm330_vm2, %v294_v58  ;;  %v260_v1 = vrot.slane %v246_v59, %v1960_v13  ;;  %331 = vst.msk [vmem:[#allocation2] sm:$0x3] %vm330_vm2, %v253_v60  ;;  %v297_v2 = vcombine.high %v239_v61, %v239_v61  ;;  %v304_v3 = vrot.slane %v239_v61, %v1960_v13 }
  0xde   :  { %v231_v4 = vadd.f32 %v1645_v50, %v230_v62  ;;  %475 = vrot.lane.b32.xlu0 %v409_v63, %s1882_s1  ;;  %v416_v5 = vrot.slane %v295_v0, %v1960_v13  ;;  %340 = vst.msk [vmem:[#allocation2 + $0x12] sm:$0x3] %vm330_vm2, %v295_v0  ;;  %v296_v6 = vcombine.high %v294_v58, %v294_v58 }
  0xdf   :  { %333 = vst.msk [vmem:[#allocation2 + $0x4] sm:$0x3] %vm330_vm2, %v260_v1  ;;  %v311_v7 = vrot.slane %v297_v2, %v1960_v13  ;;  %343 = vst.msk [vmem:[#allocation2 + $0x18] sm:$0x3] %vm330_vm2, %v304_v3  ;;  %v353_v10 = vrot.slane %v253_v60, %v1960_v13  ;;  %v261_v11 = vcombine.high %v253_v60, %v253_v60 }
  0xe0   :  { %v263_v8 = vcombine.high %v231_v4, %v231_v4  ;;  %v270_v9 = vrot.slane %v231_v4, %v1960_v13  ;;  %477 = vrot.lane.b32.xlu1 %v416_v5, %s1882_s1  ;;  %342 = vst.msk [vmem:[#allocation2 + $0x16] sm:$0x3] %vm330_vm2, %v296_v6  ;;  %v262_v12 = vcombine.high %v260_v1, %v260_v1 }
  0xe1   :  { %345 = vst.msk [vmem:[#allocation2 + $0x1c] sm:$0x3] %vm330_vm2, %v311_v7  ;;  %v312_v15 = vcombine.high %v304_v3, %v304_v3  ;;  %v367_v17 = vrot.slane %v260_v1, %v1960_v13  ;;  %332 = vst.msk [vmem:[#allocation2 + $0x2] sm:$0x3] %vm330_vm2, %v261_v11  ;;  %v313_v18 = vcombine.high %v311_v7, %v311_v7 }
  0xe2   :  { %v277_v14 = vrot.slane %v263_v8, %v1960_v13  ;;  %335 = vst.msk [vmem:[#allocation2 + $0x8] sm:$0x3] %vm330_vm2, %v270_v9  ;;  %v278_v16 = vcombine.high %v270_v9, %v270_v9  ;;  %459 = vrot.lane.b32.xlu0 %v353_v10, %s1882_s1  ;;  %334 = vst.msk [vmem:[#allocation2 + $0x6] sm:$0x3] %vm330_vm2, %v262_v12  ;;  %v423_v20 = vrot.slane %v294_v58, %v1960_v13 }
  0xe3   :  { %344 = vst.msk [vmem:[#allocation2 + $0x1a] sm:$0x3] %vm330_vm2, %v312_v15  ;;  %346 = vst.msk [vmem:[#allocation2 + $0x1e] sm:$0x3] %vm330_vm2, %v313_v18  ;;  %v430_v21 = vrot.slane %v296_v6, %v1960_v13  ;;  %v360_v22 = vrot.slane %v261_v11, %v1960_v13  ;;  %v374_v23 = vrot.slane %v262_v12, %v1960_v13 }
  0xe4   :  { %337 = vst.msk [vmem:[#allocation2 + $0xc] sm:$0x3] %vm330_vm2, %v277_v14  ;;  %336 = vst.msk [vmem:[#allocation2 + $0xa] sm:$0x3] %vm330_vm2, %v278_v16  ;;  %v279_v19 = vcombine.high %v277_v14, %v277_v14  ;;  %463 = vrot.lane.b32.xlu1 %v367_v17, %s1882_s1  ;;  %v437_v24 = vrot.slane %v304_v3, %v1960_v13  ;;  %v444_v25 = vrot.slane %v312_v15, %v1960_v13 }
  0xe5   :  { %v381_v29 = vrot.slane %v270_v9, %v1960_v13  ;;  %v388_v35 = vrot.slane %v278_v16, %v1960_v13  ;;  %v395_v36 = vrot.slane %v277_v14, %v1960_v13  ;;  %v451_v38 = vrot.slane %v311_v7, %v1960_v13 }
  0xe6   :  { %338 = vst.msk [vmem:[#allocation2 + $0xe] sm:$0x3] %vm330_vm2, %v279_v19  ;;  %479 = vrot.lane.b32.xlu0 %v423_v20, %s1882_s1  ;;  %v402_v37 = vrot.slane %v279_v19, %v1960_v13  ;;  %v458_v39 = vrot.slane %v313_v18, %v1960_v13 }
  0xe8   :  { %481 = vrot.lane.b32.xlu1 %v430_v21, %s1882_s1 }
  0xea   :  { %461 = vrot.lane.b32.xlu0 %v360_v22, %s1882_s1 }
  0xec   :  { %465 = vrot.lane.b32.xlu1 %v374_v23, %s1882_s1 }
  0xee   :  { %483 = vrot.lane.b32.xlu0 %v437_v24, %s1882_s1 }
  0xf0   :  { %485 = vrot.lane.b32.xlu1 %v444_v25, %s1882_s1 }
  0xf2   :  { %467 = vrot.lane.b32.xlu0 %v381_v29, %s1882_s1 }
  0xf4   :  { %469 = vrot.lane.b32.xlu1 %v388_v35, %s1882_s1 }
  0xf6   :  { %471 = vrot.lane.b32.xlu0 %v395_v36, %s1882_s1 }
  0xf8   :  { %473 = vrot.lane.b32.xlu1 %v402_v37, %s1882_s1 }
  0xfa   :  { %487 = vrot.lane.b32.xlu0 %v451_v38, %s1882_s1 }
  0xfc   :  { %489 = vrot.lane.b32.xlu1 %v458_v39, %s1882_s1 }
 0x150   :  { %v476_v40 = vpop.permute.xlu0 %475 }
 0x151   :  { %515 = vst.msk [vmem:[#allocation3 + $0x10] sm:$0x3] %vm330_vm2, %v476_v40 }
 0x152   :  { %v478_v41 = vpop.permute.xlu1 %477 }
 0x153   :  { %516 = vst.msk [vmem:[#allocation3 + $0x12] sm:$0x3] %vm330_vm2, %v478_v41 }
 0x154   :  { %v460_v42 = vpop.permute.xlu0 %459 }
 0x155   :  { %507 = vst.msk [vmem:[#allocation3] sm:$0x3] %vm330_vm2, %v460_v42 }
 0x156   :  { %v464_v43 = vpop.permute.xlu1 %463 }
 0x157   :  { %509 = vst.msk [vmem:[#allocation3 + $0x4] sm:$0x3] %vm330_vm2, %v464_v43 }
 0x158   :  { %v480_v44 = vpop.permute.xlu0 %479 }
 0x159   :  { %517 = vst.msk [vmem:[#allocation3 + $0x14] sm:$0x3] %vm330_vm2, %v480_v44 }
 0x15a   :  { %v482_v45 = vpop.permute.xlu1 %481 }
 0x15b   :  { %518 = vst.msk [vmem:[#allocation3 + $0x16] sm:$0x3] %vm330_vm2, %v482_v45 }
 0x15c   :  { %v462_v46 = vpop.permute.xlu0 %461 }
 0x15d   :  { %508 = vst.msk [vmem:[#allocation3 + $0x2] sm:$0x3] %vm330_vm2, %v462_v46 }
 0x15e   :  { %v466_v47 = vpop.permute.xlu1 %465 }
 0x15f   :  { %510 = vst.msk [vmem:[#allocation3 + $0x6] sm:$0x3] %vm330_vm2, %v466_v47 }
 0x160   :  { %v484_v48 = vpop.permute.xlu0 %483 }
 0x161   :  { %519 = vst.msk [vmem:[#allocation3 + $0x18] sm:$0x3] %vm330_vm2, %v484_v48 }
 0x162   :  { %v486_v49 = vpop.permute.xlu1 %485 }
 0x163   :  { %520 = vst.msk [vmem:[#allocation3 + $0x1a] sm:$0x3] %vm330_vm2, %v486_v49 }
 0x164   :  { %v468_v50 = vpop.permute.xlu0 %467 }
 0x165   :  { %511 = vst.msk [vmem:[#allocation3 + $0x8] sm:$0x3] %vm330_vm2, %v468_v50 }
 0x166   :  { %v470_v51 = vpop.permute.xlu1 %469 }
 0x167   :  { %512 = vst.msk [vmem:[#allocation3 + $0xa] sm:$0x3] %vm330_vm2, %v470_v51 }
 0x168   :  { %v472_v52 = vpop.permute.xlu0 %471 }
 0x169   :  { %513 = vst.msk [vmem:[#allocation3 + $0xc] sm:$0x3] %vm330_vm2, %v472_v52 }
 0x16a   :  { %v474_v53 = vpop.permute.xlu1 %473 }
 0x16b   :  { %514 = vst.msk [vmem:[#allocation3 + $0xe] sm:$0x3] %vm330_vm2, %v474_v53 }
 0x16c   :  { %v488_v54 = vpop.permute.xlu0 %487 }
 0x16d   :  { %521 = vst.msk [vmem:[#allocation3 + $0x1c] sm:$0x3] %vm330_vm2, %v488_v54 }
 0x16e   :  { %v490_v55 = vpop.permute.xlu1 %489 }
 0x16f   :  { %522 = vst.msk [vmem:[#allocation3 + $0x1e] sm:$0x3] %vm330_vm2, %v490_v55 }
 0x170 LB: > { %v1655_v58 = vcombine.low %v2071_v28, %v2078_v30  ;;  %v1659_v59 = vcombine.low %v2093_v33, %v2098_v34  ;;  %v1883_v60 = vmov 0.0   ;;  %v1654_v61 = vcombine.low %v2061_v26, %v2066_v27  ;;  %s539_s3 = ssub.s32 15, %s1867_s2  ;;  %s1653_s25 = sshll.u32 %s1867_s2, 1  ;;  %s1867_s2 = sphi %s2127_s2, %s536_s2   ;;  %v1863_v57 = vphi %v1861_v57, %v663_v57   ;;  %v1859_v56 = vphi %v1857_v56, %v664_v56  }
 0x171   : > { %1715 = vmatprep.subr.bf16.mxu0 %v1883_v60  ;;  %1723 = vmatprep.subr.bf16.mxu1 %v1883_v60  ;;  %v1658_v62 = vcombine.low %v2083_v31, %v2088_v32  ;;  %vm1884_vm3 = vmmov 0   ;;  %vm555_vm4 = vcmask 261120   ;;  %s1657_s26 = sshll.u32 %s539_s3, 1  ;;  %s541_s27 = scalar_lea.vmem [#allocation2], %s1653_s25 }
 0x172   : > { %1716 = vmatpush3.bf16.msra.mxu0 %v1655_v58  ;;  %1724 = vmatpush3.bf16.msra.mxu1 %v1659_v59  ;;  %v542_v63 = vld [vmem:[%s541_s27] sm:$0x3]  ;;  %s602_s28 = scalar_lea.vmem [#allocation3], %s1657_s26  ;;  %s536_s2 = sadd.s32 1, %s1867_s2  }
 0x173   : > { %1717 = vmatprep.subr.bf16.mxu0 %v1883_v60  ;;  %1725 = vmatprep.subr.bf16.mxu1 %v1883_v60  ;;  %p533_p0 = scmp.ge.s32.totalorder %s536_s2, 16  }
 0x174   : > { %1719 = vmatprep.mubr.msk.bf16.mxu0 %vm1884_vm3, %v1883_v60  ;;  %1727 = vmatprep.mubr.msk.bf16.mxu1 %vm1884_vm3, %v1883_v60  ;;  %s1885_s29 = smov (%p533_p0), 32   ;;  %v1825_v40 = vld [vmem:[%s2645_s5 + $0x18] sm:$0xff] (%p533_p0)   ;;  %v1826_v41 = vld [vmem:[%s2645_s5 + $0x10] sm:$0xff] (%p533_p0)   ;;  %v1827_v44 = vld [vmem:[%s2645_s5 + $0x8] sm:$0xff] (%p533_p0)   ;;  %vm777_vm5 = vcmask (%p533_p0), 517376   ;;  %vm939_vm6 = vcmask (%p533_p0), 523264  }
 0x175   :  { %v1828_v47 = vld [vmem:[%s2645_s5] sm:$0xff] (%p533_p0)  }
 0x176   : > { %1718 = vmatpush3.bf16.msra.mxu0 %v1654_v61  ;;  %1726 = vmatpush3.bf16.msra.mxu1 %v1658_v62  ;;  %v603_v0 = vld [vmem:[%s602_s28] sm:$0x3] }
 0x177   :  { %1731 = vmatprep.subr.bf16.mxu0 (%p533_p0), %v1825_v40 }
 0x179   : > { %1720 = vmatmul.mubr.msk.bf16.vlgmr.msra.gmra.mxu0 %vm555_vm4, %v1863_v57  ;;  %1728 = vmatmul.mubr.msk.bf16.vlgmr.msra.gmra.mxu1 %vm555_vm4, %v1859_v56 }
 0x17a   :  { %1732 = vmatpush3.bf16.msra.mxu0 (%p533_p0), %v1825_v40 }
 0x17b   :  { %1733 = vmatprep.subr.bf16.mxu0 (%p533_p0), %v1826_v41 }
 0x17e   :  { %1734 = vmatpush3.bf16.msra.mxu0 (%p533_p0), %v1826_v41  ;;  %v1661_v41 = vld [vmem:[%s2648_s8] ss:$0 sm:$0xff] (%p533_p0) }
 0x17f   :  { %1735 = vmatprep.subr.bf16.mxu0 (%p533_p0), %v1827_v44 }
 0x182   :  { %1736 = vmatpush3.bf16.msra.mxu0 (%p533_p0), %v1827_v44 }
 0x183   :  { %1737 = vmatprep.subr.bf16.mxu0 (%p533_p0), %v1828_v47 }
 0x186   :  { %1738 = vmatpush3.bf16.msra.mxu0 (%p533_p0), %v1828_v47 }
 0x239   : > { %v593_v1 = vpop.f32.mrf.mxu0  ;;  %v653_v2 = vpop.f32.mrf.mxu1 }
 0x23a   : > { %v599_v3 = vadd.f32 %v593_v1, %v542_v63  ;;  %v659_v4 = vadd.f32 %v653_v2, %v603_v0 }
 0x23b   : > { %v1721_v5 = vpop.f32.mrf.mxu0  ;;  %v1729_v6 = vpop.f32.mrf.mxu1 }
 0x23c   : > { %1821 = vtanh.f32 %v599_v3 }
 0x23d   : > { %1823 = vtanh.f32 %v659_v4  ;;  %v596_v7 = vpop.f32.mrf.mxu0  ;;  %v656_v8 = vpop.f32.mrf.mxu1 }
 0x23f   : > { %v1722_v9 = vpop.f32.mrf.mxu0  ;;  %v1730_v10 = vpop.f32.mrf.mxu1 }
 0x247   :  { %535 = sbr.rel (!%p533_p0) target bundleno = 368 (0x170), region = 74 }
 0x249   : > { %v1822_v11 = vpop.eup %1821 }
 0x24a   : > { %v1824_v12 = vpop.eup %1823  ;;  %661 = vst.msk [vmem:[%s541_s27] sm:$0x3] %vm330_vm2, %v1822_v11  ;;  %v663_v57 = vpack.c.bf16 %v1822_v11, %v1822_v11  }
 0x24b   : > { %662 = vst.msk [vmem:[%s602_s28] sm:$0x3] %vm330_vm2, %v1824_v12  ;;  %v664_v56 = vpack.c.bf16 %v1824_v12, %v1824_v12  }
 0x251   :  { %v667_v20 = vld [vmem:[#allocation2 + $0x4] sm:$0x3]  ;;  %v665_v21 = vld [vmem:[#allocation2] sm:$0x3]  ;;  %v668_v22 = vld [vmem:[#allocation2 + $0x6] sm:$0x3] }
 0x252   :  { %v699_v14 = vld [vmem:[#allocation3 + $0x4] sm:$0x3]  ;;  %v697_v15 = vld [vmem:[#allocation3] sm:$0x3]  ;;  %v700_v16 = vld [vmem:[#allocation3 + $0x6] sm:$0x3] }
 0x253   :  { %733 = vrot.lane.b32.xlu1 %v699_v14, %s1885_s29  ;;  %729 = vrot.lane.b32.xlu0 %v697_v15, %s1885_s29  ;;  %v698_v17 = vld [vmem:[#allocation3 + $0x2] sm:$0x3]  ;;  %v702_v18 = vld [vmem:[#allocation3 + $0xa] sm:$0x3]  ;;  %v701_v19 = vld [vmem:[#allocation3 + $0x8] sm:$0x3] }
 0x254   :  { %683 = vst.msk [vmem:[%s2649_s9 + $0x4] sm:$0x3] %vm330_vm2, %v667_v20  ;;  %v666_v23 = vld [vmem:[#allocation2 + $0x2] sm:$0x3]  ;;  %681 = vst.msk [vmem:[%s2649_s9] sm:$0x3] %vm330_vm2, %v665_v21 }
 0x255   :  { %684 = vst.msk [vmem:[%s2649_s9 + $0x6] sm:$0x3] %vm330_vm2, %v668_v22  ;;  %682 = vst.msk [vmem:[%s2649_s9 + $0x2] sm:$0x3] %vm330_vm2, %v666_v23  ;;  %v670_v24 = vld [vmem:[#allocation2 + $0xa] sm:$0x3] }
 0x256   :  { %v669_v25 = vld [vmem:[#allocation2 + $0x8] sm:$0x3]  ;;  %v672_v26 = vld [vmem:[#allocation2 + $0xe] sm:$0x3]  ;;  %v703_v28 = vld [vmem:[#allocation3 + $0xc] sm:$0x3] }
 0x257   :  { %735 = vrot.lane.b32.xlu1 %v700_v16, %s1885_s29  ;;  %731 = vrot.lane.b32.xlu0 %v698_v17, %s1885_s29  ;;  %v704_v27 = vld [vmem:[#allocation3 + $0xe] sm:$0x3]  ;;  %686 = vst.msk [vmem:[%s2649_s9 + $0xa] sm:$0x3] %vm330_vm2, %v670_v24  ;;  %685 = vst.msk [vmem:[%s2649_s9 + $0x8] sm:$0x3] %vm330_vm2, %v669_v25 }
 0x258   :  { %688 = vst.msk [vmem:[%s2649_s9 + $0xe] sm:$0x3] %vm330_vm2, %v672_v26  ;;  %v671_v29 = vld [vmem:[#allocation2 + $0xc] sm:$0x3]  ;;  %v674_v30 = vld [vmem:[#allocation2 + $0x12] sm:$0x3] }
 0x259   :  { %v673_v31 = vld [vmem:[#allocation2 + $0x10] sm:$0x3]  ;;  %687 = vst.msk [vmem:[%s2649_s9 + $0xc] sm:$0x3] %vm330_vm2, %v671_v29  ;;  %690 = vst.msk [vmem:[%s2649_s9 + $0x12] sm:$0x3] %vm330_vm2, %v674_v30 }
 0x25a   :  { %689 = vst.msk [vmem:[%s2649_s9 + $0x10] sm:$0x3] %vm330_vm2, %v673_v31  ;;  %v676_v32 = vld [vmem:[#allocation2 + $0x16] sm:$0x3]  ;;  %v675_v33 = vld [vmem:[#allocation2 + $0x14] sm:$0x3] }
 0x25b   :  { %739 = vrot.lane.b32.xlu1 %v702_v18, %s1885_s29  ;;  %737 = vrot.lane.b32.xlu0 %v701_v19, %s1885_s29  ;;  %692 = vst.msk [vmem:[%s2649_s9 + $0x16] sm:$0x3] %vm330_vm2, %v676_v32  ;;  %691 = vst.msk [vmem:[%s2649_s9 + $0x14] sm:$0x3] %vm330_vm2, %v675_v33  ;;  %v678_v34 = vld [vmem:[#allocation2 + $0x1a] sm:$0x3] }
 0x25c   :  { %v677_v35 = vld [vmem:[#allocation2 + $0x18] sm:$0x3]  ;;  %694 = vst.msk [vmem:[%s2649_s9 + $0x1a] sm:$0x3] %vm330_vm2, %v678_v34  ;;  %v706_v36 = vld [vmem:[#allocation3 + $0x12] sm:$0x3] }
 0x25d   :  { %693 = vst.msk [vmem:[%s2649_s9 + $0x18] sm:$0x3] %vm330_vm2, %v677_v35  ;;  %v705_v37 = vld [vmem:[#allocation3 + $0x10] sm:$0x3]  ;;  %v680_v38 = vld [vmem:[#allocation2 + $0x1e] sm:$0x3] }
 0x25e   :  { %v679_v39 = vld [vmem:[#allocation2 + $0x1c] sm:$0x3]  ;;  %696 = vst.msk [vmem:[%s2649_s9 + $0x1e] sm:$0x3] %vm330_vm2, %v680_v38  ;;  %v708_v42 = vld [vmem:[#allocation3 + $0x16] sm:$0x3] }
 0x25f   :  { %743 = vrot.lane.b32.xlu1 %v704_v27, %s1885_s29  ;;  %741 = vrot.lane.b32.xlu0 %v703_v28, %s1885_s29  ;;  %695 = vst.msk [vmem:[%s2649_s9 + $0x1c] sm:$0x3] %vm330_vm2, %v679_v39  ;;  %v707_v43 = vld [vmem:[#allocation3 + $0x14] sm:$0x3]  ;;  %v710_v45 = vld [vmem:[#allocation3 + $0x1a] sm:$0x3] }
 0x260   :  { %v709_v46 = vld [vmem:[#allocation3 + $0x18] sm:$0x3]  ;;  %v712_v48 = vld [vmem:[#allocation3 + $0x1e] sm:$0x3]  ;;  %v711_v49 = vld [vmem:[#allocation3 + $0x1c] sm:$0x3] }
 0x263   :  { %747 = vrot.lane.b32.xlu1 %v706_v36, %s1885_s29  ;;  %745 = vrot.lane.b32.xlu0 %v705_v37, %s1885_s29 }
 0x267   :  { %751 = vrot.lane.b32.xlu1 %v708_v42, %s1885_s29  ;;  %749 = vrot.lane.b32.xlu0 %v707_v43, %s1885_s29 }
 0x26b   :  { %755 = vrot.lane.b32.xlu1 %v710_v45, %s1885_s29  ;;  %753 = vrot.lane.b32.xlu0 %v709_v46, %s1885_s29 }
 0x26f   :  { %759 = vrot.lane.b32.xlu1 %v712_v48, %s1885_s29  ;;  %757 = vrot.lane.b32.xlu0 %v711_v49, %s1885_s29 }
 0x2c5   :  { %v734_v50 = vpop.permute.xlu1 %733  ;;  %v730_v51 = vpop.permute.xlu0 %729 }
 0x2c6   :  { %780 = vst.msk [vmem:[%s2649_s9 + $0x4] sm:$0x3] %vm777_vm5, %v734_v50  ;;  %778 = vst.msk [vmem:[%s2649_s9] sm:$0x3] %vm777_vm5, %v730_v51 }
 0x2c9   :  { %v736_v52 = vpop.permute.xlu1 %735  ;;  %v732_v53 = vpop.permute.xlu0 %731 }
 0x2ca   :  { %781 = vst.msk [vmem:[%s2649_s9 + $0x6] sm:$0x3] %vm777_vm5, %v736_v52  ;;  %779 = vst.msk [vmem:[%s2649_s9 + $0x2] sm:$0x3] %vm777_vm5, %v732_v53 }
 0x2cd   :  { %v740_v54 = vpop.permute.xlu1 %739  ;;  %v738_v55 = vpop.permute.xlu0 %737  ;;  %v794_v60 = vld [vmem:[%s2649_s9] sm:$0x3]  ;;  %v796_v63 = vld [vmem:[%s2649_s9 + $0x4] sm:$0x3] }
 0x2ce   :  { %783 = vst.msk [vmem:[%s2649_s9 + $0xa] sm:$0x3] %vm777_vm5, %v740_v54  ;;  %782 = vst.msk [vmem:[%s2649_s9 + $0x8] sm:$0x3] %vm777_vm5, %v738_v55 }
 0x2d1   :  { %v744_v56 = vpop.permute.xlu1 %743  ;;  %v742_v57 = vpop.permute.xlu0 %741  ;;  %v795_v58 = vld [vmem:[%s2649_s9 + $0x2] sm:$0x3]  ;;  %v797_v59 = vld [vmem:[%s2649_s9 + $0x6] sm:$0x3] }
 0x2d2   :  { %785 = vst.msk [vmem:[%s2649_s9 + $0xe] sm:$0x3] %vm777_vm5, %v744_v56  ;;  %784 = vst.msk [vmem:[%s2649_s9 + $0xc] sm:$0x3] %vm777_vm5, %v742_v57  ;;  %v826_v2 = vcombine.low %v794_v60, %v795_v58  ;;  %v827_v3 = vcombine.low %v796_v63, %v797_v59 }
 0x2d4   :  { %v834_v9 = vrot.slane %v826_v2, %v1960_v13  ;;  %v841_v10 = vrot.slane %v827_v3, %v1960_v13 }
 0x2d5   :  { %v748_v61 = vpop.permute.xlu1 %747  ;;  %v746_v62 = vpop.permute.xlu0 %745  ;;  %v798_v0 = vld [vmem:[%s2649_s9 + $0x8] sm:$0x3]  ;;  %v799_v1 = vld [vmem:[%s2649_s9 + $0xa] sm:$0x3] }
 0x2d6   :  { %787 = vst.msk [vmem:[%s2649_s9 + $0x12] sm:$0x3] %vm777_vm5, %v748_v61  ;;  %786 = vst.msk [vmem:[%s2649_s9 + $0x10] sm:$0x3] %vm777_vm5, %v746_v62  ;;  %v843_v4 = vcombine.low %v798_v0, %v799_v1  ;;  %v842_v17 = vcombine.low %v834_v9, %v841_v10 }
 0x2d8   :  { %v851_v12 = vrot.slane %v843_v4, %v1960_v13 }
 0x2d9   :  { %v752_v5 = vpop.permute.xlu1 %751  ;;  %v750_v6 = vpop.permute.xlu0 %749  ;;  %v800_v7 = vld [vmem:[%s2649_s9 + $0xc] sm:$0x3]  ;;  %v801_v8 = vld [vmem:[%s2649_s9 + $0xe] sm:$0x3] }
 0x2da   :  { %789 = vst.msk [vmem:[%s2649_s9 + $0x16] sm:$0x3] %vm777_vm5, %v752_v5  ;;  %788 = vst.msk [vmem:[%s2649_s9 + $0x14] sm:$0x3] %vm777_vm5, %v750_v6  ;;  %v844_v11 = vcombine.low %v800_v7, %v801_v8 }
 0x2dc   :  { %v858_v14 = vrot.slane %v844_v11, %v1960_v13 }
 0x2dd   :  { %v756_v15 = vpop.permute.xlu1 %755  ;;  %v754_v16 = vpop.permute.xlu0 %753  ;;  %v802_v24 = vld [vmem:[%s2649_s9 + $0x10] sm:$0x3]  ;;  %v803_v25 = vld [vmem:[%s2649_s9 + $0x12] sm:$0x3] }
 0x2de   :  { %791 = vst.msk [vmem:[%s2649_s9 + $0x1a] sm:$0x3] %vm777_vm5, %v756_v15  ;;  %790 = vst.msk [vmem:[%s2649_s9 + $0x18] sm:$0x3] %vm777_vm5, %v754_v16  ;;  %v859_v18 = vcombine.low %v851_v12, %v858_v14  ;;  %v860_v29 = vcombine.low %v802_v24, %v803_v25  ;;  %v2444_v24 = vld [vmem:[%s2647_s7 + $0x8] sm:$0xf] }
 0x2df   :  { %v2449_v25 = vld [vmem:[%s2647_s7 + $0xc] sm:$0xf] }
 0x2e0   :  { %v898_v19 = vpack.c.bf16 %v859_v18, %v842_v17  ;;  %v868_v35 = vrot.slane %v860_v29, %v1960_v13  ;;  %v2412_v17 = vld [vmem:[%s2646_s6] sm:$0xf]  ;;  %v2417_v18 = vld [vmem:[%s2646_s6 + $0x4] sm:$0xf] }
 0x2e1   :  { %v760_v20 = vpop.permute.xlu1 %759  ;;  %v758_v21 = vpop.permute.xlu0 %757  ;;  %v804_v22 = vld [vmem:[%s2649_s9 + $0x14] sm:$0x3]  ;;  %v805_v23 = vld [vmem:[%s2649_s9 + $0x16] sm:$0x3] }
 0x2e2   :  { %793 = vst.msk [vmem:[%s2649_s9 + $0x1e] sm:$0x3] %vm777_vm5, %v760_v20  ;;  %792 = vst.msk [vmem:[%s2649_s9 + $0x1c] sm:$0x3] %vm777_vm5, %v758_v21  ;;  %1739 = vmatprep.mubr.msk.bf16.mxu0 %vm939_vm6, %v898_v19  ;;  %v861_v28 = vcombine.low %v804_v22, %v805_v23  ;;  %v2422_v19 = vld [vmem:[%s2646_s6 + $0x8] sm:$0xf] }
 0x2e3   :  { %v2429_v21 = vld [vmem:[%s2646_s6 + $0xc] sm:$0xf]  ;;  %v2434_v22 = vld [vmem:[%s2647_s7] sm:$0xf]  ;;  %v2439_v23 = vld [vmem:[%s2647_s7 + $0x4] sm:$0xf] }
 0x2e4   :  { %v875_v33 = vrot.slane %v861_v28, %v1960_v13  ;;  %s2478_s6 = smov 0  }
 0x2e5   :  { %v806_v26 = vld [vmem:[%s2649_s9 + $0x18] sm:$0x3]  ;;  %v807_v27 = vld [vmem:[%s2649_s9 + $0x1a] sm:$0x3] }
 0x2e6   :  { %v877_v30 = vcombine.low %v806_v26, %v807_v27  ;;  %v876_v38 = vcombine.low %v868_v35, %v875_v33 }
 0x2e8   :  { %v885_v36 = vrot.slane %v877_v30, %v1960_v13 }
 0x2e9   :  { %v808_v31 = vld [vmem:[%s2649_s9 + $0x1c] sm:$0x3]  ;;  %v809_v32 = vld [vmem:[%s2649_s9 + $0x1e] sm:$0x3] }
 0x2ea   :  { %v878_v34 = vcombine.low %v808_v31, %v809_v32 }
 0x2ec   :  { %v892_v37 = vrot.slane %v878_v34, %v1960_v13 }
 0x2ee   :  { %v893_v39 = vcombine.low %v885_v36, %v892_v37 }
 0x2f0   :  { %v899_v40 = vpack.c.bf16 %v893_v39, %v876_v38 }
 0x2f2   :  { %1740 = vmatmul.mubr.msk.bf16.vlgmr.msra.gmra.mxu0 %vm939_vm6, %v899_v40 }
 0x3b2   :  { %v1741_v42 = vpop.f32.mrf.mxu0 }
 0x3b3   :  { %v989_v43 = vadd.f32 %v1741_v42, %v1661_v41 }
 0x3b4   :  { %v980_v44 = vpop.f32.mrf.mxu0 }
 0x3b5   :  { %v1033_v45 = vcombine.high %v989_v43, %v989_v43  ;;  %v1040_v46 = vrot.slane %v989_v43, %v1960_v13  ;;  %v981_v47 = vadd.f32 %v1661_v41, %v980_v44 }
 0x3b6   :  { %v1742_v48 = vpop.f32.mrf.mxu0 }
 0x3b7   :  { %v1047_v49 = vrot.slane %v1033_v45, %v1960_v13  ;;  %1091 = vst.msk [vmem:[#allocation2 + $0x10] sm:$0x3] %vm330_vm2, %v1040_v46  ;;  %v999_v50 = vcombine.high %v981_v47, %v981_v47  ;;  %v1006_v51 = vrot.slane %v981_v47, %v1960_v13  ;;  %v992_v52 = vadd.f32 %v1742_v48, %v1661_v41 }
 0x3b8   :  { %v983_v53 = vpop.f32.mrf.mxu0  ;;  %v1161_v54 = vrot.slane %v1040_v46, %v1960_v13  ;;  %v1048_v55 = vcombine.high %v1040_v46, %v1040_v46  ;;  %v1869_v46 = vmov 0   ;;  %v1873_v47 = vmov 0  }
 0x3b9   :  { %1093 = vst.msk [vmem:[#allocation2 + $0x14] sm:$0x3] %vm330_vm2, %v1047_v49  ;;  %v1013_v56 = vrot.slane %v999_v50, %v1960_v13  ;;  %1083 = vst.msk [vmem:[#allocation2] sm:$0x3] %vm330_vm2, %v1006_v51  ;;  %v1050_v57 = vcombine.high %v992_v52, %v992_v52  ;;  %v1057_v58 = vrot.slane %v992_v52, %v1960_v13 }
 0x3ba   :  { %v984_v59 = vadd.f32 %v1661_v41, %v983_v53  ;;  %1227 = vrot.lane.b32.xlu0 %v1161_v54, %s1882_s1  ;;  %v1168_v60 = vrot.slane %v1048_v55, %v1960_v13  ;;  %1092 = vst.msk [vmem:[#allocation2 + $0x12] sm:$0x3] %vm330_vm2, %v1048_v55  ;;  %v1014_v61 = vcombine.high %v1006_v51, %v1006_v51 }
 0x3bb   :  { %1085 = vst.msk [vmem:[#allocation2 + $0x4] sm:$0x3] %vm330_vm2, %v1013_v56  ;;  %v1064_v62 = vrot.slane %v1050_v57, %v1960_v13  ;;  %1095 = vst.msk [vmem:[#allocation2 + $0x18] sm:$0x3] %vm330_vm2, %v1057_v58  ;;  %v1049_v1 = vcombine.high %v1047_v49, %v1047_v49  ;;  %v1105_v2 = vrot.slane %v1006_v51, %v1960_v13 }
 0x3bc   :  { %v1016_v63 = vcombine.high %v984_v59, %v984_v59  ;;  %v1023_v0 = vrot.slane %v984_v59, %v1960_v13  ;;  %1229 = vrot.lane.b32.xlu1 %v1168_v60, %s1882_s1  ;;  %1084 = vst.msk [vmem:[#allocation2 + $0x2] sm:$0x3] %vm330_vm2, %v1014_v61  ;;  %v1015_v3 = vcombine.high %v1013_v56, %v1013_v56 }
 0x3bd   :  { %1097 = vst.msk [vmem:[#allocation2 + $0x1c] sm:$0x3] %vm330_vm2, %v1064_v62  ;;  %1094 = vst.msk [vmem:[#allocation2 + $0x16] sm:$0x3] %vm330_vm2, %v1049_v1  ;;  %v1065_v5 = vcombine.high %v1057_v58, %v1057_v58  ;;  %v1112_v6 = vrot.slane %v1014_v61, %v1960_v13  ;;  %v1066_v8 = vcombine.high %v1064_v62, %v1064_v62 }
 0x3be   :  { %v1030_v4 = vrot.slane %v1016_v63, %v1960_v13  ;;  %1087 = vst.msk [vmem:[#allocation2 + $0x8] sm:$0x3] %vm330_vm2, %v1023_v0  ;;  %1211 = vrot.lane.b32.xlu0 %v1105_v2, %s1882_s1  ;;  %1086 = vst.msk [vmem:[#allocation2 + $0x6] sm:$0x3] %vm330_vm2, %v1015_v3  ;;  %v1031_v7 = vcombine.high %v1023_v0, %v1023_v0  ;;  %v1175_v10 = vrot.slane %v1047_v49, %v1960_v13 }
 0x3bf   :  { %1096 = vst.msk [vmem:[#allocation2 + $0x1a] sm:$0x3] %vm330_vm2, %v1065_v5  ;;  %1098 = vst.msk [vmem:[#allocation2 + $0x1e] sm:$0x3] %vm330_vm2, %v1066_v8  ;;  %v1182_v11 = vrot.slane %v1049_v1, %v1960_v13  ;;  %v1119_v12 = vrot.slane %v1013_v56, %v1960_v13  ;;  %v1126_v14 = vrot.slane %v1015_v3, %v1960_v13 }
 0x3c0   :  { %1089 = vst.msk [vmem:[#allocation2 + $0xc] sm:$0x3] %vm330_vm2, %v1030_v4  ;;  %v1032_v9 = vcombine.high %v1030_v4, %v1030_v4  ;;  %1213 = vrot.lane.b32.xlu1 %v1112_v6, %s1882_s1  ;;  %1088 = vst.msk [vmem:[#allocation2 + $0xa] sm:$0x3] %vm330_vm2, %v1031_v7  ;;  %v1189_v15 = vrot.slane %v1057_v58, %v1960_v13  ;;  %v1196_v16 = vrot.slane %v1065_v5, %v1960_v13 }
 0x3c1   :  { %v1133_v20 = vrot.slane %v1023_v0, %v1960_v13  ;;  %v1140_v26 = vrot.slane %v1031_v7, %v1960_v13  ;;  %v1147_v27 = vrot.slane %v1030_v4, %v1960_v13  ;;  %v1203_v29 = vrot.slane %v1064_v62, %v1960_v13 }
 0x3c2   :  { %1090 = vst.msk [vmem:[#allocation2 + $0xe] sm:$0x3] %vm330_vm2, %v1032_v9  ;;  %1231 = vrot.lane.b32.xlu0 %v1175_v10, %s1882_s1  ;;  %v1154_v28 = vrot.slane %v1032_v9, %v1960_v13  ;;  %v1210_v30 = vrot.slane %v1066_v8, %v1960_v13 }
 0x3c4   :  { %1233 = vrot.lane.b32.xlu1 %v1182_v11, %s1882_s1 }
 0x3c6   :  { %1215 = vrot.lane.b32.xlu0 %v1119_v12, %s1882_s1 }
 0x3c8   :  { %1217 = vrot.lane.b32.xlu1 %v1126_v14, %s1882_s1 }
 0x3ca   :  { %1235 = vrot.lane.b32.xlu0 %v1189_v15, %s1882_s1 }
 0x3cc   :  { %1237 = vrot.lane.b32.xlu1 %v1196_v16, %s1882_s1 }
 0x3ce   :  { %1219 = vrot.lane.b32.xlu0 %v1133_v20, %s1882_s1 }
 0x3d0   :  { %1221 = vrot.lane.b32.xlu1 %v1140_v26, %s1882_s1 }
 0x3d2   :  { %1223 = vrot.lane.b32.xlu0 %v1147_v27, %s1882_s1 }
 0x3d4   :  { %1225 = vrot.lane.b32.xlu1 %v1154_v28, %s1882_s1 }
 0x3d6   :  { %1239 = vrot.lane.b32.xlu0 %v1203_v29, %s1882_s1 }
 0x3d8   :  { %1241 = vrot.lane.b32.xlu1 %v1210_v30, %s1882_s1 }
 0x42c   :  { %v1228_v31 = vpop.permute.xlu0 %1227 }
 0x42d   :  { %1267 = vst.msk [vmem:[#allocation3 + $0x10] sm:$0x3] %vm330_vm2, %v1228_v31 }
 0x42e   :  { %v1230_v32 = vpop.permute.xlu1 %1229 }
 0x42f   :  { %1268 = vst.msk [vmem:[#allocation3 + $0x12] sm:$0x3] %vm330_vm2, %v1230_v32 }
 0x430   :  { %v1212_v33 = vpop.permute.xlu0 %1211 }
 0x431   :  { %1259 = vst.msk [vmem:[#allocation3] sm:$0x3] %vm330_vm2, %v1212_v33 }
 0x432   :  { %v1214_v34 = vpop.permute.xlu1 %1213 }
 0x433   :  { %1260 = vst.msk [vmem:[#allocation3 + $0x2] sm:$0x3] %vm330_vm2, %v1214_v34 }
 0x434   :  { %v1232_v35 = vpop.permute.xlu0 %1231 }
 0x435   :  { %1269 = vst.msk [vmem:[#allocation3 + $0x14] sm:$0x3] %vm330_vm2, %v1232_v35 }
 0x436   :  { %v1234_v36 = vpop.permute.xlu1 %1233 }
 0x437   :  { %1270 = vst.msk [vmem:[#allocation3 + $0x16] sm:$0x3] %vm330_vm2, %v1234_v36 }
 0x438   :  { %v1216_v13 = vpop.permute.xlu0 %1215 }
 0x439   :  { %1261 = vst.msk [vmem:[#allocation3 + $0x4] sm:$0x3] %vm330_vm2, %v1216_v13 }
 0x43a   :  { %v1218_v37 = vpop.permute.xlu1 %1217 }
 0x43b   :  { %1262 = vst.msk [vmem:[#allocation3 + $0x6] sm:$0x3] %vm330_vm2, %v1218_v37 }
 0x43c   :  { %v1236_v38 = vpop.permute.xlu0 %1235 }
 0x43d   :  { %1271 = vst.msk [vmem:[#allocation3 + $0x18] sm:$0x3] %vm330_vm2, %v1236_v38 }
 0x43e   :  { %v1238_v39 = vpop.permute.xlu1 %1237 }
 0x43f   :  { %1272 = vst.msk [vmem:[#allocation3 + $0x1a] sm:$0x3] %vm330_vm2, %v1238_v39 }
 0x440   :  { %v1220_v40 = vpop.permute.xlu0 %1219 }
 0x441   :  { %1263 = vst.msk [vmem:[#allocation3 + $0x8] sm:$0x3] %vm330_vm2, %v1220_v40 }
 0x442   :  { %v1222_v41 = vpop.permute.xlu1 %1221 }
 0x443   :  { %1264 = vst.msk [vmem:[#allocation3 + $0xa] sm:$0x3] %vm330_vm2, %v1222_v41 }
 0x444   :  { %v1224_v42 = vpop.permute.xlu0 %1223 }
 0x445   :  { %1265 = vst.msk [vmem:[#allocation3 + $0xc] sm:$0x3] %vm330_vm2, %v1224_v42 }
 0x446   :  { %v1226_v43 = vpop.permute.xlu1 %1225 }
 0x447   :  { %1266 = vst.msk [vmem:[#allocation3 + $0xe] sm:$0x3] %vm330_vm2, %v1226_v43 }
 0x448   :  { %v1240_v44 = vpop.permute.xlu0 %1239 }
 0x449   :  { %1273 = vst.msk [vmem:[#allocation3 + $0x1c] sm:$0x3] %vm330_vm2, %v1240_v44 }
 0x44a   :  { %v1242_v45 = vpop.permute.xlu1 %1241 }
 0x44b   :  { %1274 = vst.msk [vmem:[#allocation3 + $0x1e] sm:$0x3] %vm330_vm2, %v1242_v45 }
 0x44c LB: > { %v1670_v48 = vcombine.low %v2422_v19, %v2429_v21  ;;  %v1674_v49 = vcombine.low %v2444_v24, %v2449_v25  ;;  %v1886_v50 = vmov 0.0   ;;  %v1669_v51 = vcombine.low %v2412_v17, %v2417_v18  ;;  %s1291_s7 = ssub.s32 15, %s1879_s6  ;;  %s1668_s2 = sshll.u32 %s1879_s6, 1  ;;  %s1879_s6 = sphi %s2478_s6, %s1288_s6   ;;  %v1875_v47 = vphi %v1873_v47, %v1415_v47   ;;  %v1871_v46 = vphi %v1869_v46, %v1416_v46  }
 0x44d   : > { %1743 = vmatprep.subr.bf16.mxu0 %v1886_v50  ;;  %1751 = vmatprep.subr.bf16.mxu1 %v1886_v50  ;;  %v1673_v52 = vcombine.low %v2434_v22, %v2439_v23  ;;  %vm1887_vm7 = vmmov 0   ;;  %s1672_s3 = sshll.u32 %s1291_s7, 1  ;;  %s1293_s25 = scalar_lea.vmem [#allocation2], %s1668_s2 }
 0x44e   : > { %1744 = vmatpush3.bf16.msra.mxu0 %v1670_v48  ;;  %1752 = vmatpush3.bf16.msra.mxu1 %v1674_v49  ;;  %v1294_v53 = vld [vmem:[%s1293_s25] sm:$0x3]  ;;  %s1354_s29 = scalar_lea.vmem [#allocation3], %s1672_s3  ;;  %s1288_s6 = sadd.s32 1, %s1879_s6  }
 0x44f   : > { %1745 = vmatprep.subr.bf16.mxu0 %v1886_v50  ;;  %1753 = vmatprep.subr.bf16.mxu1 %v1886_v50  ;;  %p1285_p1 = scmp.ge.s32.totalorder %s1288_s6, 16  }
 0x450   : > { %1747 = vmatprep.mubr.msk.bf16.mxu0 %vm1887_vm7, %v1886_v50  ;;  %1755 = vmatprep.mubr.msk.bf16.mxu1 %vm1887_vm7, %v1886_v50  ;;  %s1888_s26 = smov (%p1285_p1), 64   ;;  %vm1497_vm8 = vcmask (%p1285_p1), 779776   ;;  %vm1594_vm9 = vcmask (%p1285_p1), 1042176  }
 0x452   : > { %1746 = vmatpush3.bf16.msra.mxu0 %v1669_v51  ;;  %1754 = vmatpush3.bf16.msra.mxu1 %v1673_v52  ;;  %v1355_v54 = vld [vmem:[%s1354_s29] sm:$0x3] }
 0x455   : > { %1748 = vmatmul.mubr.msk.bf16.vlgmr.msra.gmra.mxu0 %vm555_vm4, %v1875_v47  ;;  %1756 = vmatmul.mubr.msk.bf16.vlgmr.msra.gmra.mxu1 %vm555_vm4, %v1871_v46 }
 0x515   : > { %v1345_v55 = vpop.f32.mrf.mxu0  ;;  %v1405_v56 = vpop.f32.mrf.mxu1 }
 0x516   : > { %v1351_v57 = vadd.f32 %v1345_v55, %v1294_v53  ;;  %v1411_v58 = vadd.f32 %v1405_v56, %v1355_v54 }
 0x517   : > { %v1749_v59 = vpop.f32.mrf.mxu0  ;;  %v1757_v60 = vpop.f32.mrf.mxu1 }
 0x518   : > { %1829 = vtanh.f32 %v1351_v57 }
 0x519   : > { %1831 = vtanh.f32 %v1411_v58  ;;  %v1348_v61 = vpop.f32.mrf.mxu0  ;;  %v1408_v62 = vpop.f32.mrf.mxu1 }
 0x51b   : > { %v1750_v63 = vpop.f32.mrf.mxu0  ;;  %v1758_v0 = vpop.f32.mrf.mxu1 }
 0x523   :  { %1287 = sbr.rel (!%p1285_p1) target bundleno = 1100 (0x44c), region = 85 }
 0x525   : > { %v1830_v1 = vpop.eup %1829 }
 0x526   : > { %v1832_v2 = vpop.eup %1831  ;;  %1413 = vst.msk [vmem:[%s1293_s25] sm:$0x3] %vm330_vm2, %v1830_v1  ;;  %v1415_v47 = vpack.c.bf16 %v1830_v1, %v1830_v1  }
 0x527   : > { %1414 = vst.msk [vmem:[%s1354_s29] sm:$0x3] %vm330_vm2, %v1832_v2  ;;  %v1416_v46 = vpack.c.bf16 %v1832_v2, %v1832_v2  }
 0x52d   :  { %v1419_v3 = vld [vmem:[#allocation2 + $0x4] sm:$0x3]  ;;  %v1417_v4 = vld [vmem:[#allocation2] sm:$0x3]  ;;  %v1420_v5 = vld [vmem:[#allocation2 + $0x6] sm:$0x3] }
 0x52e   :  { %1453 = vrot.lane.b32.xlu1 %v1419_v3, %s1888_s26  ;;  %1449 = vrot.lane.b32.xlu0 %v1417_v4, %s1888_s26  ;;  %v1418_v6 = vld [vmem:[#allocation2 + $0x2] sm:$0x3]  ;;  %v1422_v7 = vld [vmem:[#allocation2 + $0xa] sm:$0x3]  ;;  %v1421_v8 = vld [vmem:[#allocation2 + $0x8] sm:$0x3] }
 0x52f   :  { %v1424_v9 = vld [vmem:[#allocation2 + $0xe] sm:$0x3]  ;;  %v1423_v10 = vld [vmem:[#allocation2 + $0xc] sm:$0x3]  ;;  %v1426_v11 = vld [vmem:[#allocation2 + $0x12] sm:$0x3] }
 0x530   :  { %v1425_v12 = vld [vmem:[#allocation2 + $0x10] sm:$0x3]  ;;  %v1428_v14 = vld [vmem:[#allocation2 + $0x16] sm:$0x3]  ;;  %v1427_v15 = vld [vmem:[#allocation2 + $0x14] sm:$0x3] }
 0x531   :  { %v1430_v16 = vld [vmem:[#allocation2 + $0x1a] sm:$0x3]  ;;  %v1429_v17 = vld [vmem:[#allocation2 + $0x18] sm:$0x3]  ;;  %v1432_v18 = vld [vmem:[#allocation2 + $0x1e] sm:$0x3] }
 0x532   :  { %1455 = vrot.lane.b32.xlu1 %v1420_v5, %s1888_s26  ;;  %1451 = vrot.lane.b32.xlu0 %v1418_v6, %s1888_s26  ;;  %v1431_v19 = vld [vmem:[#allocation2 + $0x1c] sm:$0x3]  ;;  %v1515_v20 = vld [vmem:[#allocation3 + $0x2] sm:$0x3]  ;;  %v1514_v21 = vld [vmem:[#allocation3] sm:$0x3] }
 0x533   :  { %v1517_v22 = vld [vmem:[#allocation3 + $0x6] sm:$0x3]  ;;  %v1516_v23 = vld [vmem:[#allocation3 + $0x4] sm:$0x3]  ;;  %v1519_v24 = vld [vmem:[#allocation3 + $0xa] sm:$0x3] }
 0x534   :  { %v1518_v25 = vld [vmem:[#allocation3 + $0x8] sm:$0x3]  ;;  %v1521_v26 = vld [vmem:[#allocation3 + $0xe] sm:$0x3]  ;;  %v1520_v27 = vld [vmem:[#allocation3 + $0xc] sm:$0x3] }
 0x535   :  { %v1523_v28 = vld [vmem:[#allocation3 + $0x12] sm:$0x3]  ;;  %v1522_v29 = vld [vmem:[#allocation3 + $0x10] sm:$0x3]  ;;  %v1525_v30 = vld [vmem:[#allocation3 + $0x16] sm:$0x3] }
 0x536   :  { %1459 = vrot.lane.b32.xlu1 %v1422_v7, %s1888_s26  ;;  %1457 = vrot.lane.b32.xlu0 %v1421_v8, %s1888_s26  ;;  %v1524_v31 = vld [vmem:[#allocation3 + $0x14] sm:$0x3]  ;;  %v1527_v32 = vld [vmem:[#allocation3 + $0x1a] sm:$0x3]  ;;  %v1526_v33 = vld [vmem:[#allocation3 + $0x18] sm:$0x3] }
 0x537   :  { %v1529_v34 = vld [vmem:[#allocation3 + $0x1e] sm:$0x3]  ;;  %v1528_v35 = vld [vmem:[#allocation3 + $0x1c] sm:$0x3] }
 0x53a   :  { %1463 = vrot.lane.b32.xlu1 %v1424_v9, %s1888_s26  ;;  %1461 = vrot.lane.b32.xlu0 %v1423_v10, %s1888_s26 }
 0x53e   :  { %1467 = vrot.lane.b32.xlu1 %v1426_v11, %s1888_s26  ;;  %1465 = vrot.lane.b32.xlu0 %v1425_v12, %s1888_s26 }
 0x542   :  { %1471 = vrot.lane.b32.xlu1 %v1428_v14, %s1888_s26  ;;  %1469 = vrot.lane.b32.xlu0 %v1427_v15, %s1888_s26 }
 0x546   :  { %1475 = vrot.lane.b32.xlu1 %v1430_v16, %s1888_s26  ;;  %1473 = vrot.lane.b32.xlu0 %v1429_v17, %s1888_s26 }
 0x54a   :  { %1479 = vrot.lane.b32.xlu1 %v1432_v18, %s1888_s26  ;;  %1477 = vrot.lane.b32.xlu0 %v1431_v19, %s1888_s26 }
 0x54e   :  { %1548 = vrot.lane.b32.xlu1 %v1515_v20, %s1882_s1  ;;  %1546 = vrot.lane.b32.xlu0 %v1514_v21, %s1882_s1 }
 0x552   :  { %1552 = vrot.lane.b32.xlu1 %v1517_v22, %s1882_s1  ;;  %1550 = vrot.lane.b32.xlu0 %v1516_v23, %s1882_s1 }
 0x556   :  { %1556 = vrot.lane.b32.xlu1 %v1519_v24, %s1882_s1  ;;  %1554 = vrot.lane.b32.xlu0 %v1518_v25, %s1882_s1 }
 0x55a   :  { %1560 = vrot.lane.b32.xlu1 %v1521_v26, %s1882_s1  ;;  %1558 = vrot.lane.b32.xlu0 %v1520_v27, %s1882_s1 }
 0x55e   :  { %1564 = vrot.lane.b32.xlu1 %v1523_v28, %s1882_s1  ;;  %1562 = vrot.lane.b32.xlu0 %v1522_v29, %s1882_s1 }
 0x562   :  { %1568 = vrot.lane.b32.xlu1 %v1525_v30, %s1882_s1  ;;  %1566 = vrot.lane.b32.xlu0 %v1524_v31, %s1882_s1 }
 0x566   :  { %1572 = vrot.lane.b32.xlu1 %v1527_v32, %s1882_s1  ;;  %1570 = vrot.lane.b32.xlu0 %v1526_v33, %s1882_s1 }
 0x56a   :  { %1576 = vrot.lane.b32.xlu1 %v1529_v34, %s1882_s1  ;;  %1574 = vrot.lane.b32.xlu0 %v1528_v35, %s1882_s1 }
 0x5a0   :  { %v1454_v36 = vpop.permute.xlu1 %1453  ;;  %v1450_v13 = vpop.permute.xlu0 %1449 }
 0x5a1   :  { %1500 = vst.msk [vmem:[%s2649_s9 + $0x4] sm:$0x3] %vm1497_vm8, %v1454_v36  ;;  %1498 = vst.msk [vmem:[%s2649_s9] sm:$0x3] %vm1497_vm8, %v1450_v13 }
 0x5a4   :  { %v1456_v37 = vpop.permute.xlu1 %1455  ;;  %v1452_v38 = vpop.permute.xlu0 %1451 }
 0x5a5   :  { %1501 = vst.msk [vmem:[%s2649_s9 + $0x6] sm:$0x3] %vm1497_vm8, %v1456_v37  ;;  %1499 = vst.msk [vmem:[%s2649_s9 + $0x2] sm:$0x3] %vm1497_vm8, %v1452_v38 }
 0x5a8   :  { %v1460_v39 = vpop.permute.xlu1 %1459  ;;  %v1458_v40 = vpop.permute.xlu0 %1457 }
 0x5a9   :  { %1503 = vst.msk [vmem:[%s2649_s9 + $0xa] sm:$0x3] %vm1497_vm8, %v1460_v39  ;;  %1502 = vst.msk [vmem:[%s2649_s9 + $0x8] sm:$0x3] %vm1497_vm8, %v1458_v40 }
 0x5ac   :  { %v1464_v41 = vpop.permute.xlu1 %1463  ;;  %v1462_v42 = vpop.permute.xlu0 %1461 }
 0x5ad   :  { %1505 = vst.msk [vmem:[%s2649_s9 + $0xe] sm:$0x3] %vm1497_vm8, %v1464_v41  ;;  %1504 = vst.msk [vmem:[%s2649_s9 + $0xc] sm:$0x3] %vm1497_vm8, %v1462_v42 }
 0x5b0   :  { %v1468_v43 = vpop.permute.xlu1 %1467  ;;  %v1466_v44 = vpop.permute.xlu0 %1465 }
 0x5b1   :  { %1507 = vst.msk [vmem:[%s2649_s9 + $0x12] sm:$0x3] %vm1497_vm8, %v1468_v43  ;;  %1506 = vst.msk [vmem:[%s2649_s9 + $0x10] sm:$0x3] %vm1497_vm8, %v1466_v44 }
 0x5b4   :  { %v1472_v45 = vpop.permute.xlu1 %1471  ;;  %v1470_v46 = vpop.permute.xlu0 %1469 }
 0x5b5   :  { %1509 = vst.msk [vmem:[%s2649_s9 + $0x16] sm:$0x3] %vm1497_vm8, %v1472_v45  ;;  %1508 = vst.msk [vmem:[%s2649_s9 + $0x14] sm:$0x3] %vm1497_vm8, %v1470_v46 }
 0x5b8   :  { %v1476_v47 = vpop.permute.xlu1 %1475  ;;  %v1474_v48 = vpop.permute.xlu0 %1473 }
 0x5b9   :  { %1511 = vst.msk [vmem:[%s2649_s9 + $0x1a] sm:$0x3] %vm1497_vm8, %v1476_v47  ;;  %1510 = vst.msk [vmem:[%s2649_s9 + $0x18] sm:$0x3] %vm1497_vm8, %v1474_v48 }
 0x5bc   :  { %v1480_v49 = vpop.permute.xlu1 %1479  ;;  %v1478_v50 = vpop.permute.xlu0 %1477 }
 0x5bd   :  { %1513 = vst.msk [vmem:[%s2649_s9 + $0x1e] sm:$0x3] %vm1497_vm8, %v1480_v49  ;;  %1512 = vst.msk [vmem:[%s2649_s9 + $0x1c] sm:$0x3] %vm1497_vm8, %v1478_v50 }
 0x5c0   :  { %v1549_v51 = vpop.permute.xlu1 %1548  ;;  %v1547_v52 = vpop.permute.xlu0 %1546 }
 0x5c1   :  { %1596 = vst.msk [vmem:[%s2649_s9 + $0x2] sm:$0x3] %vm1594_vm9, %v1549_v51  ;;  %1595 = vst.msk [vmem:[%s2649_s9] sm:$0x3] %vm1594_vm9, %v1547_v52 }
 0x5c4   :  { %v1553_v53 = vpop.permute.xlu1 %1552  ;;  %v1551_v54 = vpop.permute.xlu0 %1550 }
 0x5c5   :  { %1598 = vst.msk [vmem:[%s2649_s9 + $0x6] sm:$0x3] %vm1594_vm9, %v1553_v53  ;;  %1597 = vst.msk [vmem:[%s2649_s9 + $0x4] sm:$0x3] %vm1594_vm9, %v1551_v54 }
 0x5c8   :  { %v1557_v55 = vpop.permute.xlu1 %1556  ;;  %v1555_v56 = vpop.permute.xlu0 %1554 }
 0x5c9   :  { %1600 = vst.msk [vmem:[%s2649_s9 + $0xa] sm:$0x3] %vm1594_vm9, %v1557_v55  ;;  %1599 = vst.msk [vmem:[%s2649_s9 + $0x8] sm:$0x3] %vm1594_vm9, %v1555_v56 }
 0x5cc   :  { %v1561_v57 = vpop.permute.xlu1 %1560  ;;  %v1559_v58 = vpop.permute.xlu0 %1558 }
 0x5cd   :  { %1602 = vst.msk [vmem:[%s2649_s9 + $0xe] sm:$0x3] %vm1594_vm9, %v1561_v57  ;;  %1601 = vst.msk [vmem:[%s2649_s9 + $0xc] sm:$0x3] %vm1594_vm9, %v1559_v58 }
 0x5d0   :  { %v1565_v59 = vpop.permute.xlu1 %1564  ;;  %v1563_v60 = vpop.permute.xlu0 %1562 }
 0x5d1   :  { %1604 = vst.msk [vmem:[%s2649_s9 + $0x12] sm:$0x3] %vm1594_vm9, %v1565_v59  ;;  %1603 = vst.msk [vmem:[%s2649_s9 + $0x10] sm:$0x3] %vm1594_vm9, %v1563_v60 }
 0x5d4   :  { %v1569_v61 = vpop.permute.xlu1 %1568  ;;  %v1567_v62 = vpop.permute.xlu0 %1566 }
 0x5d5   :  { %1606 = vst.msk [vmem:[%s2649_s9 + $0x16] sm:$0x3] %vm1594_vm9, %v1569_v61  ;;  %1605 = vst.msk [vmem:[%s2649_s9 + $0x14] sm:$0x3] %vm1594_vm9, %v1567_v62 }
 0x5d8   :  { %v1573_v63 = vpop.permute.xlu1 %1572  ;;  %v1571_v0 = vpop.permute.xlu0 %1570 }
 0x5d9   :  { %1608 = vst.msk [vmem:[%s2649_s9 + $0x1a] sm:$0x3] %vm1594_vm9, %v1573_v63  ;;  %1607 = vst.msk [vmem:[%s2649_s9 + $0x18] sm:$0x3] %vm1594_vm9, %v1571_v0 }
 0x5dc   :  { %v1577_v1 = vpop.permute.xlu1 %1576  ;;  %v1575_v2 = vpop.permute.xlu0 %1574 }
 0x5dd   :  { %1610 = vst.msk [vmem:[%s2649_s9 + $0x1e] sm:$0x3] %vm1594_vm9, %v1577_v1  ;;  %1609 = vst.msk [vmem:[%s2649_s9 + $0x1c] sm:$0x3] %vm1594_vm9, %v1575_v2 }

</bundles_post_ra>
